<compile_context>
chip_gen: v7x
topology: tpu7x:2x2x1
jax: 0.10.0
libtpu: 0.0.40
codegen_flags: <defaults>
</compile_context>

<pallas_src>
import numpy as np
import jax
import jax.numpy as jnp
from jax.experimental import pallas as pl
from jax.experimental.pallas import tpu as pltpu

_K = 4  # every ConvTranspose1d in the decoder has kernel_size 4


# ---------------------------------------------------------------- fused kernel

def _make_decoder_kernel(cfgs, batch, n_out_channels, l_final):
    """cfgs: tuple of has_bn flags per layer (static Python config)."""

    def kernel(*refs):
        x_ref, out_ref = refs[0], refs[-1]
        x = x_ref[...]                                   # (Cin0, B)  f32
        ridx = 1
        for has_bn in cfgs:
            w_ref, m_ref = refs[ridx], refs[ridx + 1]
            ridx += 2
            w = w_ref[...]                               # (K*Cout_p, Cin), tap-major
            cout_p = w.shape[0] // _K

            # ---- ConvTranspose1d as two MXU matmuls (batched over samples) ----
            # channel contraction: one matmul for the whole batch
            h = jnp.dot(w, x, preferred_element_type=jnp.float32)      # (K*Cout_p, B*Lin)
            # fuse the K per-tap scatters: lane-concat tap slices, one matmul
            h_cat = jnp.concatenate(
                [h[k * cout_p:(k + 1) * cout_p, :] for k in range(_K)],
                axis=1)                                                 # (Cout_p, K*B*Lin)
            y = jnp.dot(h_cat, m_ref[...],
                        preferred_element_type=jnp.float32)             # (Cout_p, B*Lout)

            if has_bn:
                # BatchNorm1d (batch stats over N and L, biased var) + LeakyReLU(0.2),
                # computed once on the batched tile.
                g_ref, b_ref = refs[ridx], refs[ridx + 1]
                ridx += 2
                mean = jnp.mean(y, axis=1, keepdims=True)               # (Cout, 1)
                var = jnp.mean(jnp.square(y - mean), axis=1, keepdims=True)
                scale = g_ref[...] * jax.lax.rsqrt(var + 1e-5)
                shift = b_ref[...] - mean * scale
                z = y * scale + shift
                x = jnp.where(z > 0, z, 0.2 * z)
            else:
                # final layer: Tanh on the full padded block, slice only at store
                yt = jnp.tanh(y)                                        # (8, B*Lout)
                for b in range(batch):
                    out_ref[b, :, :] = yt[0:n_out_channels,
                                          b * l_final:(b + 1) * l_final]

    return kernel


# ---------------------------------------------------------------- params

def _layer_cfg(nef, n_input, L):
    # (Cin, Cout, stride, pad, has_bn) — mirrors the nn.Sequential in __init__
    return [
        (n_input,  nef * 16, 1, 0, True),
        (nef * 16, nef * 8,  2, 0, True),
        (nef * 8,  nef * 4,  2, 0, True),
        (nef * 4,  nef * 2,  2, 1, True),
        (nef * 2,  nef,      2, 1, True),
        (nef,      L,        2, 1, False),   # final layer: no BN, Tanh after
    ]


def init_decoder_params(key, nef, nz, L, nc, conditional):
    n_input = nz + (nc if conditional else 0)
    params = []
    for (cin, cout, s, p, has_bn) in _layer_cfg(nef, n_input, L):
        key, wk = jax.random.split(key)
        w = 0.02 * jax.random.normal(wk, (cin, cout, _K), jnp.float32)  # torch layout
        # Kernel-side weight: (K*Cout_p, Cin), tap-major.  The final layer's Cout
        # is zero-padded to a multiple of 8 so in-kernel tap slices stay aligned
        # (BN-layer widths 128/64/32/16/8 are already multiples of 8 for nef=8).
        cout_p = cout if has_bn else ((cout + 7) // 8) * 8
        wt = jnp.transpose(w, (2, 1, 0))                                # (K, Cout, Cin)
        if cout_p != cout:
            wt = jnp.pad(wt, ((0, 0), (0, cout_p - cout), (0, 0)))
        wt = wt.reshape(_K * cout_p, cin)
        gamma = jnp.ones((cout, 1), jnp.float32) if has_bn else None
        beta = jnp.zeros((cout, 1), jnp.float32) if has_bn else None
        params.append(dict(w=w, wt=wt, gamma=gamma, beta=beta,
                           cin=cin, cout=cout, cout_p=cout_p,
                           stride=s, pad=p, has_bn=has_bn))
    return params


def _scatter_mask(batch, l_in, l_out, stride, pad):
    """Host-precomputed fused scatter mask for one layer.

    M[k*B*Lin + b*Lin + l, b*Lout + t] = [t == l*stride + k - pad]
    so that (Cout, K*B*Lin) @ M == batched ConvTranspose1d overlap-add.
    """
    m = np.zeros((_K * batch * l_in, batch * l_out), np.float32)
    for k in range(_K):
        for b in range(batch):
            for l in range(l_in):
                t = l * stride + k - pad
                if 0 <= t < l_out:
                    m[k * batch * l_in + b * l_in + l, b * l_out + t] = 1.0
    return jnp.asarray(m)


# ---------------------------------------------------------------- forward

def decoder_forward(params, z, labels=None, conditional=False):
    """Equivalent of Decoder.forward(z, labels); returns PyTorch NCL (B, L, 176)."""
    if conditional:
        z = jnp.concatenate([z, labels], axis=1)              # (B, nz + nc)
    z = z.astype(jnp.float32)
    B = z.shape[0]
    x0 = z.T                                                  # (Cin0, B) — batched on lanes

    vmem = pl.BlockSpec(memory_space=pltpu.MemorySpace.VMEM)
    inputs, in_specs, cfgs = [x0], [vmem], []
    flops, trans, nbytes = 0, 0, x0.size * 4
    l_cur = 1
    for p in params:
        l_in = l_cur
        l_out = (l_in - 1) * p["stride"] - 2 * p["pad"] + _K
        mask = _scatter_mask(B, l_in, l_out, p["stride"], p["pad"])
        inputs += [p["wt"], mask]
        in_specs += [vmem, vmem]
        cfgs.append(p["has_bn"])
        flops += 2 * (_K * p["cout_p"]) * p["cin"] * (B * l_in)       # channel matmul
        flops += 2 * p["cout_p"] * (_K * B * l_in) * (B * l_out)      # fused scatter matmul
        nbytes += (p["wt"].size + mask.size) * 4
        if p["has_bn"]:
            inputs += [p["gamma"], p["beta"]]
            in_specs += [vmem, vmem]
            nbytes += (p["gamma"].size + p["beta"].size) * 4
            trans += p["cout"]                                        # rsqrt per channel
        else:
            trans += B * p["cout_p"] * l_out                          # tanh
        l_cur = l_out
    n_out_c = params[-1]["cout"]
    nbytes += B * n_out_c * l_cur * 4

    kernel = _make_decoder_kernel(tuple(cfgs), B, n_out_c, l_cur)
    return pl.pallas_call(
        kernel,
        out_shape=jax.ShapeDtypeStruct((B, n_out_c, l_cur), jnp.float32),
        in_specs=in_specs,
        out_specs=vmem,
        cost_estimate=pl.CostEstimate(flops=int(flops), transcendentals=int(trans),
                                      bytes_accessed=int(nbytes)),
    )(*inputs)


# ---------------------------------------------------------------- reference

def _decoder_reference(params, z, labels=None, conditional=False):
    """Pure-JAX (XLA) reference with identical math, for correctness checking."""
    if conditional:
        z = jnp.concatenate([z, labels], axis=1)
    x = z.astype(jnp.float32)[:, None, :]                     # NLC (B, 1, Cin)
    for p in params:
        w, s, pad = p["w"], p["stride"], p["pad"]
        B, l_in, _ = x.shape
        _, cout, K = w.shape
        cols = jnp.einsum("blc,cok->blok", x, w)
        l_full = (l_in - 1) * s + K
        y = jnp.zeros((B, l_full, cout), jnp.float32)
        for k in range(K):
            y = y.at[:, k:k + (l_in - 1) * s + 1:s, :].add(cols[:, :, :, k])
        x = y[:, pad:l_full - pad, :]
        if p["has_bn"]:
            mean = jnp.mean(x, axis=(0, 1), keepdims=True)
            var = jnp.mean(jnp.square(x - mean), axis=(0, 1), keepdims=True)
            xn = (x - mean) * jax.lax.rsqrt(var + 1e-5)
            xn = xn * p["gamma"].reshape(1, 1, -1) + p["beta"].reshape(1, 1, -1)
            x = jnp.where(xn > 0, xn, 0.2 * xn)
        else:
            x = jnp.tanh(x)
    return jnp.transpose(x, (0, 2, 1))                        # NCL (B, 6, 176)


# ---------------------------------------------------------------- main

if __name__ == "__main__":
    nef, nz, L, nc = 8, 16, 6, 4
    conditional = True
    B = 2

    key = jax.random.PRNGKey(0)
    key, zk, lk = jax.random.split(key, 3)
    z = jax.random.normal(zk, (B, nz), jnp.float32)
    labels = jax.random.normal(lk, (B, nc), jnp.float32)

    params = init_decoder_params(key, nef, nz, L, nc, conditional)

    out = decoder_forward(params, z, labels, conditional)
    out = jax.block_until_ready(out)

    # output: (B, C=L=6, length=176);  lengths: 1 -> 4 -> 10 -> 22 -> 44 -> 88 -> 176
    assert out.shape == (B, L, 176), out.shape
    assert bool(jnp.all(jnp.isfinite(out)))
    assert bool(jnp.all(jnp.abs(out) <= 1.0))                 # tanh range

    ref = _decoder_reference(params, z, labels, conditional)
    assert bool(jnp.allclose(out, ref, atol=2e-3, rtol=2e-3)), \
        float(jnp.max(jnp.abs(out - ref)))

    print("KERNEL_OK")
</pallas_src>

<mosaic_0001>
module attributes {stable_mosaic.version = 11 : i64} {
  func.func @kernel(%arg0: memref<20x2xf32, #tpu.memory_space<vmem>>, %arg1: memref<512x20xf32, #tpu.memory_space<vmem>>, %arg2: memref<8x8xf32, #tpu.memory_space<vmem>>, %arg3: memref<128x1xf32, #tpu.memory_space<vmem>>, %arg4: memref<128x1xf32, #tpu.memory_space<vmem>>, %arg5: memref<256x128xf32, #tpu.memory_space<vmem>>, %arg6: memref<32x20xf32, #tpu.memory_space<vmem>>, %arg7: memref<64x1xf32, #tpu.memory_space<vmem>>, %arg8: memref<64x1xf32, #tpu.memory_space<vmem>>, %arg9: memref<128x64xf32, #tpu.memory_space<vmem>>, %arg10: memref<80x44xf32, #tpu.memory_space<vmem>>, %arg11: memref<32x1xf32, #tpu.memory_space<vmem>>, %arg12: memref<32x1xf32, #tpu.memory_space<vmem>>, %arg13: memref<64x32xf32, #tpu.memory_space<vmem>>, %arg14: memref<176x88xf32, #tpu.memory_space<vmem>>, %arg15: memref<16x1xf32, #tpu.memory_space<vmem>>, %arg16: memref<16x1xf32, #tpu.memory_space<vmem>>, %arg17: memref<32x16xf32, #tpu.memory_space<vmem>>, %arg18: memref<352x176xf32, #tpu.memory_space<vmem>>, %arg19: memref<8x1xf32, #tpu.memory_space<vmem>>, %arg20: memref<8x1xf32, #tpu.memory_space<vmem>>, %arg21: memref<32x8xf32, #tpu.memory_space<vmem>>, %arg22: memref<704x352xf32, #tpu.memory_space<vmem>>, %arg23: memref<2x6x176xf32, #tpu.memory_space<vmem>>) attributes {dimension_semantics = [], scalar_prefetch = 0 : i64, scratch_operands = 0 : i64, tpu.core_type = #tpu.core_type<tc>} {
    %c0 = arith.constant 0 : index
    %c0_0 = arith.constant 0 : index
    %0 = vector.load %arg0[%c0, %c0_0] : memref<20x2xf32, #tpu.memory_space<vmem>>, vector<20x2xf32>
    %c0_1 = arith.constant 0 : index
    %c0_2 = arith.constant 0 : index
    %1 = vector.load %arg1[%c0_1, %c0_2] : memref<512x20xf32, #tpu.memory_space<vmem>>, vector<512x20xf32>
    %cst = arith.constant dense<0.000000e+00> : vector<512x2xf32>
    %2 = tpu.matmul %1, %0, %cst {dimension_numbers = #tpu.dot_dimension_numbers<[1], [0], [0], [1], [0, 0, 1, 1], [], []>} : vector<512x20xf32>, vector<20x2xf32>, vector<512x2xf32> -> vector<512x2xf32>
    %3 = vector.extract_strided_slice %2 {offsets = [0, 0], sizes = [128, 2], strides = [1, 1]} : vector<512x2xf32> to vector<128x2xf32>
    %4 = vector.extract_strided_slice %2 {offsets = [128, 0], sizes = [128, 2], strides = [1, 1]} : vector<512x2xf32> to vector<128x2xf32>
    %5 = vector.extract_strided_slice %2 {offsets = [256, 0], sizes = [128, 2], strides = [1, 1]} : vector<512x2xf32> to vector<128x2xf32>
    %6 = vector.extract_strided_slice %2 {offsets = [384, 0], sizes = [128, 2], strides = [1, 1]} : vector<512x2xf32> to vector<128x2xf32>
    %7 = tpu.concatenate %3, %4, %5, %6 in 1 : vector<128x2xf32>, vector<128x2xf32>, vector<128x2xf32>, vector<128x2xf32> -> vector<128x8xf32>
    %c0_3 = arith.constant 0 : index
    %c0_4 = arith.constant 0 : index
    %8 = vector.load %arg2[%c0_3, %c0_4] : memref<8x8xf32, #tpu.memory_space<vmem>>, vector<8x8xf32>
    %cst_5 = arith.constant dense<0.000000e+00> : vector<128x8xf32>
    %9 = tpu.matmul %7, %8, %cst_5 {dimension_numbers = #tpu.dot_dimension_numbers<[1], [0], [0], [1], [0, 0, 1, 1], [], []>} : vector<128x8xf32>, vector<8x8xf32>, vector<128x8xf32> -> vector<128x8xf32>
    %cst_6 = arith.constant dense<0.000000e+00> : vector<128xf32>
    %10 = vector.multi_reduction <add>, %9, %cst_6 [1] : vector<128x8xf32> to vector<128xf32>
    %11 = vector.shape_cast %10 : vector<128xf32> to vector<128x1xf32>
    %cst_7 = arith.constant 8.000000e+00 : f32
    %12 = vector.broadcast %cst_7 : f32 to vector<128x1xf32>
    %13 = arith.divf %11, %12 : vector<128x1xf32>
    %14 = vector.broadcast %13 : vector<128x1xf32> to vector<128x8xf32>
    %15 = arith.subf %9, %14 : vector<128x8xf32>
    %16 = arith.mulf %15, %15 : vector<128x8xf32>
    %cst_8 = arith.constant dense<0.000000e+00> : vector<128xf32>
    %17 = vector.multi_reduction <add>, %16, %cst_8 [1] : vector<128x8xf32> to vector<128xf32>
    %18 = vector.shape_cast %17 : vector<128xf32> to vector<128x1xf32>
    %cst_9 = arith.constant 8.000000e+00 : f32
    %19 = vector.broadcast %cst_9 : f32 to vector<128x1xf32>
    %20 = arith.divf %18, %19 : vector<128x1xf32>
    %c0_10 = arith.constant 0 : index
    %c0_11 = arith.constant 0 : index
    %21 = vector.load %arg3[%c0_10, %c0_11] : memref<128x1xf32, #tpu.memory_space<vmem>>, vector<128x1xf32>
    %cst_12 = arith.constant 9.99999974E-6 : f32
    %22 = vector.broadcast %cst_12 : f32 to vector<128x1xf32>
    %23 = arith.addf %20, %22 : vector<128x1xf32>
    %24 = math.rsqrt %23 : vector<128x1xf32>
    %25 = arith.mulf %21, %24 : vector<128x1xf32>
    %c0_13 = arith.constant 0 : index
    %c0_14 = arith.constant 0 : index
    %26 = vector.load %arg4[%c0_13, %c0_14] : memref<128x1xf32, #tpu.memory_space<vmem>>, vector<128x1xf32>
    %27 = arith.mulf %13, %25 : vector<128x1xf32>
    %28 = arith.subf %26, %27 : vector<128x1xf32>
    %29 = vector.broadcast %25 : vector<128x1xf32> to vector<128x8xf32>
    %30 = arith.mulf %9, %29 : vector<128x8xf32>
    %31 = vector.broadcast %28 : vector<128x1xf32> to vector<128x8xf32>
    %32 = arith.addf %30, %31 : vector<128x8xf32>
    %cst_15 = arith.constant 0.000000e+00 : f32
    %33 = vector.broadcast %cst_15 : f32 to vector<128x8xf32>
    %34 = arith.cmpf ogt, %32, %33 : vector<128x8xf32>
    %cst_16 = arith.constant 2.000000e-01 : f32
    %35 = vector.broadcast %cst_16 : f32 to vector<128x8xf32>
    %36 = arith.mulf %35, %32 : vector<128x8xf32>
    %37 = arith.select %34, %32, %36 : vector<128x8xi1>, vector<128x8xf32>
    %c0_17 = arith.constant 0 : index
    %c0_18 = arith.constant 0 : index
    %38 = vector.load %arg5[%c0_17, %c0_18] : memref<256x128xf32, #tpu.memory_space<vmem>>, vector<256x128xf32>
    %cst_19 = arith.constant dense<0.000000e+00> : vector<256x8xf32>
    %39 = tpu.matmul %38, %37, %cst_19 {dimension_numbers = #tpu.dot_dimension_numbers<[1], [0], [0], [1], [0, 0, 1, 1], [], []>} : vector<256x128xf32>, vector<128x8xf32>, vector<256x8xf32> -> vector<256x8xf32>
    %40 = vector.extract_strided_slice %39 {offsets = [0, 0], sizes = [64, 8], strides = [1, 1]} : vector<256x8xf32> to vector<64x8xf32>
    %41 = vector.extract_strided_slice %39 {offsets = [64, 0], sizes = [64, 8], strides = [1, 1]} : vector<256x8xf32> to vector<64x8xf32>
    %42 = vector.extract_strided_slice %39 {offsets = [128, 0], sizes = [64, 8], strides = [1, 1]} : vector<256x8xf32> to vector<64x8xf32>
    %43 = vector.extract_strided_slice %39 {offsets = [192, 0], sizes = [64, 8], strides = [1, 1]} : vector<256x8xf32> to vector<64x8xf32>
    %44 = tpu.concatenate %40, %41, %42, %43 in 1 : vector<64x8xf32>, vector<64x8xf32>, vector<64x8xf32>, vector<64x8xf32> -> vector<64x32xf32>
    %c0_20 = arith.constant 0 : index
    %c0_21 = arith.constant 0 : index
    %45 = vector.load %arg6[%c0_20, %c0_21] : memref<32x20xf32, #tpu.memory_space<vmem>>, vector<32x20xf32>
    %cst_22 = arith.constant dense<0.000000e+00> : vector<64x20xf32>
    %46 = tpu.matmul %44, %45, %cst_22 {dimension_numbers = #tpu.dot_dimension_numbers<[1], [0], [0], [1], [0, 0, 1, 1], [], []>} : vector<64x32xf32>, vector<32x20xf32>, vector<64x20xf32> -> vector<64x20xf32>
    %cst_23 = arith.constant dense<0.000000e+00> : vector<64xf32>
    %47 = vector.multi_reduction <add>, %46, %cst_23 [1] : vector<64x20xf32> to vector<64xf32>
    %48 = vector.shape_cast %47 : vector<64xf32> to vector<64x1xf32>
    %cst_24 = arith.constant 2.000000e+01 : f32
    %49 = vector.broadcast %cst_24 : f32 to vector<64x1xf32>
    %50 = arith.divf %48, %49 : vector<64x1xf32>
    %51 = vector.broadcast %50 : vector<64x1xf32> to vector<64x20xf32>
    %52 = arith.subf %46, %51 : vector<64x20xf32>
    %53 = arith.mulf %52, %52 : vector<64x20xf32>
    %cst_25 = arith.constant dense<0.000000e+00> : vector<64xf32>
    %54 = vector.multi_reduction <add>, %53, %cst_25 [1] : vector<64x20xf32> to vector<64xf32>
    %55 = vector.shape_cast %54 : vector<64xf32> to vector<64x1xf32>
    %cst_26 = arith.constant 2.000000e+01 : f32
    %56 = vector.broadcast %cst_26 : f32 to vector<64x1xf32>
    %57 = arith.divf %55, %56 : vector<64x1xf32>
    %c0_27 = arith.constant 0 : index
    %c0_28 = arith.constant 0 : index
    %58 = vector.load %arg7[%c0_27, %c0_28] : memref<64x1xf32, #tpu.memory_space<vmem>>, vector<64x1xf32>
    %cst_29 = arith.constant 9.99999974E-6 : f32
    %59 = vector.broadcast %cst_29 : f32 to vector<64x1xf32>
    %60 = arith.addf %57, %59 : vector<64x1xf32>
    %61 = math.rsqrt %60 : vector<64x1xf32>
    %62 = arith.mulf %58, %61 : vector<64x1xf32>
    %c0_30 = arith.constant 0 : index
    %c0_31 = arith.constant 0 : index
    %63 = vector.load %arg8[%c0_30, %c0_31] : memref<64x1xf32, #tpu.memory_space<vmem>>, vector<64x1xf32>
    %64 = arith.mulf %50, %62 : vector<64x1xf32>
    %65 = arith.subf %63, %64 : vector<64x1xf32>
    %66 = vector.broadcast %62 : vector<64x1xf32> to vector<64x20xf32>
    %67 = arith.mulf %46, %66 : vector<64x20xf32>
    %68 = vector.broadcast %65 : vector<64x1xf32> to vector<64x20xf32>
    %69 = arith.addf %67, %68 : vector<64x20xf32>
    %cst_32 = arith.constant 0.000000e+00 : f32
    %70 = vector.broadcast %cst_32 : f32 to vector<64x20xf32>
    %71 = arith.cmpf ogt, %69, %70 : vector<64x20xf32>
    %cst_33 = arith.constant 2.000000e-01 : f32
    %72 = vector.broadcast %cst_33 : f32 to vector<64x20xf32>
    %73 = arith.mulf %72, %69 : vector<64x20xf32>
    %74 = arith.select %71, %69, %73 : vector<64x20xi1>, vector<64x20xf32>
    %c0_34 = arith.constant 0 : index
    %c0_35 = arith.constant 0 : index
    %75 = vector.load %arg9[%c0_34, %c0_35] : memref<128x64xf32, #tpu.memory_space<vmem>>, vector<128x64xf32>
    %cst_36 = arith.constant dense<0.000000e+00> : vector<128x20xf32>
    %76 = tpu.matmul %75, %74, %cst_36 {dimension_numbers = #tpu.dot_dimension_numbers<[1], [0], [0], [1], [0, 0, 1, 1], [], []>} : vector<128x64xf32>, vector<64x20xf32>, vector<128x20xf32> -> vector<128x20xf32>
    %77 = vector.extract_strided_slice %76 {offsets = [0, 0], sizes = [32, 20], strides = [1, 1]} : vector<128x20xf32> to vector<32x20xf32>
    %78 = vector.extract_strided_slice %76 {offsets = [32, 0], sizes = [32, 20], strides = [1, 1]} : vector<128x20xf32> to vector<32x20xf32>
    %79 = vector.extract_strided_slice %76 {offsets = [64, 0], sizes = [32, 20], strides = [1, 1]} : vector<128x20xf32> to vector<32x20xf32>
    %80 = vector.extract_strided_slice %76 {offsets = [96, 0], sizes = [32, 20], strides = [1, 1]} : vector<128x20xf32> to vector<32x20xf32>
    %81 = tpu.concatenate %77, %78, %79, %80 in 1 : vector<32x20xf32>, vector<32x20xf32>, vector<32x20xf32>, vector<32x20xf32> -> vector<32x80xf32>
    %c0_37 = arith.constant 0 : index
    %c0_38 = arith.constant 0 : index
    %82 = vector.load %arg10[%c0_37, %c0_38] : memref<80x44xf32, #tpu.memory_space<vmem>>, vector<80x44xf32>
    %cst_39 = arith.constant dense<0.000000e+00> : vector<32x44xf32>
    %83 = tpu.matmul %81, %82, %cst_39 {dimension_numbers = #tpu.dot_dimension_numbers<[1], [0], [0], [1], [0, 0, 1, 1], [], []>} : vector<32x80xf32>, vector<80x44xf32>, vector<32x44xf32> -> vector<32x44xf32>
    %cst_40 = arith.constant dense<0.000000e+00> : vector<32xf32>
    %84 = vector.multi_reduction <add>, %83, %cst_40 [1] : vector<32x44xf32> to vector<32xf32>
    %85 = vector.shape_cast %84 : vector<32xf32> to vector<32x1xf32>
    %cst_41 = arith.constant 4.400000e+01 : f32
    %86 = vector.broadcast %cst_41 : f32 to vector<32x1xf32>
    %87 = arith.divf %85, %86 : vector<32x1xf32>
    %88 = vector.broadcast %87 : vector<32x1xf32> to vector<32x44xf32>
    %89 = arith.subf %83, %88 : vector<32x44xf32>
    %90 = arith.mulf %89, %89 : vector<32x44xf32>
    %cst_42 = arith.constant dense<0.000000e+00> : vector<32xf32>
    %91 = vector.multi_reduction <add>, %90, %cst_42 [1] : vector<32x44xf32> to vector<32xf32>
    %92 = vector.shape_cast %91 : vector<32xf32> to vector<32x1xf32>
    %cst_43 = arith.constant 4.400000e+01 : f32
    %93 = vector.broadcast %cst_43 : f32 to vector<32x1xf32>
    %94 = arith.divf %92, %93 : vector<32x1xf32>
    %c0_44 = arith.constant 0 : index
    %c0_45 = arith.constant 0 : index
    %95 = vector.load %arg11[%c0_44, %c0_45] : memref<32x1xf32, #tpu.memory_space<vmem>>, vector<32x1xf32>
    %cst_46 = arith.constant 9.99999974E-6 : f32
    %96 = vector.broadcast %cst_46 : f32 to vector<32x1xf32>
    %97 = arith.addf %94, %96 : vector<32x1xf32>
    %98 = math.rsqrt %97 : vector<32x1xf32>
    %99 = arith.mulf %95, %98 : vector<32x1xf32>
    %c0_47 = arith.constant 0 : index
    %c0_48 = arith.constant 0 : index
    %100 = vector.load %arg12[%c0_47, %c0_48] : memref<32x1xf32, #tpu.memory_space<vmem>>, vector<32x1xf32>
    %101 = arith.mulf %87, %99 : vector<32x1xf32>
    %102 = arith.subf %100, %101 : vector<32x1xf32>
    %103 = vector.broadcast %99 : vector<32x1xf32> to vector<32x44xf32>
    %104 = arith.mulf %83, %103 : vector<32x44xf32>
    %105 = vector.broadcast %102 : vector<32x1xf32> to vector<32x44xf32>
    %106 = arith.addf %104, %105 : vector<32x44xf32>
    %cst_49 = arith.constant 0.000000e+00 : f32
    %107 = vector.broadcast %cst_49 : f32 to vector<32x44xf32>
    %108 = arith.cmpf ogt, %106, %107 : vector<32x44xf32>
    %cst_50 = arith.constant 2.000000e-01 : f32
    %109 = vector.broadcast %cst_50 : f32 to vector<32x44xf32>
    %110 = arith.mulf %109, %106 : vector<32x44xf32>
    %111 = arith.select %108, %106, %110 : vector<32x44xi1>, vector<32x44xf32>
    %c0_51 = arith.constant 0 : index
    %c0_52 = arith.constant 0 : index
    %112 = vector.load %arg13[%c0_51, %c0_52] : memref<64x32xf32, #tpu.memory_space<vmem>>, vector<64x32xf32>
    %cst_53 = arith.constant dense<0.000000e+00> : vector<64x44xf32>
    %113 = tpu.matmul %112, %111, %cst_53 {dimension_numbers = #tpu.dot_dimension_numbers<[1], [0], [0], [1], [0, 0, 1, 1], [], []>} : vector<64x32xf32>, vector<32x44xf32>, vector<64x44xf32> -> vector<64x44xf32>
    %114 = vector.extract_strided_slice %113 {offsets = [0, 0], sizes = [16, 44], strides = [1, 1]} : vector<64x44xf32> to vector<16x44xf32>
    %115 = vector.extract_strided_slice %113 {offsets = [16, 0], sizes = [16, 44], strides = [1, 1]} : vector<64x44xf32> to vector<16x44xf32>
    %116 = vector.extract_strided_slice %113 {offsets = [32, 0], sizes = [16, 44], strides = [1, 1]} : vector<64x44xf32> to vector<16x44xf32>
    %117 = vector.extract_strided_slice %113 {offsets = [48, 0], sizes = [16, 44], strides = [1, 1]} : vector<64x44xf32> to vector<16x44xf32>
    %118 = tpu.concatenate %114, %115, %116, %117 in 1 : vector<16x44xf32>, vector<16x44xf32>, vector<16x44xf32>, vector<16x44xf32> -> vector<16x176xf32>
    %c0_54 = arith.constant 0 : index
    %c0_55 = arith.constant 0 : index
    %119 = vector.load %arg14[%c0_54, %c0_55] : memref<176x88xf32, #tpu.memory_space<vmem>>, vector<176x88xf32>
    %cst_56 = arith.constant dense<0.000000e+00> : vector<16x88xf32>
    %120 = tpu.matmul %118, %119, %cst_56 {dimension_numbers = #tpu.dot_dimension_numbers<[1], [0], [0], [1], [0, 0, 1, 1], [], []>} : vector<16x176xf32>, vector<176x88xf32>, vector<16x88xf32> -> vector<16x88xf32>
    %cst_57 = arith.constant dense<0.000000e+00> : vector<16xf32>
    %121 = vector.multi_reduction <add>, %120, %cst_57 [1] : vector<16x88xf32> to vector<16xf32>
    %122 = vector.shape_cast %121 : vector<16xf32> to vector<16x1xf32>
    %cst_58 = arith.constant 8.800000e+01 : f32
    %123 = vector.broadcast %cst_58 : f32 to vector<16x1xf32>
    %124 = arith.divf %122, %123 : vector<16x1xf32>
    %125 = vector.broadcast %124 : vector<16x1xf32> to vector<16x88xf32>
    %126 = arith.subf %120, %125 : vector<16x88xf32>
    %127 = arith.mulf %126, %126 : vector<16x88xf32>
    %cst_59 = arith.constant dense<0.000000e+00> : vector<16xf32>
    %128 = vector.multi_reduction <add>, %127, %cst_59 [1] : vector<16x88xf32> to vector<16xf32>
    %129 = vector.shape_cast %128 : vector<16xf32> to vector<16x1xf32>
    %cst_60 = arith.constant 8.800000e+01 : f32
    %130 = vector.broadcast %cst_60 : f32 to vector<16x1xf32>
    %131 = arith.divf %129, %130 : vector<16x1xf32>
    %c0_61 = arith.constant 0 : index
    %c0_62 = arith.constant 0 : index
    %132 = vector.load %arg15[%c0_61, %c0_62] : memref<16x1xf32, #tpu.memory_space<vmem>>, vector<16x1xf32>
    %cst_63 = arith.constant 9.99999974E-6 : f32
    %133 = vector.broadcast %cst_63 : f32 to vector<16x1xf32>
    %134 = arith.addf %131, %133 : vector<16x1xf32>
    %135 = math.rsqrt %134 : vector<16x1xf32>
    %136 = arith.mulf %132, %135 : vector<16x1xf32>
    %c0_64 = arith.constant 0 : index
    %c0_65 = arith.constant 0 : index
    %137 = vector.load %arg16[%c0_64, %c0_65] : memref<16x1xf32, #tpu.memory_space<vmem>>, vector<16x1xf32>
    %138 = arith.mulf %124, %136 : vector<16x1xf32>
    %139 = arith.subf %137, %138 : vector<16x1xf32>
    %140 = vector.broadcast %136 : vector<16x1xf32> to vector<16x88xf32>
    %141 = arith.mulf %120, %140 : vector<16x88xf32>
    %142 = vector.broadcast %139 : vector<16x1xf32> to vector<16x88xf32>
    %143 = arith.addf %141, %142 : vector<16x88xf32>
    %cst_66 = arith.constant 0.000000e+00 : f32
    %144 = vector.broadcast %cst_66 : f32 to vector<16x88xf32>
    %145 = arith.cmpf ogt, %143, %144 : vector<16x88xf32>
    %cst_67 = arith.constant 2.000000e-01 : f32
    %146 = vector.broadcast %cst_67 : f32 to vector<16x88xf32>
    %147 = arith.mulf %146, %143 : vector<16x88xf32>
    %148 = arith.select %145, %143, %147 : vector<16x88xi1>, vector<16x88xf32>
    %c0_68 = arith.constant 0 : index
    %c0_69 = arith.constant 0 : index
    %149 = vector.load %arg17[%c0_68, %c0_69] : memref<32x16xf32, #tpu.memory_space<vmem>>, vector<32x16xf32>
    %cst_70 = arith.constant dense<0.000000e+00> : vector<32x88xf32>
    %150 = tpu.matmul %149, %148, %cst_70 {dimension_numbers = #tpu.dot_dimension_numbers<[1], [0], [0], [1], [0, 0, 1, 1], [], []>} : vector<32x16xf32>, vector<16x88xf32>, vector<32x88xf32> -> vector<32x88xf32>
    %151 = vector.extract_strided_slice %150 {offsets = [0, 0], sizes = [8, 88], strides = [1, 1]} : vector<32x88xf32> to vector<8x88xf32>
    %152 = vector.extract_strided_slice %150 {offsets = [8, 0], sizes = [8, 88], strides = [1, 1]} : vector<32x88xf32> to vector<8x88xf32>
    %153 = vector.extract_strided_slice %150 {offsets = [16, 0], sizes = [8, 88], strides = [1, 1]} : vector<32x88xf32> to vector<8x88xf32>
    %154 = vector.extract_strided_slice %150 {offsets = [24, 0], sizes = [8, 88], strides = [1, 1]} : vector<32x88xf32> to vector<8x88xf32>
    %155 = tpu.concatenate %151, %152, %153, %154 in 1 : vector<8x88xf32>, vector<8x88xf32>, vector<8x88xf32>, vector<8x88xf32> -> vector<8x352xf32>
    %c0_71 = arith.constant 0 : index
    %c0_72 = arith.constant 0 : index
    %156 = vector.load %arg18[%c0_71, %c0_72] : memref<352x176xf32, #tpu.memory_space<vmem>>, vector<352x176xf32>
    %cst_73 = arith.constant dense<0.000000e+00> : vector<8x176xf32>
    %157 = tpu.matmul %155, %156, %cst_73 {dimension_numbers = #tpu.dot_dimension_numbers<[1], [0], [0], [1], [0, 0, 1, 1], [], []>} : vector<8x352xf32>, vector<352x176xf32>, vector<8x176xf32> -> vector<8x176xf32>
    %cst_74 = arith.constant dense<0.000000e+00> : vector<8xf32>
    %158 = vector.multi_reduction <add>, %157, %cst_74 [1] : vector<8x176xf32> to vector<8xf32>
    %159 = vector.shape_cast %158 : vector<8xf32> to vector<8x1xf32>
    %cst_75 = arith.constant 1.760000e+02 : f32
    %160 = vector.broadcast %cst_75 : f32 to vector<8x1xf32>
    %161 = arith.divf %159, %160 : vector<8x1xf32>
    %162 = vector.broadcast %161 : vector<8x1xf32> to vector<8x176xf32>
    %163 = arith.subf %157, %162 : vector<8x176xf32>
    %164 = arith.mulf %163, %163 : vector<8x176xf32>
    %cst_76 = arith.constant dense<0.000000e+00> : vector<8xf32>
    %165 = vector.multi_reduction <add>, %164, %cst_76 [1] : vector<8x176xf32> to vector<8xf32>
    %166 = vector.shape_cast %165 : vector<8xf32> to vector<8x1xf32>
    %cst_77 = arith.constant 1.760000e+02 : f32
    %167 = vector.broadcast %cst_77 : f32 to vector<8x1xf32>
    %168 = arith.divf %166, %167 : vector<8x1xf32>
    %c0_78 = arith.constant 0 : index
    %c0_79 = arith.constant 0 : index
    %169 = vector.load %arg19[%c0_78, %c0_79] : memref<8x1xf32, #tpu.memory_space<vmem>>, vector<8x1xf32>
    %cst_80 = arith.constant 9.99999974E-6 : f32
    %170 = vector.broadcast %cst_80 : f32 to vector<8x1xf32>
    %171 = arith.addf %168, %170 : vector<8x1xf32>
    %172 = math.rsqrt %171 : vector<8x1xf32>
    %173 = arith.mulf %169, %172 : vector<8x1xf32>
    %c0_81 = arith.constant 0 : index
    %c0_82 = arith.constant 0 : index
    %174 = vector.load %arg20[%c0_81, %c0_82] : memref<8x1xf32, #tpu.memory_space<vmem>>, vector<8x1xf32>
    %175 = arith.mulf %161, %173 : vector<8x1xf32>
    %176 = arith.subf %174, %175 : vector<8x1xf32>
    %177 = vector.broadcast %173 : vector<8x1xf32> to vector<8x176xf32>
    %178 = arith.mulf %157, %177 : vector<8x176xf32>
    %179 = vector.broadcast %176 : vector<8x1xf32> to vector<8x176xf32>
    %180 = arith.addf %178, %179 : vector<8x176xf32>
    %cst_83 = arith.constant 0.000000e+00 : f32
    %181 = vector.broadcast %cst_83 : f32 to vector<8x176xf32>
    %182 = arith.cmpf ogt, %180, %181 : vector<8x176xf32>
    %cst_84 = arith.constant 2.000000e-01 : f32
    %183 = vector.broadcast %cst_84 : f32 to vector<8x176xf32>
    %184 = arith.mulf %183, %180 : vector<8x176xf32>
    %185 = arith.select %182, %180, %184 : vector<8x176xi1>, vector<8x176xf32>
    %c0_85 = arith.constant 0 : index
    %c0_86 = arith.constant 0 : index
    %186 = vector.load %arg21[%c0_85, %c0_86] : memref<32x8xf32, #tpu.memory_space<vmem>>, vector<32x8xf32>
    %cst_87 = arith.constant dense<0.000000e+00> : vector<32x176xf32>
    %187 = tpu.matmul %186, %185, %cst_87 {dimension_numbers = #tpu.dot_dimension_numbers<[1], [0], [0], [1], [0, 0, 1, 1], [], []>} : vector<32x8xf32>, vector<8x176xf32>, vector<32x176xf32> -> vector<32x176xf32>
    %188 = vector.extract_strided_slice %187 {offsets = [0, 0], sizes = [8, 176], strides = [1, 1]} : vector<32x176xf32> to vector<8x176xf32>
    %189 = vector.extract_strided_slice %187 {offsets = [8, 0], sizes = [8, 176], strides = [1, 1]} : vector<32x176xf32> to vector<8x176xf32>
    %190 = vector.extract_strided_slice %187 {offsets = [16, 0], sizes = [8, 176], strides = [1, 1]} : vector<32x176xf32> to vector<8x176xf32>
    %191 = vector.extract_strided_slice %187 {offsets = [24, 0], sizes = [8, 176], strides = [1, 1]} : vector<32x176xf32> to vector<8x176xf32>
    %192 = tpu.concatenate %188, %189, %190, %191 in 1 : vector<8x176xf32>, vector<8x176xf32>, vector<8x176xf32>, vector<8x176xf32> -> vector<8x704xf32>
    %c0_88 = arith.constant 0 : index
    %c0_89 = arith.constant 0 : index
    %193 = vector.load %arg22[%c0_88, %c0_89] : memref<704x352xf32, #tpu.memory_space<vmem>>, vector<704x352xf32>
    %cst_90 = arith.constant dense<0.000000e+00> : vector<8x352xf32>
    %194 = tpu.matmul %192, %193, %cst_90 {dimension_numbers = #tpu.dot_dimension_numbers<[1], [0], [0], [1], [0, 0, 1, 1], [], []>} : vector<8x704xf32>, vector<704x352xf32>, vector<8x352xf32> -> vector<8x352xf32>
    %195 = math.tanh %194 : vector<8x352xf32>
    %196 = vector.extract_strided_slice %195 {offsets = [0, 0], sizes = [6, 176], strides = [1, 1]} : vector<8x352xf32> to vector<6x176xf32>
    %c0_91 = arith.constant 0 : index
    %c0_92 = arith.constant 0 : index
    %c0_93 = arith.constant 0 : index
    %197 = vector.load %arg23[%c0_91, %c0_92, %c0_93] : memref<2x6x176xf32, #tpu.memory_space<vmem>>, vector<1x6x176xf32>
    %198 = vector.shape_cast %197 : vector<1x6x176xf32> to vector<6x176xf32>
    %199 = vector.shape_cast %196 : vector<6x176xf32> to vector<1x6x176xf32>
    tpu.vector_store %arg23[%c0_91, %c0_92, %c0_93], %199 {strides = array<i32>} : memref<2x6x176xf32, #tpu.memory_space<vmem>>, vector<1x6x176xf32>,
    %200 = vector.extract_strided_slice %195 {offsets = [0, 176], sizes = [6, 176], strides = [1, 1]} : vector<8x352xf32> to vector<6x176xf32>
    %c1 = arith.constant 1 : index
    %c0_94 = arith.constant 0 : index
    %c0_95 = arith.constant 0 : index
    %201 = vector.load %arg23[%c1, %c0_94, %c0_95] : memref<2x6x176xf32, #tpu.memory_space<vmem>>, vector<1x6x176xf32>
    %202 = vector.shape_cast %201 : vector<1x6x176xf32> to vector<6x176xf32>
    %203 = vector.shape_cast %200 : vector<6x176xf32> to vector<1x6x176xf32>
    tpu.vector_store %arg23[%c1, %c0_94, %c0_95], %203 {strides = array<i32>} : memref<2x6x176xf32, #tpu.memory_space<vmem>>, vector<1x6x176xf32>,
    return
  }
}

</mosaic_0001>

<bundles_post_ra>
// kernel: tpu_custom_call.1
= control target key start
LH: loop header
LB: loop body
LE: loop exit
PB: predicated region body
PF: predicated region fallthrough
CT: control target
= control target key end

     0   :  { %vm141_vm0 = vcmask 162816   ;;  %vm334_vm1 = vcmask 1043456   ;;  %vm915_vm2 = vcmask 15360   ;;  %vm949_vm3 = vcmask 48128   ;;  %s5854_s29 = smov 20   ;;  %s5863_s25 = smov 80   ;;  %s8515_s0 = inlined_call_operand.vmem [shape: f32[20,2], index: 0, kind: input, shape index: {}]   ;;  %s8516_s1 = inlined_call_operand.vmem [shape: f32[512,20], index: 1, kind: input, shape index: {}]   ;;  %s8517_s2 = inlined_call_operand.vmem [shape: f32[8,8], index: 2, kind: input, shape index: {}]   ;;  %s8518_s3 = inlined_call_operand.vmem [shape: f32[128,1], index: 3, kind: input, shape index: {}]   ;;  %s8519_s4 = inlined_call_operand.vmem [shape: f32[128,1], index: 4, kind: input, shape index: {}]   ;;  %s8520_s5 = inlined_call_operand.vmem [shape: f32[256,128], index: 5, kind: input, shape index: {}]   ;;  %s8521_s6 = inlined_call_operand.vmem [shape: f32[32,20], index: 6, kind: input, shape index: {}]   ;;  %s8522_s7 = inlined_call_operand.vmem [shape: f32[64,1], index: 7, kind: input, shape index: {}]   ;;  %s8523_s8 = inlined_call_operand.vmem [shape: f32[64,1], index: 8, kind: input, shape index: {}]   ;;  %s8524_s9 = inlined_call_operand.vmem [shape: f32[128,64], index: 9, kind: input, shape index: {}]   ;;  %s8525_s10 = inlined_call_operand.vmem [shape: f32[80,44], index: 10, kind: input, shape index: {}]   ;;  %s8526_s11 = inlined_call_operand.vmem [shape: f32[32,1], index: 11, kind: input, shape index: {}]   ;;  %s8527_s12 = inlined_call_operand.vmem [shape: f32[32,1], index: 12, kind: input, shape index: {}]   ;;  %s8528_s13 = inlined_call_operand.vmem [shape: f32[64,32], index: 13, kind: input, shape index: {}]   ;;  %s8529_s14 = inlined_call_operand.vmem [shape: f32[176,88], index: 14, kind: input, shape index: {}]   ;;  %s8530_s15 = inlined_call_operand.vmem [shape: f32[16,1], index: 15, kind: input, shape index: {}]   ;;  %s8531_s16 = inlined_call_operand.vmem [shape: f32[16,1], index: 16, kind: input, shape index: {}]   ;;  %s8532_s17 = inlined_call_operand.vmem [shape: f32[32,16], index: 17, kind: input, shape index: {}]   ;;  %s8533_s18 = inlined_call_operand.vmem [shape: f32[352,176], index: 18, kind: input, shape index: {}]   ;;  %s8534_s19 = inlined_call_operand.vmem [shape: f32[8,1], index: 19, kind: input, shape index: {}]   ;;  %s8535_s20 = inlined_call_operand.vmem [shape: f32[8,1], index: 20, kind: input, shape index: {}]   ;;  %s8536_s21 = inlined_call_operand.vmem [shape: f32[32,8], index: 21, kind: input, shape index: {}]   ;;  %s8537_s22 = inlined_call_operand.vmem [shape: f32[704,352], index: 22, kind: input, shape index: {}]   ;;  %s8538_s23 = inlined_call_operand.vmem [shape: f32[2,6,176], index: 23, kind: output, shape index: {}]  }
   0x1   :  { %8546 = sst [smem:[#allocation2_spill]] %s8515_s0  ;;  %s5849_s0 = smov 6   ;;  %vm932_vm4 = vcmask 31744   ;;  %vm967_vm5 = vcmask 64512  }
   0x2   :  { %8547 = sst [smem:[#allocation3_spill]] %s8516_s1  ;;  %s8554_s24 = sld [smem:[#allocation2_spill]] }
   0x3   :  { %8548 = sst [smem:[#allocation4_spill]] %s8517_s2  ;;  %s8555_s2 = sld [smem:[#allocation3_spill]] }
   0x4   :  { %8549 = sst [smem:[#allocation5_spill]] %s8518_s3  ;;  %s8556_s3 = sld [smem:[#allocation4_spill]] }
   0x5   :  { %8550 = sst [smem:[#allocation6_spill]] %s8519_s4  ;;  %s5853_s4 = smov 24  }
   0x6   :  { %8551 = sst [smem:[#allocation7_spill]] %s8520_s5 }
   0x7   :  { %8552 = sst [smem:[#allocation8_spill]] %s8521_s6  ;;  %s8558_s6 = sld [smem:[#allocation6_spill]] }
   0x8   :  { %8553 = sst [smem:[#allocation9_spill]] %s8522_s7  ;;  %v74_v0 = vld [vmem:[%s8554_s24] sm:$0xff]  ;;  %v75_v1 = vld [vmem:[%s8554_s24 + $0x8] sm:$0xff]  ;;  %v76_v4 = vld [vmem:[%s8554_s24 + $0x10] sm:$0xf]  ;;  %s5848_s7 = smov 4  }
   0x9   :  { %v5255_v2 = vpack.c.bf16 %v75_v1, %v74_v0  ;;  %v77_v3 = vld [vmem:[%s8555_s2] sm:$0xff]  ;;  %v78_v5 = vld [vmem:[%s8555_s2 + $0x8] sm:$0xff]  ;;  %v79_v6 = vld [vmem:[%s8555_s2 + $0x10] sm:$0xff]  ;;  %s8557_s24 = sld [smem:[#allocation5_spill]]  ;;  %s8559_s26 = sld [smem:[#allocation7_spill]] }
   0xa   :  { %4937 = vmatprep.mubr.msk.f32.mxu0 %vm141_vm0, %v77_v3  ;;  %v80_v7 = vld [vmem:[%s8555_s2 + $0x18] sm:$0xff]  ;;  %v81_v8 = vld [vmem:[%s8555_s2 + $0x20] sm:$0xff]  ;;  %v82_v9 = vld [vmem:[%s8555_s2 + $0x28] sm:$0xff]  ;;  %s8560_s1 = sld [smem:[#allocation8_spill]]  ;;  %s8561_s5 = sld [smem:[#allocation9_spill]] }
   0xb   :  { %5256 = vmatprep.subr.bf16.mxu0 %v5255_v2  ;;  %v83_v10 = vld [vmem:[%s8555_s2 + $0x30] sm:$0xff]  ;;  %v84_v11 = vld [vmem:[%s8555_s2 + $0x38] sm:$0xff]  ;;  %v85_v12 = vld [vmem:[%s8555_s2 + $0x40] sm:$0xff] }
   0xc   :  { %5258 = vmatpush3.bf16.msra.mxu0 %v5255_v2  ;;  %v86_v13 = vld [vmem:[%s8555_s2 + $0x48] sm:$0xff]  ;;  %v87_v14 = vld [vmem:[%s8555_s2 + $0x50] sm:$0xff]  ;;  %v88_v15 = vld [vmem:[%s8555_s2 + $0x58] sm:$0xff] }
   0xd   :  { %4935 = vmatprep.subr.msk.mxu0 %vm334_vm1, %v76_v4  ;;  %v89_v16 = vld [vmem:[%s8555_s2 + $0x60] sm:$0xff]  ;;  %v90_v17 = vld [vmem:[%s8555_s2 + $0x68] sm:$0xff]  ;;  %v91_v18 = vld [vmem:[%s8555_s2 + $0x70] sm:$0xff] }
   0xe   :  { %v92_v19 = vld [vmem:[%s8555_s2 + $0x78] sm:$0xff]  ;;  %v93_v20 = vld [vmem:[%s8555_s2 + $0x80] sm:$0xff]  ;;  %v94_v21 = vld [vmem:[%s8555_s2 + $0x88] sm:$0xff] }
   0xf   :  { %v95_v22 = vld [vmem:[%s8555_s2 + $0x90] sm:$0xff]  ;;  %v96_v23 = vld [vmem:[%s8555_s2 + $0x98] sm:$0xff]  ;;  %v97_v24 = vld [vmem:[%s8555_s2 + $0xa0] sm:$0xff] }
  0x10   :  { %4936 = vmatpush3.msk.msra.mxu0 %vm334_vm1, %v76_v4  ;;  %v98_v25 = vld [vmem:[%s8555_s2 + $0xa8] sm:$0xff]  ;;  %v99_v26 = vld [vmem:[%s8555_s2 + $0xb0] sm:$0xff]  ;;  %v100_v27 = vld [vmem:[%s8555_s2 + $0xb8] sm:$0xff] }
  0x11   :  { %4938 = vmatmul.mubr.msk.f32.vlgmr.msra.gmra.mrb[0].mxu0 %vm141_vm0, %v78_v5  ;;  %v101_v28 = vld [vmem:[%s8555_s2 + $0xc0] sm:$0xff]  ;;  %v102_v29 = vld [vmem:[%s8555_s2 + $0xc8] sm:$0xff]  ;;  %v103_v30 = vld [vmem:[%s8555_s2 + $0xd0] sm:$0xff] }
  0x12   :  { %4940 = vmatprep.mubr.msk.f32.mxu0 %vm141_vm0, %v79_v6  ;;  %v104_v31 = vld [vmem:[%s8555_s2 + $0xd8] sm:$0xff]  ;;  %v105_v32 = vld [vmem:[%s8555_s2 + $0xe0] sm:$0xff]  ;;  %v106_v33 = vld [vmem:[%s8555_s2 + $0xe8] sm:$0xff] }
  0x13   :  { %v107_v34 = vld [vmem:[%s8555_s2 + $0xf0] sm:$0xff]  ;;  %v108_v35 = vld [vmem:[%s8555_s2 + $0xf8] sm:$0xff]  ;;  %v109_v36 = vld [vmem:[%s8555_s2 + $0x100] sm:$0xff] }
  0x14   :  { %v110_v37 = vld [vmem:[%s8555_s2 + $0x108] sm:$0xff]  ;;  %v111_v38 = vld [vmem:[%s8555_s2 + $0x110] sm:$0xff]  ;;  %v112_v39 = vld [vmem:[%s8555_s2 + $0x118] sm:$0xff] }
  0x15   :  { %4941 = vmatmul.mubr.msk.f32.gmra.mrb[2].mxu0 %vm141_vm0, %v80_v7  ;;  %v113_v40 = vld [vmem:[%s8555_s2 + $0x120] sm:$0xff]  ;;  %v114_v41 = vld [vmem:[%s8555_s2 + $0x128] sm:$0xff]  ;;  %v115_v42 = vld [vmem:[%s8555_s2 + $0x130] sm:$0xff] }
  0x16   :  { %4943 = vmatprep.mubr.msk.f32.mxu0 %vm141_vm0, %v81_v8  ;;  %v116_v43 = vld [vmem:[%s8555_s2 + $0x138] sm:$0xff]  ;;  %v117_v44 = vld [vmem:[%s8555_s2 + $0x140] sm:$0xff]  ;;  %v118_v45 = vld [vmem:[%s8555_s2 + $0x148] sm:$0xff] }
  0x17   :  { %v119_v46 = vld [vmem:[%s8555_s2 + $0x150] sm:$0xff]  ;;  %v120_v47 = vld [vmem:[%s8555_s2 + $0x158] sm:$0xff]  ;;  %v121_v48 = vld [vmem:[%s8555_s2 + $0x160] sm:$0xff] }
  0x18   :  { %v122_v49 = vld [vmem:[%s8555_s2 + $0x168] sm:$0xff]  ;;  %v123_v50 = vld [vmem:[%s8555_s2 + $0x170] sm:$0xff]  ;;  %v124_v51 = vld [vmem:[%s8555_s2 + $0x178] sm:$0xff] }
  0x19   :  { %4944 = vmatmul.mubr.msk.f32.gmra.mrb[4].mxu0 %vm141_vm0, %v82_v9  ;;  %v125_v52 = vld [vmem:[%s8555_s2 + $0x180] sm:$0xff]  ;;  %v126_v53 = vld [vmem:[%s8555_s2 + $0x188] sm:$0xff]  ;;  %v127_v54 = vld [vmem:[%s8555_s2 + $0x190] sm:$0xff] }
  0x1a   :  { %4946 = vmatprep.mubr.msk.f32.mxu0 %vm141_vm0, %v83_v10  ;;  %v128_v55 = vld [vmem:[%s8555_s2 + $0x198] sm:$0xff]  ;;  %v129_v56 = vld [vmem:[%s8555_s2 + $0x1a0] sm:$0xff]  ;;  %v130_v57 = vld [vmem:[%s8555_s2 + $0x1a8] sm:$0xff] }
  0x1b   :  { %v131_v58 = vld [vmem:[%s8555_s2 + $0x1b0] sm:$0xff]  ;;  %v132_v59 = vld [vmem:[%s8555_s2 + $0x1b8] sm:$0xff]  ;;  %v133_v60 = vld [vmem:[%s8555_s2 + $0x1c0] sm:$0xff] }
  0x1c   :  { %v134_v61 = vld [vmem:[%s8555_s2 + $0x1c8] sm:$0xff]  ;;  %v135_v62 = vld [vmem:[%s8555_s2 + $0x1d0] sm:$0xff]  ;;  %v136_v63 = vld [vmem:[%s8555_s2 + $0x1d8] sm:$0xff] }
  0x1d   :  { %4947 = vmatmul.mubr.msk.f32.gmra.mrb[6].mxu0 %vm141_vm0, %v84_v11  ;;  %v137_v0 = vld [vmem:[%s8555_s2 + $0x1e0] sm:$0xff]  ;;  %v138_v1 = vld [vmem:[%s8555_s2 + $0x1e8] sm:$0xff]  ;;  %v139_v2 = vld [vmem:[%s8555_s2 + $0x1f0] sm:$0xff] }
  0x1e   :  { %4949 = vmatprep.mubr.msk.f32.mxu0 %vm141_vm0, %v85_v12  ;;  %v140_v3 = vld [vmem:[%s8555_s2 + $0x1f8] sm:$0xff]  ;;  %s5847_s2 = smov 2  }
  0x21   :  { %4950 = vmatmul.mubr.msk.f32.gmra.mrb[8].mxu0 %vm141_vm0, %v86_v13 }
  0x22   :  { %4952 = vmatprep.mubr.msk.f32.mxu0 %vm141_vm0, %v87_v14 }
  0x25   :  { %4953 = vmatmul.mubr.msk.f32.gmra.mrb[10].mxu0 %vm141_vm0, %v88_v15 }
  0x26   :  { %4955 = vmatprep.mubr.msk.f32.mxu0 %vm141_vm0, %v89_v16 }
  0x29   :  { %4956 = vmatmul.mubr.msk.f32.gmra.mrb[12].mxu0 %vm141_vm0, %v90_v17 }
  0x2a   :  { %4958 = vmatprep.mubr.msk.f32.mxu0 %vm141_vm0, %v91_v18 }
  0x2d   :  { %4959 = vmatmul.mubr.msk.f32.gmra.mrb[14].mxu0 %vm141_vm0, %v92_v19 }
  0x2e   :  { %4961 = vmatprep.mubr.msk.f32.mxu0 %vm141_vm0, %v93_v20 }
  0x31   :  { %4962 = vmatmul.mubr.msk.f32.gmra.mrb[16].mxu0 %vm141_vm0, %v94_v21 }
  0x32   :  { %4964 = vmatprep.mubr.msk.f32.mxu0 %vm141_vm0, %v95_v22 }
  0x35   :  { %4965 = vmatmul.mubr.msk.f32.gmra.mrb[18].mxu0 %vm141_vm0, %v96_v23 }
  0x36   :  { %4967 = vmatprep.mubr.msk.f32.mxu0 %vm141_vm0, %v97_v24 }
  0x39   :  { %4968 = vmatmul.mubr.msk.f32.gmra.mrb[20].mxu0 %vm141_vm0, %v98_v25 }
  0x3a   :  { %4970 = vmatprep.mubr.msk.f32.mxu0 %vm141_vm0, %v99_v26 }
  0x3d   :  { %4971 = vmatmul.mubr.msk.f32.gmra.mrb[22].mxu0 %vm141_vm0, %v100_v27 }
  0x3e   :  { %4973 = vmatprep.mubr.msk.f32.mxu0 %vm141_vm0, %v101_v28 }
  0x41   :  { %4974 = vmatmul.mubr.msk.f32.gmra.mrb[24].mxu0 %vm141_vm0, %v102_v29 }
  0x42   :  { %4976 = vmatprep.mubr.msk.f32.mxu0 %vm141_vm0, %v103_v30 }
  0x45   :  { %4977 = vmatmul.mubr.msk.f32.gmra.mrb[26].mxu0 %vm141_vm0, %v104_v31 }
  0x46   :  { %4979 = vmatprep.mubr.msk.f32.mxu0 %vm141_vm0, %v105_v32 }
  0x49   :  { %4980 = vmatmul.mubr.msk.f32.gmra.mrb[28].mxu0 %vm141_vm0, %v106_v33 }
  0x4a   :  { %4982 = vmatprep.mubr.msk.f32.mxu0 %vm141_vm0, %v107_v34 }
  0x4d   :  { %4983 = vmatmul.mubr.msk.f32.gmra.mrb[30].mxu0 %vm141_vm0, %v108_v35 }
  0x4e   :  { %4985 = vmatprep.mubr.msk.f32.mxu0 %vm141_vm0, %v109_v36 }
  0x51   :  { %4986 = vmatmul.mubr.msk.f32.gmra.mrb[32].mxu0 %vm141_vm0, %v110_v37 }
  0x52   :  { %4988 = vmatprep.mubr.msk.f32.mxu0 %vm141_vm0, %v111_v38 }
  0x55   :  { %4989 = vmatmul.mubr.msk.f32.gmra.mrb[34].mxu0 %vm141_vm0, %v112_v39 }
  0x56   :  { %4991 = vmatprep.mubr.msk.f32.mxu0 %vm141_vm0, %v113_v40 }
  0x59   :  { %4992 = vmatmul.mubr.msk.f32.gmra.mrb[36].mxu0 %vm141_vm0, %v114_v41 }
  0x5a   :  { %4994 = vmatprep.mubr.msk.f32.mxu0 %vm141_vm0, %v115_v42 }
  0x5d   :  { %4995 = vmatmul.mubr.msk.f32.gmra.mrb[38].mxu0 %vm141_vm0, %v116_v43 }
  0x5e   :  { %4997 = vmatprep.mubr.msk.f32.mxu0 %vm141_vm0, %v117_v44 }
  0x61   :  { %4998 = vmatmul.mubr.msk.f32.gmra.mrb[40].mxu0 %vm141_vm0, %v118_v45 }
  0x62   :  { %5000 = vmatprep.mubr.msk.f32.mxu0 %vm141_vm0, %v119_v46 }
  0x65   :  { %5001 = vmatmul.mubr.msk.f32.gmra.mrb[42].mxu0 %vm141_vm0, %v120_v47 }
  0x66   :  { %5003 = vmatprep.mubr.msk.f32.mxu0 %vm141_vm0, %v121_v48  ;;  %v966_v48 = vld [vmem:[%s8556_s3] sm:$0xff]  ;;  %s5851_s3 = smov 8  }
  0x67   :  { %5033 = vmatprep.subr.mxu1 %v966_v48 }
  0x68   :  { %5034 = vmatpush3.msra.mxu1 %v966_v48 }
  0x69   :  { %5004 = vmatmul.mubr.msk.f32.gmra.mrb[44].mxu0 %vm141_vm0, %v122_v49 }
  0x6a   :  { %5006 = vmatprep.mubr.msk.f32.mxu0 %vm141_vm0, %v123_v50 }
  0x6d   :  { %5007 = vmatmul.mubr.msk.f32.gmra.mrb[46].mxu0 %vm141_vm0, %v124_v51 }
  0x6e   :  { %5009 = vmatprep.mubr.msk.f32.mxu0 %vm141_vm0, %v125_v52 }
  0x71   :  { %5010 = vmatmul.mubr.msk.f32.gmra.mrb[48].mxu0 %vm141_vm0, %v126_v53 }
  0x72   :  { %5012 = vmatprep.mubr.msk.f32.mxu0 %vm141_vm0, %v127_v54 }
  0x75   :  { %5013 = vmatmul.mubr.msk.f32.gmra.mrb[50].mxu0 %vm141_vm0, %v128_v55 }
  0x76   :  { %5015 = vmatprep.mubr.msk.f32.mxu0 %vm141_vm0, %v129_v56 }
  0x79   :  { %5016 = vmatmul.mubr.msk.f32.gmra.mrb[52].mxu0 %vm141_vm0, %v130_v57 }
  0x7a   :  { %5018 = vmatprep.mubr.msk.f32.mxu0 %vm141_vm0, %v131_v58 }
  0x7d   :  { %5019 = vmatmul.mubr.msk.f32.gmra.mrb[54].mxu0 %vm141_vm0, %v132_v59 }
  0x7e   :  { %5021 = vmatprep.mubr.msk.f32.mxu0 %vm141_vm0, %v133_v60 }
  0x81   :  { %5022 = vmatmul.mubr.msk.f32.gmra.mrb[56].mxu0 %vm141_vm0, %v134_v61 }
  0x82   :  { %5024 = vmatprep.mubr.msk.f32.mxu0 %vm141_vm0, %v135_v62 }
  0x85   :  { %5025 = vmatmul.mubr.msk.f32.gmra.mrb[58].mxu0 %vm141_vm0, %v136_v63 }
  0x86   :  { %5027 = vmatprep.mubr.msk.f32.mxu0 %vm141_vm0, %v137_v0 }
  0x89   :  { %5028 = vmatmul.mubr.msk.f32.gmra.mrb[60].mxu0 %vm141_vm0, %v138_v1 }
  0x8a   :  { %5030 = vmatprep.mubr.msk.f32.mxu0 %vm141_vm0, %v139_v2 }
  0x8d   :  { %5031 = vmatmul.mubr.msk.f32.gmra.mrb[62].mxu0 %vm141_vm0, %v140_v3 }
  0xe4   :  { %v6249_v4 = vpop.f32.mrb[0].mxu0 }
  0xe5   :  { %v6251_v5 = vpop.f32.mrb[1].mxu0 }
  0xe8   :  { %v6253_v6 = vpop.f32.mrb[2].mxu0 }
  0xe9   :  { %v6255_v7 = vpop.f32.mrb[3].mxu0 }
  0xec   :  { %v6257_v8 = vpop.f32.mrb[4].mxu0 }
  0xed   :  { %v6259_v9 = vpop.f32.mrb[5].mxu0 }
  0xf0   :  { %v6261_v10 = vpop.f32.mrb[6].mxu0 }
  0xf1   :  { %v6263_v11 = vpop.f32.mrb[7].mxu0 }
  0xf4   :  { %v6265_v12 = vpop.f32.mrb[8].mxu0 }
  0xf5   :  { %v6267_v13 = vpop.f32.mrb[9].mxu0 }
  0xf8   :  { %v6269_v14 = vpop.f32.mrb[10].mxu0 }
  0xf9   :  { %v6271_v15 = vpop.f32.mrb[11].mxu0 }
  0xfc   :  { %v6273_v16 = vpop.f32.mrb[12].mxu0 }
  0xfd   :  { %v6275_v17 = vpop.f32.mrb[13].mxu0 }
 0x100   :  { %v6277_v18 = vpop.f32.mrb[14].mxu0 }
 0x101   :  { %v6279_v19 = vpop.f32.mrb[15].mxu0 }
 0x104   :  { %v4963_v20 = vpop.f32.mrb[16].mxu0 }
 0x105   :  { %741 = vrot.lane.b32.xlu0 %v4963_v20, %s5847_s2  ;;  %v484_v21 = vpop.f32.mrb[17].mxu0 }
 0x108   :  { %v4966_v22 = vpop.f32.mrb[18].mxu0 }
 0x109   :  { %739 = vrot.lane.b32.xlu0 %v484_v21, %s5847_s2  ;;  %745 = vrot.lane.b32.xlu1 %v4966_v22, %s5847_s2  ;;  %v494_v23 = vpop.f32.mrb[19].mxu0 }
 0x10c   :  { %v4969_v24 = vpop.f32.mrb[20].mxu0 }
 0x10d   :  { %743 = vrot.lane.b32.xlu0 %v494_v23, %s5847_s2  ;;  %749 = vrot.lane.b32.xlu1 %v4969_v24, %s5847_s2  ;;  %v504_v25 = vpop.f32.mrb[21].mxu0 }
 0x110   :  { %v4972_v26 = vpop.f32.mrb[22].mxu0 }
 0x111   :  { %747 = vrot.lane.b32.xlu0 %v504_v25, %s5847_s2  ;;  %753 = vrot.lane.b32.xlu1 %v4972_v26, %s5847_s2  ;;  %v514_v27 = vpop.f32.mrb[23].mxu0 }
 0x114   :  { %v4975_v28 = vpop.f32.mrb[24].mxu0 }
 0x115   :  { %751 = vrot.lane.b32.xlu0 %v514_v27, %s5847_s2  ;;  %757 = vrot.lane.b32.xlu1 %v4975_v28, %s5847_s2  ;;  %v524_v29 = vpop.f32.mrb[25].mxu0 }
 0x118   :  { %v4978_v30 = vpop.f32.mrb[26].mxu0 }
 0x119   :  { %755 = vrot.lane.b32.xlu0 %v524_v29, %s5847_s2  ;;  %761 = vrot.lane.b32.xlu1 %v4978_v30, %s5847_s2  ;;  %v534_v31 = vpop.f32.mrb[27].mxu0 }
 0x11c   :  { %v4981_v32 = vpop.f32.mrb[28].mxu0 }
 0x11d   :  { %759 = vrot.lane.b32.xlu0 %v534_v31, %s5847_s2  ;;  %765 = vrot.lane.b32.xlu1 %v4981_v32, %s5847_s2  ;;  %v544_v33 = vpop.f32.mrb[29].mxu0 }
 0x120   :  { %v4984_v34 = vpop.f32.mrb[30].mxu0 }
 0x121   :  { %763 = vrot.lane.b32.xlu0 %v544_v33, %s5847_s2  ;;  %769 = vrot.lane.b32.xlu1 %v4984_v34, %s5847_s2  ;;  %v554_v35 = vpop.f32.mrb[31].mxu0 }
 0x124   :  { %v4987_v36 = vpop.f32.mrb[32].mxu0 }
 0x125   :  { %767 = vrot.lane.b32.xlu0 %v554_v35, %s5847_s2  ;;  %805 = vrot.lane.b32.xlu1 %v4987_v36, %s5848_s7  ;;  %v564_v37 = vpop.f32.mrb[33].mxu0 }
 0x128   :  { %v4990_v38 = vpop.f32.mrb[34].mxu0 }
 0x129   :  { %803 = vrot.lane.b32.xlu1 %v564_v37, %s5848_s7  ;;  %v574_v39 = vpop.f32.mrb[35].mxu0 }
 0x12a   :  { %807 = vrot.lane.b32.xlu0 %v574_v39, %s5848_s7 }
 0x12c   :  { %v4993_v40 = vpop.f32.mrb[36].mxu0 }
 0x12d   :  { %809 = vrot.lane.b32.xlu1 %v4990_v38, %s5848_s7  ;;  %v584_v41 = vpop.f32.mrb[37].mxu0 }
 0x12e   :  { %811 = vrot.lane.b32.xlu0 %v584_v41, %s5848_s7 }
 0x130   :  { %v4996_v42 = vpop.f32.mrb[38].mxu0 }
 0x131   :  { %813 = vrot.lane.b32.xlu1 %v4993_v40, %s5848_s7  ;;  %v594_v43 = vpop.f32.mrb[39].mxu0 }
 0x132   :  { %815 = vrot.lane.b32.xlu0 %v594_v43, %s5848_s7 }
 0x134   :  { %v4999_v44 = vpop.f32.mrb[40].mxu0 }
 0x135   :  { %817 = vrot.lane.b32.xlu1 %v4996_v42, %s5848_s7  ;;  %v604_v45 = vpop.f32.mrb[41].mxu0 }
 0x136   :  { %819 = vrot.lane.b32.xlu0 %v604_v45, %s5848_s7 }
 0x138   :  { %v5002_v46 = vpop.f32.mrb[42].mxu0 }
 0x139   :  { %821 = vrot.lane.b32.xlu1 %v4999_v44, %s5848_s7  ;;  %v614_v47 = vpop.f32.mrb[43].mxu0 }
 0x13a   :  { %823 = vrot.lane.b32.xlu0 %v614_v47, %s5848_s7 }
 0x13c   :  { %v5005_v49 = vpop.f32.mrb[44].mxu0 }
 0x13d   :  { %825 = vrot.lane.b32.xlu1 %v5002_v46, %s5848_s7  ;;  %v624_v50 = vpop.f32.mrb[45].mxu0 }
 0x13e   :  { %827 = vrot.lane.b32.xlu0 %v624_v50, %s5848_s7 }
 0x140   :  { %v5008_v51 = vpop.f32.mrb[46].mxu0 }
 0x141   :  { %829 = vrot.lane.b32.xlu1 %v5005_v49, %s5848_s7  ;;  %v634_v52 = vpop.f32.mrb[47].mxu0 }
 0x142   :  { %831 = vrot.lane.b32.xlu0 %v634_v52, %s5848_s7 }
 0x144   :  { %v5011_v53 = vpop.f32.mrb[48].mxu0 }
 0x145   :  { %833 = vrot.lane.b32.xlu1 %v5008_v51, %s5848_s7  ;;  %v644_v54 = vpop.f32.mrb[49].mxu0 }
 0x146   :  { %867 = vrot.lane.b32.xlu0 %v644_v54, %s5849_s0 }
 0x148   :  { %v5014_v55 = vpop.f32.mrb[50].mxu0 }
 0x149   :  { %869 = vrot.lane.b32.xlu1 %v5011_v53, %s5849_s0  ;;  %v654_v56 = vpop.f32.mrb[51].mxu0 }
 0x14a   :  { %871 = vrot.lane.b32.xlu0 %v654_v56, %s5849_s0 }
 0x14c   :  { %v5017_v57 = vpop.f32.mrb[52].mxu0 }
 0x14d   :  { %873 = vrot.lane.b32.xlu1 %v5014_v55, %s5849_s0  ;;  %v664_v58 = vpop.f32.mrb[53].mxu0 }
 0x14e   :  { %875 = vrot.lane.b32.xlu0 %v664_v58, %s5849_s0 }
 0x150   :  { %v5020_v59 = vpop.f32.mrb[54].mxu0 }
 0x151   :  { %877 = vrot.lane.b32.xlu1 %v5017_v57, %s5849_s0  ;;  %v674_v60 = vpop.f32.mrb[55].mxu0 }
 0x152   :  { %879 = vrot.lane.b32.xlu0 %v674_v60, %s5849_s0 }
 0x154   :  { %v5023_v61 = vpop.f32.mrb[56].mxu0 }
 0x155   :  { %881 = vrot.lane.b32.xlu1 %v5020_v59, %s5849_s0  ;;  %v684_v62 = vpop.f32.mrb[57].mxu0 }
 0x156   :  { %883 = vrot.lane.b32.xlu0 %v684_v62, %s5849_s0 }
 0x158   :  { %v5026_v63 = vpop.f32.mrb[58].mxu0 }
 0x159   :  { %885 = vrot.lane.b32.xlu1 %v5023_v61, %s5849_s0  ;;  %v694_v0 = vpop.f32.mrb[59].mxu0 }
 0x15a   :  { %887 = vrot.lane.b32.xlu0 %v694_v0, %s5849_s0 }
 0x15c   :  { %v5029_v1 = vpop.f32.mrb[60].mxu0 }
 0x15d   :  { %889 = vrot.lane.b32.xlu1 %v5026_v63, %s5849_s0  ;;  %v704_v2 = vpop.f32.mrb[61].mxu0 }
 0x15e   :  { %891 = vrot.lane.b32.xlu0 %v704_v2, %s5849_s0 }
 0x160   :  { %v5032_v3 = vpop.f32.mrb[62].mxu0 }
 0x161   :  { %893 = vrot.lane.b32.xlu1 %v5029_v1, %s5849_s0  ;;  %v714_v20 = vpop.f32.mrb[63].mxu0 }
 0x162   :  { %895 = vrot.lane.b32.xlu0 %v714_v20, %s5849_s0 }
 0x165   :  { %897 = vrot.lane.b32.xlu1 %v5032_v3, %s5849_s0  ;;  %s5852_s0 = smov 16  }
 0x177   :  { %v742_v21 = vpop.permute.xlu0 %741 }
 0x178   :  { %v917_v57 = vsel %vm915_vm2, %v6249_v4, %v742_v21 }
 0x17b   :  { %v740_v22 = vpop.permute.xlu0 %739  ;;  %v746_v23 = vpop.permute.xlu1 %745 }
 0x17c   :  { %v916_v52 = vsel %vm915_vm2, %v6251_v5, %v740_v22  ;;  %v919_v4 = vsel %vm915_vm2, %v6253_v6, %v746_v23 }
 0x17f   :  { %v744_v24 = vpop.permute.xlu0 %743  ;;  %v750_v25 = vpop.permute.xlu1 %749 }
 0x180   :  { %v918_v58 = vsel %vm915_vm2, %v6255_v7, %v744_v24  ;;  %v921_v6 = vsel %vm915_vm2, %v6257_v8, %v750_v25 }
 0x183   :  { %v748_v26 = vpop.permute.xlu0 %747  ;;  %v6316_v27 = vpop.permute.xlu1 %753 }
 0x184   :  { %v920_v7 = vsel %vm915_vm2, %v6259_v9, %v748_v26  ;;  %v923_v8 = vsel %vm915_vm2, %v6261_v10, %v6316_v27 }
 0x187   :  { %v752_v28 = vpop.permute.xlu0 %751  ;;  %v6318_v29 = vpop.permute.xlu1 %757 }
 0x188   :  { %v922_v9 = vsel %vm915_vm2, %v6263_v11, %v752_v28  ;;  %v925_v10 = vsel %vm915_vm2, %v6265_v12, %v6318_v29 }
 0x18b   :  { %v6320_v30 = vpop.permute.xlu0 %755  ;;  %v6322_v31 = vpop.permute.xlu1 %761 }
 0x18c   :  { %v924_v11 = vsel %vm915_vm2, %v6267_v13, %v6320_v30  ;;  %v927_v12 = vsel %vm915_vm2, %v6269_v14, %v6322_v31 }
 0x18f   :  { %v6324_v32 = vpop.permute.xlu0 %759  ;;  %v6326_v33 = vpop.permute.xlu1 %765 }
 0x190   :  { %v926_v13 = vsel %vm915_vm2, %v6271_v15, %v6324_v32  ;;  %v929_v14 = vsel %vm915_vm2, %v6273_v16, %v6326_v33 }
 0x193   :  { %v6328_v34 = vpop.permute.xlu0 %763  ;;  %v6330_v35 = vpop.permute.xlu1 %769 }
 0x194   :  { %v928_v15 = vsel %vm915_vm2, %v6275_v17, %v6328_v34  ;;  %v931_v16 = vsel %vm915_vm2, %v6277_v18, %v6330_v35 }
 0x197   :  { %v6332_v36 = vpop.permute.xlu0 %767  ;;  %v806_v37 = vpop.permute.xlu1 %805 }
 0x198   :  { %v934_v59 = vsel %vm932_vm4, %v917_v57, %v806_v37  ;;  %v930_v17 = vsel %vm915_vm2, %v6279_v19, %v6332_v36 }
 0x19b   :  { %v804_v38 = vpop.permute.xlu1 %803 }
 0x19c   :  { %v808_v39 = vpop.permute.xlu0 %807  ;;  %v933_v54 = vsel %vm932_vm4, %v916_v52, %v804_v38 }
 0x19d   :  { %v935_v60 = vsel %vm932_vm4, %v918_v58, %v808_v39 }
 0x19f   :  { %v810_v40 = vpop.permute.xlu1 %809 }
 0x1a0   :  { %v812_v41 = vpop.permute.xlu0 %811  ;;  %v936_v0 = vsel %vm932_vm4, %v919_v4, %v810_v40 }
 0x1a1   :  { %v937_v2 = vsel %vm932_vm4, %v920_v7, %v812_v41 }
 0x1a3   :  { %v814_v42 = vpop.permute.xlu1 %813 }
 0x1a4   :  { %v816_v43 = vpop.permute.xlu0 %815  ;;  %v938_v22 = vsel %vm932_vm4, %v921_v6, %v814_v42 }
 0x1a5   :  { %v939_v24 = vsel %vm932_vm4, %v922_v9, %v816_v43 }
 0x1a7   :  { %v818_v44 = vpop.permute.xlu1 %817 }
 0x1a8   :  { %v820_v45 = vpop.permute.xlu0 %819  ;;  %v940_v25 = vsel %vm932_vm4, %v923_v8, %v818_v44 }
 0x1a9   :  { %v941_v39 = vsel %vm932_vm4, %v924_v11, %v820_v45 }
 0x1ab   :  { %v822_v46 = vpop.permute.xlu1 %821 }
 0x1ac   :  { %v824_v47 = vpop.permute.xlu0 %823  ;;  %v942_v27 = vsel %vm932_vm4, %v925_v10, %v822_v46 }
 0x1ad   :  { %v943_v43 = vsel %vm932_vm4, %v926_v13, %v824_v47 }
 0x1af   :  { %v6334_v48 = vpop.permute.xlu1 %825 }
 0x1b0   :  { %v6336_v49 = vpop.permute.xlu0 %827  ;;  %v944_v29 = vsel %vm932_vm4, %v927_v12, %v6334_v48 }
 0x1b1   :  { %v945_v46 = vsel %vm932_vm4, %v928_v15, %v6336_v49 }
 0x1b3   :  { %v6338_v50 = vpop.permute.xlu1 %829 }
 0x1b4   :  { %v6340_v51 = vpop.permute.xlu0 %831  ;;  %v946_v31 = vsel %vm932_vm4, %v929_v14, %v6338_v50 }
 0x1b5   :  { %v947_v48 = vsel %vm932_vm4, %v930_v17, %v6340_v51 }
 0x1b7   :  { %v6344_v53 = vpop.permute.xlu1 %833 }
 0x1b8   :  { %v868_v55 = vpop.permute.xlu0 %867  ;;  %v948_v19 = vsel %vm932_vm4, %v931_v16, %v6344_v53 }
 0x1b9   :  { %v950_v56 = vsel %vm949_vm3, %v933_v54, %v868_v55 }
 0x1ba   :  { %5035 = vmatprep.mubr.msk.f32.mxu1 %vm967_vm5, %v950_v56 }
 0x1bb   :  { %v870_v5 = vpop.permute.xlu1 %869 }
 0x1bc   :  { %v951_v61 = vsel %vm949_vm3, %v934_v59, %v870_v5  ;;  %v872_v62 = vpop.permute.xlu0 %871 }
 0x1bd   :  { %v952_v63 = vsel %vm949_vm3, %v935_v60, %v872_v62  ;;  %5036 = vmatmul.mubr.msk.f32.vlgmr.msra.gmra.mrb[0].mxu1 %vm967_vm5, %v951_v61 }
 0x1be   :  { %5038 = vmatprep.mubr.msk.f32.mxu1 %vm967_vm5, %v952_v63 }
 0x1bf   :  { %v874_v1 = vpop.permute.xlu1 %873 }
 0x1c0   :  { %v953_v3 = vsel %vm949_vm3, %v936_v0, %v874_v1  ;;  %v876_v20 = vpop.permute.xlu0 %875 }
 0x1c1   :  { %v954_v21 = vsel %vm949_vm3, %v937_v2, %v876_v20  ;;  %5039 = vmatmul.mubr.msk.f32.gmra.mrb[2].mxu1 %vm967_vm5, %v953_v3 }
 0x1c2   :  { %5041 = vmatprep.mubr.msk.f32.mxu1 %vm967_vm5, %v954_v21 }
 0x1c3   :  { %v878_v23 = vpop.permute.xlu1 %877 }
 0x1c4   :  { %v955_v26 = vsel %vm949_vm3, %v938_v22, %v878_v23  ;;  %v880_v37 = vpop.permute.xlu0 %879 }
 0x1c5   :  { %v956_v38 = vsel %vm949_vm3, %v939_v24, %v880_v37  ;;  %5042 = vmatmul.mubr.msk.f32.gmra.mrb[4].mxu1 %vm967_vm5, %v955_v26 }
 0x1c6   :  { %5044 = vmatprep.mubr.msk.f32.mxu1 %vm967_vm5, %v956_v38 }
 0x1c7   :  { %v882_v28 = vpop.permute.xlu1 %881 }
 0x1c8   :  { %v957_v40 = vsel %vm949_vm3, %v940_v25, %v882_v28  ;;  %v884_v41 = vpop.permute.xlu0 %883 }
 0x1c9   :  { %v958_v42 = vsel %vm949_vm3, %v941_v39, %v884_v41  ;;  %5045 = vmatmul.mubr.msk.f32.gmra.mrb[6].mxu1 %vm967_vm5, %v957_v40 }
 0x1ca   :  { %5047 = vmatprep.mubr.msk.f32.mxu1 %vm967_vm5, %v958_v42 }
 0x1cb   :  { %v886_v30 = vpop.permute.xlu1 %885 }
 0x1cc   :  { %v959_v44 = vsel %vm949_vm3, %v942_v27, %v886_v30  ;;  %v888_v45 = vpop.permute.xlu0 %887 }
 0x1cd   :  { %v960_v52 = vsel %vm949_vm3, %v943_v43, %v888_v45  ;;  %5048 = vmatmul.mubr.msk.f32.gmra.mrb[8].mxu1 %vm967_vm5, %v959_v44 }
 0x1ce   :  { %5050 = vmatprep.mubr.msk.f32.mxu1 %vm967_vm5, %v960_v52 }
 0x1cf   :  { %v890_v32 = vpop.permute.xlu1 %889 }
 0x1d0   :  { %v961_v47 = vsel %vm949_vm3, %v944_v29, %v890_v32  ;;  %v892_v54 = vpop.permute.xlu0 %891 }
 0x1d1   :  { %v962_v55 = vsel %vm949_vm3, %v945_v46, %v892_v54  ;;  %5051 = vmatmul.mubr.msk.f32.gmra.mrb[10].mxu1 %vm967_vm5, %v961_v47 }
 0x1d2   :  { %5053 = vmatprep.mubr.msk.f32.mxu1 %vm967_vm5, %v962_v55 }
 0x1d3   :  { %v894_v34 = vpop.permute.xlu1 %893 }
 0x1d4   :  { %v963_v49 = vsel %vm949_vm3, %v946_v31, %v894_v34  ;;  %v896_v56 = vpop.permute.xlu0 %895 }
 0x1d5   :  { %v964_v57 = vsel %vm949_vm3, %v947_v48, %v896_v56  ;;  %5054 = vmatmul.mubr.msk.f32.gmra.mrb[12].mxu1 %vm967_vm5, %v963_v49 }
 0x1d6   :  { %5056 = vmatprep.mubr.msk.f32.mxu1 %vm967_vm5, %v964_v57 }
 0x1d7   :  { %v898_v33 = vpop.permute.xlu1 %897 }
 0x1d8   :  { %v965_v36 = vsel %vm949_vm3, %v948_v19, %v898_v33 }
 0x1d9   :  { %5057 = vmatmul.mubr.msk.f32.gmra.mrb[14].mxu1 %vm967_vm5, %v965_v36 }
 0x290   :  { %v6438_v50 = vpop.f32.mrb[0].mxu1 }
 0x291   :  { %v6440_v51 = vpop.f32.mrb[1].mxu1  ;;  %v1164_v58 = vsel %vm967_vm5, %v6438_v50, 0.0 }
 0x292   :  { %1165 = vadd.xlane.f32.xlu1 %v1164_v58  ;;  %v1161_v18 = vsel %vm967_vm5, %v6440_v51, 0.0 }
 0x293   :  { %1162 = vadd.xlane.f32.xlu0 %v1161_v18 }
 0x294   :  { %v6446_v35 = vpop.f32.mrb[2].mxu1 }
 0x295   :  { %v6448_v53 = vpop.f32.mrb[3].mxu1  ;;  %v1170_v59 = vsel %vm967_vm5, %v6446_v35, 0.0 }
 0x296   :  { %v1167_v62 = vsel %vm967_vm5, %v6448_v53, 0.0 }
 0x297   :  { %1171 = vadd.xlane.f32.xlu0 %v1170_v59 }
 0x298   :  { %v6452_v5 = vpop.f32.mrb[4].mxu1 }
 0x299   :  { %v6454_v60 = vpop.f32.mrb[5].mxu1  ;;  %v1176_v0 = vsel %vm967_vm5, %v6452_v5, 0.0 }
 0x29a   :  { %v1173_v61 = vsel %vm967_vm5, %v6454_v60, 0.0 }
 0x29b   :  { %1174 = vadd.xlane.f32.xlu1 %v1173_v61  ;;  %1168 = vadd.xlane.f32.xlu0 %v1167_v62 }
 0x29c   :  { %v6460_v63 = vpop.f32.mrb[6].mxu1 }
 0x29d   :  { %v6462_v4 = vpop.f32.mrb[7].mxu1  ;;  %v1182_v20 = vsel %vm967_vm5, %v6460_v63, 0.0 }
 0x29e   :  { %v1179_v7 = vsel %vm967_vm5, %v6462_v4, 0.0 }
 0x29f   :  { %1180 = vadd.xlane.f32.xlu1 %v1179_v7  ;;  %1177 = vadd.xlane.f32.xlu0 %v1176_v0 }
 0x2a0   :  { %v6468_v1 = vpop.f32.mrb[8].mxu1 }
 0x2a1   :  { %v6470_v2 = vpop.f32.mrb[9].mxu1  ;;  %v1188_v22 = vsel %vm967_vm5, %v6468_v1, 0.0 }
 0x2a2   :  { %v1185_v3 = vsel %vm967_vm5, %v6470_v2, 0.0 }
 0x2a3   :  { %1186 = vadd.xlane.f32.xlu1 %v1185_v3  ;;  %1183 = vadd.xlane.f32.xlu0 %v1182_v20 }
 0x2a4   :  { %v6476_v21 = vpop.f32.mrb[10].mxu1 }
 0x2a5   :  { %v6478_v6 = vpop.f32.mrb[11].mxu1  ;;  %v1194_v37 = vsel %vm967_vm5, %v6476_v21, 0.0 }
 0x2a6   :  { %v1191_v9 = vsel %vm967_vm5, %v6478_v6, 0.0 }
 0x2a7   :  { %1192 = vadd.xlane.f32.xlu1 %v1191_v9  ;;  %1189 = vadd.xlane.f32.xlu0 %v1188_v22 }
 0x2a8   :  { %v6484_v23 = vpop.f32.mrb[12].mxu1 }
 0x2a9   :  { %v6486_v24 = vpop.f32.mrb[13].mxu1  ;;  %v1200_v11 = vsel %vm967_vm5, %v6484_v23, 0.0 }
 0x2aa   :  { %v1197_v26 = vsel %vm967_vm5, %v6486_v24, 0.0 }
 0x2ab   :  { %1198 = vadd.xlane.f32.xlu1 %v1197_v26  ;;  %1195 = vadd.xlane.f32.xlu0 %v1194_v37 }
 0x2ac   :  { %v6492_v38 = vpop.f32.mrb[14].mxu1 }
 0x2ad   :  { %v6494_v8 = vpop.f32.mrb[15].mxu1  ;;  %v1206_v28 = vsel %vm967_vm5, %v6492_v38, 0.0 }
 0x2ae   :  { %v1203_v25 = vsel %vm967_vm5, %v6494_v8, 0.0 }
 0x2af   :  { %1201 = vadd.xlane.f32.xlu0 %v1200_v11  ;;  %1204 = vadd.xlane.f32.xlu1 %v1203_v25 }
 0x2b3   :  { %1207 = vadd.xlane.f32.xlu0 %v1206_v28 }
 0x31f   :  { %v1166_v39 = vpop.xlane.xlu1 %1165 }
 0x320   :  { %v6502_v40 = vmul.f32 0.125, %v1166_v39  ;;  %v1163_v41 = vpop.xlane.xlu0 %1162 }
 0x321   :  { %v6504_v42 = vmul.f32 0.125, %v1163_v41 }
 0x322   :  { %v1227_v10 = vsub.f32 %v6438_v50, %v6502_v40 }
 0x323   :  { %v1226_v13 = vsub.f32 %v6440_v51, %v6504_v42 }
 0x324   :  { %v1172_v27 = vpop.xlane.xlu0 %1171  ;;  %v1243_v30 = vmul.f32 %v1227_v10, %v1227_v10 }
 0x325   :  { %v6510_v43 = vmul.f32 0.125, %v1172_v27  ;;  %v1242_v44 = vmul.f32 %v1226_v13, %v1226_v13 }
 0x326   :  { %v1261_v45 = vsel %vm967_vm5, %v1243_v30, 0.0 }
 0x327   :  { %1262 = vadd.xlane.f32.xlu0 %v1261_v45  ;;  %v1258_v52 = vsel %vm967_vm5, %v1242_v44, 0.0  ;;  %v1229_v12 = vsub.f32 %v6446_v35, %v6510_v43 }
 0x328   :  { %v1175_v15 = vpop.xlane.xlu1 %1174  ;;  %1259 = vadd.xlane.f32.xlu1 %v1258_v52  ;;  %v1169_v29 = vpop.xlane.xlu0 %1168 }
 0x329   :  { %v6516_v32 = vmul.f32 0.125, %v1175_v15  ;;  %v6518_v46 = vmul.f32 0.125, %v1169_v29  ;;  %v1245_v47 = vmul.f32 %v1229_v12, %v1229_v12 }
 0x32b   :  { %v1267_v54 = vsel %vm967_vm5, %v1245_v47, 0.0  ;;  %v1228_v55 = vsub.f32 %v6448_v53, %v6518_v46  ;;  %v1230_v14 = vsub.f32 %v6454_v60, %v6516_v32 }
 0x32c   :  { %v1181_v17 = vpop.xlane.xlu1 %1180  ;;  %1268 = vadd.xlane.f32.xlu0 %v1267_v54  ;;  %v1178_v31 = vpop.xlane.xlu0 %1177 }
 0x32d   :  { %v6525_v34 = vmul.f32 0.125, %v1181_v17  ;;  %v6527_v48 = vmul.f32 0.125, %v1178_v31  ;;  %v1244_v49 = vmul.f32 %v1228_v55, %v1228_v55  ;;  %v1246_v57 = vmul.f32 %v1230_v14, %v1230_v14 }
 0x32f   :  { %v1264_v56 = vsel %vm967_vm5, %v1244_v49, 0.0  ;;  %v1231_v16 = vsub.f32 %v6452_v5, %v6527_v48  ;;  %v1232_v19 = vsub.f32 %v6462_v4, %v6525_v34  ;;  %v1270_v62 = vsel %vm967_vm5, %v1246_v57, 0.0 }
 0x330   :  { %v1187_v33 = vpop.xlane.xlu1 %1186  ;;  %1265 = vadd.xlane.f32.xlu1 %v1264_v56  ;;  %v1184_v36 = vpop.xlane.xlu0 %1183 }
 0x331   :  { %v6534_v58 = vmul.f32 0.125, %v1187_v33  ;;  %v6536_v18 = vmul.f32 0.125, %v1184_v36  ;;  %v1247_v59 = vmul.f32 %v1231_v16, %v1231_v16  ;;  %v1248_v61 = vmul.f32 %v1232_v19, %v1232_v19 }
 0x333   :  { %v1273_v7 = vsel %vm967_vm5, %v1247_v59, 0.0  ;;  %v1233_v0 = vsub.f32 %v6460_v63, %v6536_v18  ;;  %v1234_v3 = vsub.f32 %v6470_v2, %v6534_v58  ;;  %v1276_v11 = vsel %vm967_vm5, %v1248_v61, 0.0 }
 0x334   :  { %v1193_v20 = vpop.xlane.xlu1 %1192  ;;  %1271 = vadd.xlane.f32.xlu1 %v1270_v62  ;;  %1274 = vadd.xlane.f32.xlu0 %v1273_v7  ;;  %v1190_v9 = vpop.xlane.xlu0 %1189 }
 0x335   :  { %v6544_v22 = vmul.f32 0.125, %v1193_v20  ;;  %v6546_v26 = vmul.f32 0.125, %v1190_v9  ;;  %v1249_v37 = vmul.f32 %v1233_v0, %v1233_v0  ;;  %v1250_v28 = vmul.f32 %v1234_v3, %v1234_v3 }
 0x336   :  { %v5850_v3 = vmov 0  }
 0x337   :  { %v1279_v25 = vsel %vm967_vm5, %v1249_v37, 0.0  ;;  %v1235_v39 = vsub.f32 %v6468_v1, %v6546_v26  ;;  %v1236_v41 = vsub.f32 %v6478_v6, %v6544_v22  ;;  %v1282_v52 = vsel %vm967_vm5, %v1250_v28, 0.0  ;;  %5767 = vset.pattern.permute.xlu0 %v5850_v3  ;;  %5768 = vset.pattern.permute.xlu1 %v5850_v3 }
 0x338   :  { %v1199_v10 = vpop.xlane.xlu1 %1198  ;;  %1277 = vadd.xlane.f32.xlu1 %v1276_v11  ;;  %1280 = vadd.xlane.f32.xlu0 %v1279_v25  ;;  %v1196_v13 = vpop.xlane.xlu0 %1195 }
 0x339   :  { %v6554_v27 = vmul.f32 0.125, %v1199_v10  ;;  %v6556_v30 = vmul.f32 0.125, %v1196_v13  ;;  %v1251_v44 = vmul.f32 %v1235_v39, %v1235_v39  ;;  %v1252_v45 = vmul.f32 %v1236_v41, %v1236_v41 }
 0x33b   :  { %v1285_v12 = vsel %vm967_vm5, %v1251_v44, 0.0  ;;  %v1237_v15 = vsub.f32 %v6476_v21, %v6556_v30  ;;  %v1238_v29 = vsub.f32 %v6486_v24, %v6554_v27  ;;  %v1288_v31 = vsel %vm967_vm5, %v1252_v45, 0.0 }
 0x33c   :  { %v1205_v47 = vpop.xlane.xlu1 %1204  ;;  %1283 = vadd.xlane.f32.xlu1 %v1282_v52  ;;  %1286 = vadd.xlane.f32.xlu0 %v1285_v12  ;;  %v1202_v54 = vpop.xlane.xlu0 %1201 }
 0x33d   :  { %v6564_v55 = vmul.f32 0.125, %v1205_v47  ;;  %v6566_v14 = vmul.f32 0.125, %v1202_v54  ;;  %v1253_v17 = vmul.f32 %v1237_v15, %v1237_v15  ;;  %v1254_v56 = vmul.f32 %v1238_v29, %v1238_v29  ;;  %v1323_v29 = vld [vmem:[%s8557_s24 + $0x8] sm:$0xff]  ;;  %v1322_v54 = vld [vmem:[%s8557_s24] sm:$0xff] }
 0x33f   :  { %v1291_v49 = vsel %vm967_vm5, %v1253_v17, 0.0  ;;  %v1239_v57 = vsub.f32 %v6484_v23, %v6566_v14  ;;  %v1240_v16 = vsub.f32 %v6494_v8, %v6564_v55  ;;  %v1294_v59 = vsel %vm967_vm5, %v1254_v56, 0.0 }
 0x340   :  { %1289 = vadd.xlane.f32.xlu1 %v1288_v31  ;;  %1292 = vadd.xlane.f32.xlu0 %v1291_v49  ;;  %v1208_v19 = vpop.xlane.xlu0 %1207 }
 0x341   :  { %v6574_v33 = vmul.f32 0.125, %v1208_v19  ;;  %v1255_v36 = vmul.f32 %v1239_v57, %v1239_v57  ;;  %v1256_v62 = vmul.f32 %v1240_v16, %v1240_v16 }
 0x343   :  { %v1297_v61 = vsel %vm967_vm5, %v1255_v36, 0.0  ;;  %v1241_v7 = vsub.f32 %v6492_v38, %v6574_v33  ;;  %v1300_v20 = vsel %vm967_vm5, %v1256_v62, 0.0 }
 0x344   :  { %1295 = vadd.xlane.f32.xlu1 %v1294_v59  ;;  %1298 = vadd.xlane.f32.xlu0 %v1297_v61  ;;  %v1387_v59 = vld [vmem:[%s8558_s6 + $0x8] sm:$0xff] }
 0x345   :  { %v1257_v0 = vmul.f32 %v1241_v7, %v1241_v7 }
 0x347   :  { %v1303_v9 = vsel %vm967_vm5, %v1257_v0, 0.0 }
 0x348   :  { %1301 = vadd.xlane.f32.xlu1 %v1300_v20  ;;  %1304 = vadd.xlane.f32.xlu0 %v1303_v9 }
 0x3b4   :  { %v1263_v37 = vpop.xlane.xlu0 %1262 }
 0x3b5   :  { %v1307_v11 = vmul.f32 0.125, %v1263_v37  ;;  %v1260_v25 = vpop.xlane.xlu1 %1259 }
 0x3b6   :  { %v1306_v28 = vmul.f32 0.125, %v1260_v25  ;;  %v1325_v25 = vld [vmem:[%s8557_s24 + $0x18] sm:$0xff] }
 0x3b7   :  { %v1339_v39 = vadd.f32 1e-05, %v1307_v11 }
 0x3b8   :  { %v1338_v41 = vadd.f32 1e-05, %v1306_v28 }
 0x3b9   :  { %5779 = vrsqrt.f32 %v1339_v39  ;;  %v1269_v10 = vpop.xlane.xlu0 %1268 }
 0x3ba   :  { %5781 = vrsqrt.f32 %v1338_v41  ;;  %v1309_v13 = vmul.f32 0.125, %v1269_v10 }
 0x3bc   :  { %v1341_v44 = vadd.f32 1e-05, %v1309_v13 }
 0x3bd   :  { %v1266_v45 = vpop.xlane.xlu1 %1265 }
 0x3be   :  { %5783 = vrsqrt.f32 %v1341_v44  ;;  %v1308_v52 = vmul.f32 0.125, %v1266_v45  ;;  %v1386_v44 = vld [vmem:[%s8558_s6] sm:$0xff] }
 0x3bf   :  { %v1326_v45 = vld [vmem:[%s8557_s24 + $0x20] sm:$0xff] }
 0x3c0   :  { %v1340_v49 = vadd.f32 1e-05, %v1308_v52 }
 0x3c1   :  { %v1272_v12 = vpop.xlane.xlu1 %1271  ;;  %v1275_v15 = vpop.xlane.xlu0 %1274 }
 0x3c2   :  { %v1310_v47 = vmul.f32 0.125, %v1272_v12  ;;  %v1311_v7 = vmul.f32 0.125, %v1275_v15 }
 0x3c3   :  { %v5780_v17 = vpop.eup %5779 }
 0x3c4   :  { %v5782_v31 = vpop.eup %5781  ;;  %v1342_v56 = vadd.f32 1e-05, %v1310_v47  ;;  %v1371_v57 = vmul.f32 %v5780_v17, %v1323_v29  ;;  %v1343_v28 = vadd.f32 1e-05, %v1311_v7 }
 0x3c5   :  { %v1278_v16 = vpop.xlane.xlu1 %1277  ;;  %v1281_v19 = vpop.xlane.xlu0 %1280  ;;  %v1370_v36 = vmul.f32 %v5782_v31, %v1322_v54  ;;  %v1324_v31 = vld [vmem:[%s8557_s24 + $0x10] sm:$0xff] }
 0x3c6   :  { %5785 = vrsqrt.f32 %v1342_v56  ;;  %v1312_v61 = vmul.f32 0.125, %v1278_v16  ;;  %1441 = vperm.xlu0 %5767, %v1371_v57   ;;  %v1403_v62 = vmul.f32 %v1371_v57, %v6502_v40  ;;  %v1313_v16 = vmul.f32 0.125, %v1281_v19 }
 0x3c7   :  { %1436 = vperm.xlu1 %5768, %v1370_v36   ;;  %5787 = vrsqrt.f32 %v1340_v49  ;;  %v1402_v13 = vmul.f32 %v1370_v36, %v6504_v42  ;;  %v1390_v42 = vld [vmem:[%s8558_s6 + $0x20] sm:$0xff]  ;;  %v1328_v49 = vld [vmem:[%s8557_s24 + $0x30] sm:$0xff] }
 0x3c8   :  { %v1344_v0 = vadd.f32 1e-05, %v1312_v61  ;;  %v1419_v3 = vsub.f32 %v1387_v59, %v1403_v62  ;;  %v5784_v37 = vpop.eup %5783 }
 0x3c9   :  { %v1284_v20 = vpop.xlane.xlu1 %1283  ;;  %v1287_v9 = vpop.xlane.xlu0 %1286  ;;  %v1373_v40 = vmul.f32 %v5784_v37, %v1325_v25  ;;  %v1418_v29 = vsub.f32 %v1386_v44, %v1402_v13  ;;  %v1330_v44 = vld [vmem:[%s8557_s24 + $0x40] sm:$0xff] }
 0x3ca   :  { %5789 = vrsqrt.f32 %v1344_v0  ;;  %v1314_v11 = vmul.f32 0.125, %v1284_v20 }
 0x3cb   :  { %1537 = vperm.xlu1 %5768, %v1419_v3   ;;  %5791 = vrsqrt.f32 %v1343_v28  ;;  %v1405_v20 = vmul.f32 %v1373_v40, %v6510_v43  ;;  %v1392_v43 = vld [vmem:[%s8558_s6 + $0x30] sm:$0xff] }
 0x3cc   :  { %v1346_v39 = vadd.f32 1e-05, %v1314_v11  ;;  %v1389_v11 = vld [vmem:[%s8558_s6 + $0x18] sm:$0xff] }
 0x3cd   :  { %v1290_v41 = vpop.xlane.xlu1 %1289  ;;  %v6595_v10 = vpop.xlane.xlu0 %1292 }
 0x3ce   :  { %5793 = vrsqrt.f32 %v1346_v39  ;;  %v1316_v12 = vmul.f32 0.125, %v1290_v41  ;;  %v1421_v39 = vsub.f32 %v1389_v11, %v1405_v20 }
 0x3cf   :  { %1451 = vperm.xlu1 %5768, %v1373_v40   ;;  %v1327_v40 = vld [vmem:[%s8557_s24 + $0x28] sm:$0xff] }
 0x3d0   :  { %v5786_v52 = vpop.eup %5785  ;;  %v1348_v36 = vadd.f32 1e-05, %v1316_v12 }
 0x3d1   :  { %v1299_v15 = vpop.xlane.xlu0 %1298  ;;  %v6604_v47 = vmul.f32 %v5786_v52, %v1326_v45  ;;  %v5788_v54 = vpop.eup %5787  ;;  %v1315_v45 = vmul.f32 0.125, %v1287_v9 }
 0x3d2   :  { %v1319_v17 = vmul.f32 0.125, %v1299_v15  ;;  %v1296_v61 = vpop.xlane.xlu1 %1295  ;;  %v1372_v0 = vmul.f32 %v5788_v54, %v1324_v31 }
 0x3d3   :  { %1532 = vperm.xlu1 %5768, %v1418_v29   ;;  %v1406_v56 = vmul.f32 %v6604_v47, %v6516_v32  ;;  %v1345_v32 = vadd.f32 1e-05, %v1313_v16  ;;  %v1318_v19 = vmul.f32 0.125, %v1296_v61  ;;  %v1347_v31 = vadd.f32 1e-05, %v1315_v45  ;;  %v6650_v61 = vld [vmem:[%s8558_s6 + $0x68] sm:$0xff] }
 0x3d4   :  { %v5790_v57 = vpop.eup %5789  ;;  %v1351_v59 = vadd.f32 1e-05, %v1319_v17  ;;  %v1404_v54 = vmul.f32 %v1372_v0, %v6518_v46  ;;  %v1388_v17 = vld [vmem:[%s8558_s6 + $0x10] sm:$0xff]  ;;  %v1394_v46 = vld [vmem:[%s8558_s6 + $0x40] sm:$0xff] }
 0x3d5   :  { %v1305_v62 = vpop.xlane.xlu0 %1304  ;;  %v1422_v7 = vsub.f32 %v1390_v42, %v1406_v56  ;;  %v1376_v3 = vmul.f32 %v5790_v57, %v1328_v49  ;;  %v5792_v28 = vpop.eup %5791  ;;  %v1350_v52 = vadd.f32 1e-05, %v1318_v19  ;;  %v1335_v42 = vld [vmem:[%s8557_s24 + $0x68] sm:$0xff] }
 0x3d6   :  { %v1321_v37 = vmul.f32 0.125, %v1305_v62  ;;  %5795 = vrsqrt.f32 %v1351_v59  ;;  %v1375_v15 = vmul.f32 %v5792_v28, %v1327_v40  ;;  %v1420_v56 = vsub.f32 %v1388_v17, %v1404_v54  ;;  %v1391_v19 = vld [vmem:[%s8558_s6 + $0x28] sm:$0xff] }
 0x3d7   :  { %1552 = vperm.xlu0 %5767, %v1422_v7   ;;  %1446 = vperm.xlu1 %5768, %v1372_v0   ;;  %5797 = vrsqrt.f32 %v1348_v36  ;;  %v1408_v41 = vmul.f32 %v1376_v3, %v6525_v34  ;;  %v1302_v34 = vpop.xlane.xlu1 %1301  ;;  %v1332_v36 = vld [vmem:[%s8557_s24 + $0x50] sm:$0xff]  ;;  %v1317_v62 = vmul.f32 0.125, %v6595_v10 }
 0x3d8   :  { %v1353_v25 = vadd.f32 1e-05, %v1321_v37  ;;  %v5794_v13 = vpop.eup %5793  ;;  %v1320_v9 = vmul.f32 0.125, %v1302_v34  ;;  %v1407_v11 = vmul.f32 %v1375_v15, %v6527_v48  ;;  %v1401_v48 = vld [vmem:[%s8558_s6 + $0x78] sm:$0xff] }
 0x3d9   :  { %v1424_v12 = vsub.f32 %v1392_v43, %v1408_v41  ;;  %v1378_v29 = vmul.f32 %v5794_v13, %v1330_v44  ;;  %v1396_v44 = vld [vmem:[%s8558_s6 + $0x50] sm:$0xff] }
 0x3da   :  { %5799 = vrsqrt.f32 %v1353_v25  ;;  %v1352_v7 = vadd.f32 1e-05, %v1320_v9  ;;  %v1329_v25 = vld [vmem:[%s8557_s24 + $0x38] sm:$0xff]  ;;  %v1423_v41 = vsub.f32 %v1391_v19, %v1407_v11 }
 0x3db   :  { %1466 = vperm.xlu0 %5767, %v1376_v3   ;;  %1547 = vperm.xlu1 %5768, %v1421_v39   ;;  %5801 = vrsqrt.f32 %v1345_v32  ;;  %v1410_v57 = vmul.f32 %v1378_v29, %v6534_v58  ;;  %v1337_v58 = vld [vmem:[%s8557_s24 + $0x78] sm:$0xff] }
 0x3dc   :  { %5803 = vrsqrt.f32 %v1350_v52 }
 0x3dd   :  { %5805 = vrsqrt.f32 %v1347_v31  ;;  %v1426_v20 = vsub.f32 %v1394_v46, %v1410_v57  ;;  %v1336_v31 = vld [vmem:[%s8557_s24 + $0x70] sm:$0xff] }
 0x3de   :  { %5807 = vrsqrt.f32 %v1352_v7  ;;  %v1397_v7 = vld [vmem:[%s8558_s6 + $0x58] sm:$0xff] }
 0x3df   :  { %1562 = vperm.xlu0 %5767, %v1424_v12   ;;  %1461 = vperm.xlu1 %5768, %v1375_v15   ;;  %v1331_v15 = vld [vmem:[%s8557_s24 + $0x48] sm:$0xff] }
 0x3e0   :  { %v5796_v49 = vpop.eup %5795 }
 0x3e1   :  { %v5798_v16 = vpop.eup %5797  ;;  %v6645_v59 = vmul.f32 %v5796_v49, %v1335_v42 }
 0x3e2   :  { %v1380_v37 = vmul.f32 %v5798_v16, %v1332_v36  ;;  %v1333_v16 = vld [vmem:[%s8557_s24 + $0x58] sm:$0xff] }
 0x3e3   :  { %1476 = vperm.xlu0 %5767, %v1378_v29   ;;  %1542 = vperm.xlu1 %5768, %v1420_v56   ;;  %v6658_v0 = vmul.f32 %v6645_v59, %v6566_v14  ;;  %v1349_v14 = vadd.f32 1e-05, %v1317_v62 }
 0x3e4   :  { %v5800_v3 = vpop.eup %5799  ;;  %v1412_v13 = vmul.f32 %v1380_v37, %v6544_v22  ;;  %v1393_v22 = vld [vmem:[%s8558_s6 + $0x38] sm:$0xff] }
 0x3e5   :  { %v5802_v32 = vpop.eup %5801  ;;  %v1431_v10 = vsub.f32 %v6650_v61, %v6658_v0  ;;  %v1385_v28 = vmul.f32 %v5800_v3, %v1337_v58  ;;  %5809 = vrsqrt.f32 %v1349_v14  ;;  %v1400_v58 = vld [vmem:[%s8558_s6 + $0x70] sm:$0xff] }
 0x3e6   :  { %v1377_v43 = vmul.f32 %v5802_v32, %v1329_v25  ;;  %v5804_v40 = vpop.eup %5803  ;;  %v1428_v52 = vsub.f32 %v1396_v44, %v1412_v13 }
 0x3e7   :  { %1572 = vperm.xlu0 %5767, %v1426_v20   ;;  %1456 = vperm.xlu1 %5768, %v6604_v47   ;;  %v1417_v39 = vmul.f32 %v1385_v28, %v6574_v33  ;;  %v1334_v47 = vld [vmem:[%s8557_s24 + $0x60] sm:$0xff]  ;;  %v5806_v12 = vpop.eup %5805  ;;  %s5858_s24 = smov 44  }
 0x3e8   :  { %v1382_v34 = vmul.f32 %v5804_v40, %v1334_v47  ;;  %v1409_v33 = vmul.f32 %v1377_v43, %v6536_v18  ;;  %v1379_v17 = vmul.f32 %v5806_v12, %v1331_v15  ;;  %v5808_v42 = vpop.eup %5807  ;;  %v1398_v18 = vld [vmem:[%s8558_s6 + $0x60] sm:$0xff] }
 0x3e9   :  { %v1433_v45 = vsub.f32 %v1401_v48, %v1417_v39  ;;  %v1384_v49 = vmul.f32 %v5808_v42, %v1336_v31 }
 0x3ea   :  { %v1425_v29 = vsub.f32 %v1393_v22, %v1409_v33  ;;  %v1414_v54 = vmul.f32 %v1382_v34, %v6554_v27  ;;  %v1411_v56 = vmul.f32 %v1379_v17, %v6546_v26  ;;  %v1395_v27 = vld [vmem:[%s8558_s6 + $0x48] sm:$0xff] }
 0x3eb   :  { %1486 = vperm.xlu0 %5767, %v1380_v37   ;;  %1557 = vperm.xlu1 %5768, %v1423_v41   ;;  %v1416_v36 = vmul.f32 %v1384_v49, %v6564_v55  ;;  %v1674_v55 = vld [vmem:[%s8559_s26] sm:$0xff] }
 0x3ec   :  { %v1430_v9 = vsub.f32 %v1398_v18, %v1414_v54  ;;  %v1427_v46 = vsub.f32 %v1395_v27, %v1411_v56  ;;  %5091 = vmatprep.mubr.f32.mxu1 %v1674_v55 }
 0x3ed   :  { %v1432_v26 = vsub.f32 %v1400_v58, %v1416_v36 }
 0x3ef   :  { %1582 = vperm.xlu0 %5767, %v1428_v52   ;;  %1471 = vperm.xlu1 %5768, %v1377_v43   ;;  %v5810_v57 = vpop.eup %5809 }
 0x3f0   :  { %v1381_v61 = vmul.f32 %v5810_v57, %v1333_v16 }
 0x3f2   :  { %v1413_v62 = vmul.f32 %v1381_v61, %v6556_v30 }
 0x3f3   :  { %1496 = vperm.xlu0 %5767, %v1382_v34   ;;  %1567 = vperm.xlu1 %5768, %v1425_v29  }
 0x3f4   :  { %v1429_v0 = vsub.f32 %v1397_v7, %v1413_v62 }
 0x3f7   :  { %1592 = vperm.xlu0 %5767, %v1430_v9   ;;  %1481 = vperm.xlu1 %5768, %v1379_v17  }
 0x3fb   :  { %1506 = vperm.xlu0 %5767, %v1384_v49   ;;  %1577 = vperm.xlu1 %5768, %v1427_v46  }
 0x3ff   :  { %1602 = vperm.xlu0 %5767, %v1432_v26   ;;  %1491 = vperm.xlu1 %5768, %v1381_v61  }
 0x403   :  { %1587 = vperm.xlu1 %5768, %v1429_v0  }
 0x407   :  { %1501 = vperm.xlu1 %5768, %v6645_v59  }
 0x40b   :  { %1597 = vperm.xlu1 %5768, %v1431_v10  }
 0x40f   :  { %1511 = vperm.xlu1 %5768, %v1385_v28  }
 0x413   :  { %1607 = vperm.xlu1 %5768, %v1433_v45  }
 0x445   :  { %v1442_v30 = vpop.permute.xlu0 %1441 }
 0x446   :  { %v1437_v3 = vpop.permute.xlu1 %1436  ;;  %v1515_v37 = vmul.f32 %v6438_v50, %v1442_v30 }
 0x447   :  { %v1514_v19 = vmul.f32 %v1437_v3, %v6440_v51 }
 0x44a   :  { %v1538_v20 = vpop.permute.xlu1 %1537 }
 0x44b   :  { %v1611_v32 = vadd.f32 %v1538_v20, %v1515_v37 }
 0x44d   :  { %v1643_v48 = vmul.f32 0.2, %v1611_v32  ;;  %vm1627_vm6 = vcmp.gt.f32.partialorder %v1611_v32, 0.0 }
 0x44e   :  { %v1452_v11 = vpop.permute.xlu1 %1451 }
 0x44f   :  { %v1659_v41 = vsel %vm1627_vm6, %v1611_v32, %v1643_v48  ;;  %v1517_v50 = vmul.f32 %v6446_v35, %v1452_v11 }
 0x452   :  { %v1533_v25 = vpop.permute.xlu1 %1532 }
 0x453   :  { %v1610_v59 = vadd.f32 %v1533_v25, %v1514_v19 }
 0x455   :  { %vm1626_vm7 = vcmp.gt.f32.partialorder %v1610_v59, 0.0  ;;  %v1642_v10 = vmul.f32 0.2, %v1610_v59 }
 0x456   :  { %v1447_v28 = vpop.permute.xlu1 %1446  ;;  %v1553_v14 = vpop.permute.xlu0 %1552 }
 0x457   :  { %v1658_v39 = vsel %vm1626_vm7, %v1610_v59, %v1642_v10  ;;  %v1516_v45 = vmul.f32 %v1447_v28, %v6448_v53 }
 0x458   :  { %v5259_v13 = vpack.c.bf16 %v1659_v41, %v1658_v39 }
 0x45a   :  { %v1548_v43 = vpop.permute.xlu1 %1547  ;;  %5260 = vmatprep.subr.bf16.mxu1 %v5259_v13  ;;  %v1467_v40 = vpop.permute.xlu0 %1466 }
 0x45b   :  { %5262 = vmatpush3.bf16.msra.mxu1 %v5259_v13  ;;  %v1613_v51 = vadd.f32 %v1548_v43, %v1517_v50  ;;  %v1520_v56 = vmul.f32 %v1467_v40, %v6462_v4 }
 0x45d   :  { %v1645_v33 = vmul.f32 0.2, %v1613_v51  ;;  %vm1629_vm8 = vcmp.gt.f32.partialorder %v1613_v51, 0.0 }
 0x45e   :  { %v1462_v44 = vpop.permute.xlu1 %1461  ;;  %v1563_v47 = vpop.permute.xlu0 %1562 }
 0x45f   :  { %v1661_v17 = vsel %vm1629_vm8, %v1613_v51, %v1645_v33  ;;  %v1519_v35 = vmul.f32 %v6452_v5, %v1462_v44 }
 0x462   :  { %v1543_v52 = vpop.permute.xlu1 %1542  ;;  %v1477_v34 = vpop.permute.xlu0 %1476 }
 0x463   :  { %v1612_v12 = vadd.f32 %v1543_v52, %v1516_v45  ;;  %v1522_v0 = vmul.f32 %v1477_v34, %v6470_v2 }
 0x465   :  { %vm1628_vm9 = vcmp.gt.f32.partialorder %v1612_v12, 0.0  ;;  %v1644_v22 = vmul.f32 0.2, %v1612_v12 }
 0x466   :  { %v1457_v15 = vpop.permute.xlu1 %1456  ;;  %v1573_v42 = vpop.permute.xlu0 %1572 }
 0x467   :  { %v1518_v29 = vmul.f32 %v1457_v15, %v6454_v60  ;;  %v1660_v54 = vsel %vm1628_vm9, %v1612_v12, %v1644_v22  ;;  %v1616_v60 = vadd.f32 %v1563_v47, %v1520_v56  ;;  %v1618_v3 = vadd.f32 %v1573_v42, %v1522_v0  ;;  %v1687_v0 = vld [vmem:[%s8559_s26 + $0x68] sm:$0xff] }
 0x468   :  { %v5263_v18 = vpack.c.bf16 %v1661_v17, %v1660_v54  ;;  %vm2035_vm9 = vcmask 130048  }
 0x469   :  { %v1614_v31 = vadd.f32 %v1553_v14, %v1518_v29  ;;  %v1648_v26 = vmul.f32 0.2, %v1616_v60  ;;  %vm1632_vm12 = vcmp.gt.f32.partialorder %v1616_v60, 0.0  ;;  %v1650_v19 = vmul.f32 0.2, %v1618_v3 }
 0x46a   :  { %v1558_v9 = vpop.permute.xlu1 %1557  ;;  %5264 = vmatprep.subr.bf16.mxu1 %v5263_v18  ;;  %v1487_v27 = vpop.permute.xlu0 %1486  ;;  %vm1634_vm14 = vcmp.gt.f32.partialorder %v1618_v3, 0.0 }
 0x46b   :  { %v1646_v53 = vmul.f32 0.2, %v1614_v31  ;;  %v1615_v49 = vadd.f32 %v1558_v9, %v1519_v35  ;;  %5266 = vmatpush3.bf16.msra.mxu1 %v5263_v18  ;;  %vm1630_vm10 = vcmp.gt.f32.partialorder %v1614_v31, 0.0  ;;  %v1664_v30 = vsel %vm1632_vm12, %v1616_v60, %v1648_v26  ;;  %v1678_v60 = vld [vmem:[%s8559_s26 + $0x20] sm:$0xff]  ;;  %v1684_v26 = vld [vmem:[%s8559_s26 + $0x50] sm:$0xff] }
 0x46c   :  { %v1524_v48 = vmul.f32 %v1487_v27, %v6478_v6  ;;  %v1666_v28 = vsel %vm1634_vm14, %v1618_v3, %v1650_v19  ;;  %v1675_v27 = vld [vmem:[%s8559_s26 + $0x8] sm:$0xff]  ;;  %v1690_v3 = vld [vmem:[%s8559_s26 + $0x80] sm:$0xff]  ;;  %v1697_v19 = vld [vmem:[%s8559_s26 + $0xb8] sm:$0xff]  ;;  %vm2460_vm12 = vcmask 523264  }
 0x46d   :  { %vm1631_vm11 = vcmp.gt.f32.partialorder %v1615_v49, 0.0  ;;  %v1647_v57 = vmul.f32 0.2, %v1615_v49  ;;  %v1662_v46 = vsel %vm1630_vm10, %v1614_v31, %v1646_v53  ;;  %vm2044_vm10 = vcmask 195584  }
 0x46e   :  { %v1472_v16 = vpop.permute.xlu1 %1471  ;;  %v1583_v7 = vpop.permute.xlu0 %1582 }
 0x46f   :  { %v1663_v36 = vsel %vm1631_vm11, %v1615_v49, %v1647_v57  ;;  %v1521_v58 = vmul.f32 %v6460_v63, %v1472_v16  ;;  %v1620_v10 = vadd.f32 %v1583_v7, %v1524_v48  ;;  %v1677_v16 = vld [vmem:[%s8559_s26 + $0x18] sm:$0xff]  ;;  %v1686_v7 = vld [vmem:[%s8559_s26 + $0x60] sm:$0xff]  ;;  %v1699_v48 = vld [vmem:[%s8559_s26 + $0xc8] sm:$0xff]  ;;  %vm2057_vm11 = vcmask 261120  }
 0x470   :  { %v5267_v61 = vpack.c.bf16 %v1663_v36, %v1662_v46  ;;  %v1679_v46 = vld [vmem:[%s8559_s26 + $0x28] sm:$0xff]  ;;  %v1680_v36 = vld [vmem:[%s8559_s26 + $0x30] sm:$0xff] }
 0x471   :  { %v1652_v43 = vmul.f32 0.2, %v1620_v10  ;;  %vm1636_vm1 = vcmp.gt.f32.partialorder %v1620_v10, 0.0 }
 0x472   :  { %v1568_v5 = vpop.permute.xlu1 %1567  ;;  %5268 = vmatprep.subr.bf16.mxu1 %v5267_v61  ;;  %v1497_v32 = vpop.permute.xlu0 %1496 }
 0x473   :  { %v1617_v62 = vadd.f32 %v1568_v5, %v1521_v58  ;;  %5270 = vmatpush3.bf16.msra.mxu1 %v5267_v61  ;;  %v1526_v50 = vmul.f32 %v1497_v32, %v6486_v24  ;;  %v1668_v45 = vsel %vm1636_vm1, %v1620_v10, %v1652_v43  ;;  %v1681_v61 = vld [vmem:[%s8559_s26 + $0x38] sm:$0xff]  ;;  %v1682_v58 = vld [vmem:[%s8559_s26 + $0x40] sm:$0xff]  ;;  %v1683_v5 = vld [vmem:[%s8559_s26 + $0x48] sm:$0xff] }
 0x474   :  { %v1695_v32 = vld [vmem:[%s8559_s26 + $0xa8] sm:$0xff]  ;;  %v1702_v10 = vld [vmem:[%s8559_s26 + $0xe0] sm:$0xff] }
 0x475   :  { %vm1633_vm13 = vcmp.gt.f32.partialorder %v1617_v62, 0.0  ;;  %v1649_v4 = vmul.f32 0.2, %v1617_v62 }
 0x476   :  { %v1482_v55 = vpop.permute.xlu1 %1481  ;;  %v1593_v39 = vpop.permute.xlu0 %1592 }
 0x477   :  { %v1665_v20 = vsel %vm1633_vm13, %v1617_v62, %v1649_v4  ;;  %v1523_v11 = vmul.f32 %v6468_v1, %v1482_v55  ;;  %v1622_v51 = vadd.f32 %v1593_v39, %v1526_v50  ;;  %v1685_v62 = vld [vmem:[%s8559_s26 + $0x58] sm:$0xff]  ;;  %v1688_v4 = vld [vmem:[%s8559_s26 + $0x70] sm:$0xff] }
 0x478   :  { %v5271_v37 = vpack.c.bf16 %v1665_v20, %v1664_v30  ;;  %v1689_v55 = vld [vmem:[%s8559_s26 + $0x78] sm:$0xff]  ;;  %v1691_v30 = vld [vmem:[%s8559_s26 + $0x88] sm:$0xff]  ;;  %v1692_v20 = vld [vmem:[%s8559_s26 + $0x90] sm:$0xff] }
 0x479   :  { %vm1638_vm3 = vcmp.gt.f32.partialorder %v1622_v51, 0.0  ;;  %v1705_v39 = vld [vmem:[%s8559_s26 + $0xf8] sm:$0xff] }
 0x47a   :  { %v1578_v63 = vpop.permute.xlu1 %1577  ;;  %5272 = vmatprep.subr.bf16.mxu1 %v5271_v37  ;;  %v1507_v44 = vpop.permute.xlu0 %1506 }
 0x47b   :  { %v1619_v25 = vadd.f32 %v1578_v63, %v1523_v11  ;;  %5274 = vmatpush3.bf16.msra.mxu1 %v5271_v37  ;;  %v1528_v29 = vmul.f32 %v1507_v44, %v6494_v8  ;;  %v1693_v37 = vld [vmem:[%s8559_s26 + $0x98] sm:$0xff]  ;;  %v1694_v11 = vld [vmem:[%s8559_s26 + $0xa0] sm:$0xff]  ;;  %v1696_v63 = vld [vmem:[%s8559_s26 + $0xb0] sm:$0xff] }
 0x47d   :  { %vm1635_vm15 = vcmp.gt.f32.partialorder %v1619_v25, 0.0  ;;  %v1651_v2 = vmul.f32 0.2, %v1619_v25 }
 0x47e   :  { %v1492_v59 = vpop.permute.xlu1 %1491  ;;  %v1603_v15 = vpop.permute.xlu0 %1602 }
 0x47f   :  { %v1667_v14 = vsel %vm1635_vm15, %v1619_v25, %v1651_v2  ;;  %v1525_v13 = vmul.f32 %v6476_v21, %v1492_v59  ;;  %v1654_v21 = vmul.f32 0.2, %v1622_v51  ;;  %v1624_v17 = vadd.f32 %v1603_v15, %v1528_v29  ;;  %v1698_v25 = vld [vmem:[%s8559_s26 + $0xc0] sm:$0xff]  ;;  %v1700_v2 = vld [vmem:[%s8559_s26 + $0xd0] sm:$0xff]  ;;  %v1701_v59 = vld [vmem:[%s8559_s26 + $0xd8] sm:$0xff] }
 0x480   :  { %v5275_v41 = vpack.c.bf16 %v1667_v14, %v1666_v28  ;;  %v1703_v28 = vld [vmem:[%s8559_s26 + $0xe8] sm:$0xff]  ;;  %v1704_v14 = vld [vmem:[%s8559_s26 + $0xf0] sm:$0xff] }
 0x481   :  { %v1670_v42 = vsel %vm1638_vm3, %v1622_v51, %v1654_v21  ;;  %vm1640_vm7 = vcmp.gt.f32.partialorder %v1624_v17, 0.0  ;;  %v2055_v51 = vld [vmem:[%s8560_s1 + $0x10] sm:$0xff] }
 0x482   :  { %v1588_v1 = vpop.permute.xlu1 %1587  ;;  %5276 = vmatprep.subr.bf16.mxu1 %v5275_v41 }
 0x483   :  { %v1621_v40 = vadd.f32 %v1588_v1, %v1525_v13  ;;  %5278 = vmatpush3.bf16.msra.mxu1 %v5275_v41  ;;  %v2053_v41 = vld [vmem:[%s8560_s1] sm:$0xff]  ;;  %v2054_v13 = vld [vmem:[%s8560_s1 + $0x8] sm:$0xff] }
 0x484   :  { %v5291_v1 = vpack.c.bf16 %v2054_v13, %v2053_v41 }
 0x485   :  { %vm1637_vm2 = vcmp.gt.f32.partialorder %v1621_v40, 0.0  ;;  %v1653_v6 = vmul.f32 0.2, %v1621_v40 }
 0x486   :  { %v1502_v47 = vpop.permute.xlu1 %1501 }
 0x487   :  { %v1669_v52 = vsel %vm1637_vm2, %v1621_v40, %v1653_v6  ;;  %v1527_v33 = vmul.f32 %v6484_v23, %v1502_v47  ;;  %v1656_v23 = vmul.f32 0.2, %v1624_v17 }
 0x488   :  { %v5279_v34 = vpack.c.bf16 %v1669_v52, %v1668_v45  ;;  %v2056_v45 = vld [vmem:[%s8560_s1 + $0x18] sm:$0xff]  ;;  %s5859_s1 = smov 88  }
 0x489   :  { %v1672_v56 = vsel %vm1640_vm7, %v1624_v17, %v1656_v23  ;;  %v5295_v52 = vpack.c.bf16 %v2056_v45, %v2055_v51 }
 0x48a   :  { %v1598_v12 = vpop.permute.xlu1 %1597  ;;  %5280 = vmatprep.subr.bf16.mxu1 %v5279_v34 }
 0x48b   :  { %v1623_v22 = vadd.f32 %v1598_v12, %v1527_v33  ;;  %5282 = vmatpush3.bf16.msra.mxu1 %v5279_v34 }
 0x48d   :  { %vm1639_vm6 = vcmp.gt.f32.partialorder %v1623_v22, 0.0  ;;  %v1655_v24 = vmul.f32 0.2, %v1623_v22 }
 0x48e   :  { %v1512_v54 = vpop.permute.xlu1 %1511 }
 0x48f   :  { %v1671_v18 = vsel %vm1639_vm6, %v1623_v22, %v1655_v24  ;;  %v1529_v31 = vmul.f32 %v6492_v38, %v1512_v54  ;;  %v1676_v38 = vld [vmem:[%s8559_s26 + $0x10] sm:$0xff] }
 0x490   :  { %v5283_v35 = vpack.c.bf16 %v1671_v18, %v1670_v42 }
 0x492   :  { %v1608_v9 = vpop.permute.xlu1 %1607  ;;  %5284 = vmatprep.subr.bf16.mxu1 %v5283_v35 }
 0x493   :  { %v1625_v53 = vadd.f32 %v1608_v9, %v1529_v31  ;;  %5286 = vmatpush3.bf16.msra.mxu1 %v5283_v35 }
 0x495   :  { %vm1641_vm8 = vcmp.gt.f32.partialorder %v1625_v53, 0.0  ;;  %v1657_v49 = vmul.f32 0.2, %v1625_v53 }
 0x497   :  { %v1673_v57 = vsel %vm1641_vm8, %v1625_v53, %v1657_v49  ;;  %vm2706_vm8 = vcmask 326656  }
 0x498   :  { %v5287_v8 = vpack.c.bf16 %v1673_v57, %v1672_v56 }
 0x49a   :  { %5288 = vmatprep.subr.bf16.mxu1 %v5287_v8 }
 0x49b   :  { %5290 = vmatpush3.bf16.msra.mxu1 %v5287_v8 }
 0x49c   :  { %5292 = vmatprep.subr.bf16.mxu1 %v5291_v1 }
 0x49e   :  { %5092 = vmatmul.mubr.f32.vlgmr.msra.gmra.mrb[16].mxu1 %v1675_v27 }
 0x49f   :  { %5094 = vmatprep.mubr.f32.mxu1 %v1676_v38  ;;  %5294 = vmatpush3.bf16.msra.mxu1 %v5291_v1 }
 0x4a0   :  { %5296 = vmatprep.subr.bf16.mxu1 %v5295_v52 }
 0x4a2   :  { %5095 = vmatmul.mubr.f32.gmra.mrb[18].mxu1 %v1677_v16 }
 0x4a3   :  { %5097 = vmatprep.mubr.f32.mxu1 %v1678_v60  ;;  %5298 = vmatpush3.bf16.msra.mxu1 %v5295_v52 }
 0x4a6   :  { %5098 = vmatmul.mubr.f32.gmra.mrb[20].mxu1 %v1679_v46 }
 0x4a7   :  { %5100 = vmatprep.mubr.f32.mxu1 %v1680_v36 }
 0x4aa   :  { %5101 = vmatmul.mubr.f32.gmra.mrb[22].mxu1 %v1681_v61 }
 0x4ab   :  { %5103 = vmatprep.mubr.f32.mxu1 %v1682_v58 }
 0x4ae   :  { %5104 = vmatmul.mubr.f32.gmra.mrb[24].mxu1 %v1683_v5 }
 0x4af   :  { %5106 = vmatprep.mubr.f32.mxu1 %v1684_v26 }
 0x4b2   :  { %5107 = vmatmul.mubr.f32.gmra.mrb[26].mxu1 %v1685_v62 }
 0x4b3   :  { %5109 = vmatprep.mubr.f32.mxu1 %v1686_v7 }
 0x4b6   :  { %5110 = vmatmul.mubr.f32.gmra.mrb[28].mxu1 %v1687_v0 }
 0x4b7   :  { %5112 = vmatprep.mubr.f32.mxu1 %v1688_v4 }
 0x4ba   :  { %5113 = vmatmul.mubr.f32.gmra.mrb[30].mxu1 %v1689_v55 }
 0x4bb   :  { %5115 = vmatprep.mubr.f32.mxu1 %v1690_v3 }
 0x4be   :  { %5116 = vmatmul.mubr.f32.gmra.mrb[32].mxu1 %v1691_v30 }
 0x4bf   :  { %5118 = vmatprep.mubr.f32.mxu1 %v1692_v20 }
 0x4c2   :  { %5119 = vmatmul.mubr.f32.gmra.mrb[34].mxu1 %v1693_v37 }
 0x4c3   :  { %5121 = vmatprep.mubr.f32.mxu1 %v1694_v11 }
 0x4c6   :  { %5122 = vmatmul.mubr.f32.gmra.mrb[36].mxu1 %v1695_v32 }
 0x4c7   :  { %5124 = vmatprep.mubr.f32.mxu1 %v1696_v63 }
 0x4ca   :  { %5125 = vmatmul.mubr.f32.gmra.mrb[38].mxu1 %v1697_v19 }
 0x4cb   :  { %5127 = vmatprep.mubr.f32.mxu1 %v1698_v25 }
 0x4ce   :  { %5128 = vmatmul.mubr.f32.gmra.mrb[40].mxu1 %v1699_v48 }
 0x4cf   :  { %5130 = vmatprep.mubr.f32.mxu1 %v1700_v2 }
 0x4d2   :  { %5131 = vmatmul.mubr.f32.gmra.mrb[42].mxu1 %v1701_v59 }
 0x4d3   :  { %5133 = vmatprep.mubr.f32.mxu1 %v1702_v10 }
 0x4d6   :  { %5134 = vmatmul.mubr.f32.gmra.mrb[44].mxu1 %v1703_v28 }
 0x4d7   :  { %5136 = vmatprep.mubr.f32.mxu1 %v1704_v14 }
 0x4da   :  { %5137 = vmatmul.mubr.f32.gmra.mrb[46].mxu1 %v1705_v39 }
 0x571   :  { %v6829_v43 = vpop.f32.mrb[16].mxu1 }
 0x572   :  { %v6831_v40 = vpop.f32.mrb[17].mxu1 }
 0x575   :  { %v6833_v50 = vpop.f32.mrb[18].mxu1 }
 0x576   :  { %v6835_v6 = vpop.f32.mrb[19].mxu1 }
 0x579   :  { %v6837_v44 = vpop.f32.mrb[20].mxu1 }
 0x57a   :  { %v6839_v47 = vpop.f32.mrb[21].mxu1 }
 0x57d   :  { %v6847_v34 = vpop.f32.mrb[22].mxu1 }
 0x57e   :  { %v6849_v33 = vpop.f32.mrb[23].mxu1 }
 0x581   :  { %v5105_v12 = vpop.f32.mrb[24].mxu1 }
 0x582   :  { %1941 = vrot.lane.b32.xlu1 %v5105_v12, %s5851_s3  ;;  %v1812_v21 = vpop.f32.mrb[25].mxu1 }
 0x583   :  { %1939 = vrot.lane.b32.xlu0 %v1812_v21, %s5851_s3 }
 0x585   :  { %v5108_v22 = vpop.f32.mrb[26].mxu1 }
 0x586   :  { %1945 = vrot.lane.b32.xlu1 %v5108_v22, %s5851_s3  ;;  %v1822_v15 = vpop.f32.mrb[27].mxu1 }
 0x587   :  { %1943 = vrot.lane.b32.xlu0 %v1822_v15, %s5851_s3 }
 0x589   :  { %v5111_v29 = vpop.f32.mrb[28].mxu1 }
 0x58a   :  { %1949 = vrot.lane.b32.xlu1 %v5111_v29, %s5851_s3  ;;  %v1832_v24 = vpop.f32.mrb[29].mxu1 }
 0x58b   :  { %1947 = vrot.lane.b32.xlu0 %v1832_v24, %s5851_s3 }
 0x58d   :  { %v5114_v54 = vpop.f32.mrb[30].mxu1 }
 0x58e   :  { %1953 = vrot.lane.b32.xlu1 %v5114_v54, %s5851_s3  ;;  %v1842_v17 = vpop.f32.mrb[31].mxu1 }
 0x58f   :  { %1951 = vrot.lane.b32.xlu0 %v1842_v17, %s5851_s3 }
 0x591   :  { %v5117_v42 = vpop.f32.mrb[32].mxu1 }
 0x592   :  { %1973 = vrot.lane.b32.xlu1 %v5117_v42, %s5852_s0  ;;  %v1852_v18 = vpop.f32.mrb[33].mxu1 }
 0x593   :  { %1971 = vrot.lane.b32.xlu0 %v1852_v18, %s5852_s0 }
 0x595   :  { %v5120_v35 = vpop.f32.mrb[34].mxu1 }
 0x596   :  { %1977 = vrot.lane.b32.xlu1 %v5120_v35, %s5852_s0  ;;  %v1862_v31 = vpop.f32.mrb[35].mxu1 }
 0x597   :  { %1975 = vrot.lane.b32.xlu0 %v1862_v31, %s5852_s0 }
 0x599   :  { %v5123_v9 = vpop.f32.mrb[36].mxu1 }
 0x59a   :  { %1981 = vrot.lane.b32.xlu1 %v5123_v9, %s5852_s0  ;;  %v1872_v23 = vpop.f32.mrb[37].mxu1 }
 0x59b   :  { %1979 = vrot.lane.b32.xlu0 %v1872_v23, %s5852_s0 }
 0x59d   :  { %v5126_v53 = vpop.f32.mrb[38].mxu1 }
 0x59e   :  { %1985 = vrot.lane.b32.xlu1 %v5126_v53, %s5852_s0  ;;  %v1882_v49 = vpop.f32.mrb[39].mxu1 }
 0x59f   :  { %1983 = vrot.lane.b32.xlu0 %v1882_v49, %s5852_s0 }
 0x5a1   :  { %v5129_v56 = vpop.f32.mrb[40].mxu1 }
 0x5a2   :  { %2005 = vrot.lane.b32.xlu1 %v5129_v56, %s5853_s4  ;;  %v1892_v57 = vpop.f32.mrb[41].mxu1 }
 0x5a3   :  { %2003 = vrot.lane.b32.xlu0 %v1892_v57, %s5853_s4 }
 0x5a5   :  { %v5132_v8 = vpop.f32.mrb[42].mxu1 }
 0x5a6   :  { %2009 = vrot.lane.b32.xlu1 %v5132_v8, %s5853_s4  ;;  %v1902_v27 = vpop.f32.mrb[43].mxu1 }
 0x5a7   :  { %2007 = vrot.lane.b32.xlu0 %v1902_v27, %s5853_s4 }
 0x5a9   :  { %v5135_v38 = vpop.f32.mrb[44].mxu1 }
 0x5aa   :  { %2013 = vrot.lane.b32.xlu1 %v5135_v38, %s5853_s4  ;;  %v1912_v16 = vpop.f32.mrb[45].mxu1 }
 0x5ab   :  { %2011 = vrot.lane.b32.xlu0 %v1912_v16, %s5853_s4 }
 0x5ad   :  { %v5138_v60 = vpop.f32.mrb[46].mxu1 }
 0x5ae   :  { %2017 = vrot.lane.b32.xlu1 %v5138_v60, %s5853_s4  ;;  %v1922_v46 = vpop.f32.mrb[47].mxu1 }
 0x5af   :  { %2015 = vrot.lane.b32.xlu0 %v1922_v46, %s5853_s4 }
 0x5f4   :  { %v1942_v36 = vpop.permute.xlu1 %1941 }
 0x5f5   :  { %v1940_v61 = vpop.permute.xlu0 %1939  ;;  %v2028_v25 = vsel %vm967_vm5, %v6829_v43, %v1942_v36 }
 0x5f6   :  { %v2027_v63 = vsel %vm967_vm5, %v6831_v40, %v1940_v61 }
 0x5f8   :  { %v1946_v58 = vpop.permute.xlu1 %1945 }
 0x5f9   :  { %v1944_v5 = vpop.permute.xlu0 %1943  ;;  %v2030_v41 = vsel %vm967_vm5, %v6833_v50, %v1946_v58 }
 0x5fa   :  { %v2029_v14 = vsel %vm967_vm5, %v6835_v6, %v1944_v5 }
 0x5fc   :  { %v1950_v26 = vpop.permute.xlu1 %1949 }
 0x5fd   :  { %v1948_v62 = vpop.permute.xlu0 %1947  ;;  %v2032_v50 = vsel %vm967_vm5, %v6837_v44, %v1950_v26 }
 0x5fe   :  { %v2031_v6 = vsel %vm967_vm5, %v6839_v47, %v1948_v62 }
 0x600   :  { %v1954_v7 = vpop.permute.xlu1 %1953 }
 0x601   :  { %v1952_v0 = vpop.permute.xlu0 %1951  ;;  %v2034_v44 = vsel %vm967_vm5, %v6847_v34, %v1954_v7 }
 0x602   :  { %v2033_v47 = vsel %vm967_vm5, %v6849_v33, %v1952_v0 }
 0x604   :  { %v1974_v4 = vpop.permute.xlu1 %1973 }
 0x605   :  { %v1972_v55 = vpop.permute.xlu0 %1971  ;;  %v2037_v59 = vsel %vm2035_vm9, %v2028_v25, %v1974_v4 }
 0x606   :  { %v2036_v48 = vsel %vm2035_vm9, %v2027_v63, %v1972_v55 }
 0x608   :  { %v1978_v3 = vpop.permute.xlu1 %1977 }
 0x609   :  { %v1976_v30 = vpop.permute.xlu0 %1975  ;;  %v2039_v43 = vsel %vm2035_vm9, %v2030_v41, %v1978_v3 }
 0x60a   :  { %v2038_v13 = vsel %vm2035_vm9, %v2029_v14, %v1976_v30 }
 0x60c   :  { %v1982_v20 = vpop.permute.xlu1 %1981 }
 0x60d   :  { %v1980_v37 = vpop.permute.xlu0 %1979  ;;  %v2041_v21 = vsel %vm2035_vm9, %v2032_v50, %v1982_v20 }
 0x60e   :  { %v2040_v52 = vsel %vm2035_vm9, %v2031_v6, %v1980_v37 }
 0x610   :  { %v1986_v11 = vpop.permute.xlu1 %1985 }
 0x611   :  { %v1984_v32 = vpop.permute.xlu0 %1983  ;;  %v2043_v17 = vsel %vm2035_vm9, %v2034_v44, %v1986_v11 }
 0x612   :  { %v2042_v24 = vsel %vm2035_vm9, %v2033_v47, %v1984_v32 }
 0x614   :  { %v2006_v19 = vpop.permute.xlu1 %2005 }
 0x615   :  { %v2004_v2 = vpop.permute.xlu0 %2003  ;;  %v2046_v28 = vsel %vm2044_vm10, %v2037_v59, %v2006_v19 }
 0x616   :  { %v2045_v10 = vsel %vm2044_vm10, %v2036_v48, %v2004_v2 }
 0x617   :  { %5147 = vmatprep.mubr.msk.f32.mxu1 %vm2057_vm11, %v2045_v10 }
 0x618   :  { %5148 = vmatmul.mubr.msk.f32.vlgmr.msra.gmra.mrb[48].mxu1 %vm2057_vm11, %v2046_v28  ;;  %v2010_v39 = vpop.permute.xlu1 %2009 }
 0x619   :  { %v2008_v1 = vpop.permute.xlu0 %2007  ;;  %v2048_v51 = vsel %vm2044_vm10, %v2039_v43, %v2010_v39 }
 0x61a   :  { %v2047_v40 = vsel %vm2044_vm10, %v2038_v13, %v2008_v1 }
 0x61b   :  { %5150 = vmatprep.mubr.msk.f32.mxu1 %vm2057_vm11, %v2047_v40 }
 0x61c   :  { %5151 = vmatmul.mubr.msk.f32.gmra.mrb[50].mxu1 %vm2057_vm11, %v2048_v51  ;;  %v2014_v45 = vpop.permute.xlu1 %2013 }
 0x61d   :  { %v2012_v12 = vpop.permute.xlu0 %2011  ;;  %v2050_v15 = vsel %vm2044_vm10, %v2041_v21, %v2014_v45 }
 0x61e   :  { %v2049_v22 = vsel %vm2044_vm10, %v2040_v52, %v2012_v12 }
 0x61f   :  { %5153 = vmatprep.mubr.msk.f32.mxu1 %vm2057_vm11, %v2049_v22 }
 0x620   :  { %5154 = vmatmul.mubr.msk.f32.gmra.mrb[52].mxu1 %vm2057_vm11, %v2050_v15  ;;  %v2018_v29 = vpop.permute.xlu1 %2017 }
 0x621   :  { %v2016_v54 = vpop.permute.xlu0 %2015  ;;  %v2052_v18 = vsel %vm2044_vm10, %v2043_v17, %v2018_v29 }
 0x622   :  { %v2051_v42 = vsel %vm2044_vm10, %v2042_v24, %v2016_v54  ;;  %vm2711_vm10 = vcmask 490496  }
 0x623   :  { %5156 = vmatprep.mubr.msk.f32.mxu1 %vm2057_vm11, %v2051_v42 }
 0x624   :  { %5157 = vmatmul.mubr.msk.f32.gmra.mrb[54].mxu1 %vm2057_vm11, %v2052_v18 }
 0x6eb   :  { %v6907_v33 = vpop.f32.mrb[48].mxu1 }
 0x6ec   :  { %v6909_v35 = vpop.f32.mrb[49].mxu1  ;;  %v2190_v34 = vsel %vm141_vm0, %v6907_v33, 0.0 }
 0x6ed   :  { %2191 = vadd.xlane.f32.xlu1 %v2190_v34  ;;  %v2187_v31 = vsel %vm141_vm0, %v6909_v35, 0.0 }
 0x6ee   :  { %2188 = vadd.xlane.f32.xlu0 %v2187_v31 }
 0x6ef   :  { %v6915_v9 = vpop.f32.mrb[50].mxu1 }
 0x6f0   :  { %v6917_v23 = vpop.f32.mrb[51].mxu1  ;;  %v2196_v53 = vsel %vm141_vm0, %v6915_v9, 0.0 }
 0x6f1   :  { %v2193_v57 = vsel %vm141_vm0, %v6917_v23, 0.0 }
 0x6f2   :  { %2197 = vadd.xlane.f32.xlu0 %v2196_v53 }
 0x6f3   :  { %v6921_v49 = vpop.f32.mrb[52].mxu1 }
 0x6f4   :  { %v6923_v56 = vpop.f32.mrb[53].mxu1  ;;  %v2202_v16 = vsel %vm141_vm0, %v6921_v49, 0.0 }
 0x6f5   :  { %v2199_v8 = vsel %vm141_vm0, %v6923_v56, 0.0 }
 0x6f6   :  { %2194 = vadd.xlane.f32.xlu0 %v2193_v57  ;;  %2200 = vadd.xlane.f32.xlu1 %v2199_v8 }
 0x6f7   :  { %v6929_v27 = vpop.f32.mrb[54].mxu1 }
 0x6f8   :  { %v6931_v38 = vpop.f32.mrb[55].mxu1  ;;  %v2208_v46 = vsel %vm141_vm0, %v6929_v27, 0.0 }
 0x6f9   :  { %v2205_v60 = vsel %vm141_vm0, %v6931_v38, 0.0 }
 0x6fa   :  { %2203 = vadd.xlane.f32.xlu0 %v2202_v16  ;;  %2206 = vadd.xlane.f32.xlu1 %v2205_v60  ;;  %v2269_v60 = vld [vmem:[%s8561_s5 + $0x8] sm:$0xff] }
 0x6fe   :  { %2209 = vadd.xlane.f32.xlu0 %v2208_v46 }
 0x77a   :  { %v2192_v36 = vpop.xlane.xlu1 %2191 }
 0x77b   :  { %v6939_v61 = vmul.f32 0.05, %v2192_v36  ;;  %v2189_v58 = vpop.xlane.xlu0 %2188 }
 0x77c   :  { %v6941_v5 = vmul.f32 0.05, %v2189_v58  ;;  %v2268_v58 = vld [vmem:[%s8561_s5] sm:$0xff] }
 0x77d   :  { %v2221_v26 = vsub.f32 %v6907_v33, %v6939_v61 }
 0x77e   :  { %v2220_v62 = vsub.f32 %v6909_v35, %v6941_v5 }
 0x77f   :  { %v2229_v7 = vmul.f32 %v2221_v26, %v2221_v26  ;;  %v2198_v0 = vpop.xlane.xlu0 %2197 }
 0x780   :  { %v2228_v4 = vmul.f32 %v2220_v62, %v2220_v62  ;;  %v6947_v55 = vmul.f32 0.05, %v2198_v0 }
 0x781   :  { %v2239_v3 = vsel %vm141_vm0, %v2229_v7, 0.0 }
 0x782   :  { %v2223_v30 = vsub.f32 %v6915_v9, %v6947_v55  ;;  %2240 = vadd.xlane.f32.xlu0 %v2239_v3  ;;  %v2236_v20 = vsel %vm141_vm0, %v2228_v4, 0.0 }
 0x783   :  { %v2195_v37 = vpop.xlane.xlu0 %2194  ;;  %v2201_v11 = vpop.xlane.xlu1 %2200  ;;  %2237 = vadd.xlane.f32.xlu1 %v2236_v20 }
 0x784   :  { %v2231_v32 = vmul.f32 %v2223_v30, %v2223_v30  ;;  %v6953_v63 = vmul.f32 0.05, %v2195_v37  ;;  %v6955_v19 = vmul.f32 0.05, %v2201_v11  ;;  %v2301_v37 = vld [vmem:[%s8523_s8 + $0x8] sm:$0xff] }
 0x786   :  { %v2222_v25 = vsub.f32 %v6917_v23, %v6953_v63  ;;  %v2224_v48 = vsub.f32 %v6923_v56, %v6955_v19  ;;  %v2245_v2 = vsel %vm141_vm0, %v2231_v32, 0.0 }
 0x787   :  { %v2204_v59 = vpop.xlane.xlu0 %2203  ;;  %2246 = vadd.xlane.f32.xlu0 %v2245_v2  ;;  %v2207_v10 = vpop.xlane.xlu1 %2206 }
 0x788   :  { %v2230_v28 = vmul.f32 %v2222_v25, %v2222_v25  ;;  %v6962_v14 = vmul.f32 0.05, %v2204_v59  ;;  %v6964_v39 = vmul.f32 0.05, %v2207_v10  ;;  %v2232_v41 = vmul.f32 %v2224_v48, %v2224_v48  ;;  %v2271_v10 = vld [vmem:[%s8561_s5 + $0x18] sm:$0xff] }
 0x78a   :  { %v2225_v13 = vsub.f32 %v6921_v49, %v6962_v14  ;;  %v2226_v1 = vsub.f32 %v6931_v38, %v6964_v39  ;;  %v2242_v43 = vsel %vm141_vm0, %v2230_v28, 0.0  ;;  %v2248_v12 = vsel %vm141_vm0, %v2232_v41, 0.0  ;;  %v2270_v28 = vld [vmem:[%s8561_s5 + $0x10] sm:$0xff] }
 0x78b   :  { %v2210_v40 = vpop.xlane.xlu0 %2209  ;;  %2243 = vadd.xlane.f32.xlu1 %v2242_v43 }
 0x78c   :  { %v2233_v51 = vmul.f32 %v2225_v13, %v2225_v13  ;;  %v6971_v6 = vmul.f32 0.05, %v2210_v40  ;;  %v2234_v45 = vmul.f32 %v2226_v1, %v2226_v1  ;;  %v2300_v40 = vld [vmem:[%s8523_s8] sm:$0xff] }
 0x78e   :  { %v2227_v50 = vsub.f32 %v6929_v27, %v6971_v6  ;;  %v2251_v52 = vsel %vm141_vm0, %v2233_v51, 0.0  ;;  %v2254_v15 = vsel %vm141_vm0, %v2234_v45, 0.0  ;;  %v2302_v51 = vld [vmem:[%s8523_s8 + $0x10] sm:$0xff] }
 0x78f   :  { %2252 = vadd.xlane.f32.xlu0 %v2251_v52  ;;  %2249 = vadd.xlane.f32.xlu1 %v2248_v12 }
 0x790   :  { %v2235_v21 = vmul.f32 %v2227_v50, %v2227_v50  ;;  %v2272_v50 = vld [vmem:[%s8561_s5 + $0x20] sm:$0xff] }
 0x792   :  { %v2257_v22 = vsel %vm141_vm0, %v2235_v21, 0.0 }
 0x793   :  { %2258 = vadd.xlane.f32.xlu0 %v2257_v22  ;;  %2255 = vadd.xlane.f32.xlu1 %v2254_v15  ;;  %v2303_v15 = vld [vmem:[%s8523_s8 + $0x18] sm:$0xff] }
 0x80f   :  { %v2241_v47 = vpop.xlane.xlu0 %2240 }
 0x810   :  { %v2261_v29 = vmul.f32 0.05, %v2241_v47  ;;  %v2238_v44 = vpop.xlane.xlu1 %2237 }
 0x811   :  { %v2260_v24 = vmul.f32 0.05, %v2238_v44 }
 0x812   :  { %v2277_v54 = vadd.f32 1e-05, %v2261_v29 }
 0x813   :  { %v2276_v17 = vadd.f32 1e-05, %v2260_v24 }
 0x814   :  { %5811 = vrsqrt.f32 %v2277_v54  ;;  %v2247_v42 = vpop.xlane.xlu0 %2246 }
 0x815   :  { %5813 = vrsqrt.f32 %v2276_v17  ;;  %v2263_v18 = vmul.f32 0.05, %v2247_v42  ;;  %v2274_v17 = vld [vmem:[%s8561_s5 + $0x30] sm:$0xff] }
 0x817   :  { %v2279_v34 = vadd.f32 1e-05, %v2263_v18 }
 0x818   :  { %v2244_v31 = vpop.xlane.xlu1 %2243 }
 0x819   :  { %v2262_v53 = vmul.f32 0.05, %v2244_v31  ;;  %5815 = vrsqrt.f32 %v2279_v34 }
 0x81b   :  { %v2278_v57 = vadd.f32 1e-05, %v2262_v53  ;;  %v2275_v53 = vld [vmem:[%s8561_s5 + $0x38] sm:$0xff] }
 0x81c   :  { %v2253_v8 = vpop.xlane.xlu0 %2252  ;;  %v2250_v16 = vpop.xlane.xlu1 %2249 }
 0x81d   :  { %5817 = vrsqrt.f32 %v2278_v57  ;;  %v2265_v46 = vmul.f32 0.05, %v2253_v8  ;;  %v2264_v36 = vmul.f32 0.05, %v2250_v16 }
 0x81e   :  { %v5812_v26 = vpop.eup %5811 }
 0x81f   :  { %v5814_v62 = vpop.eup %5813  ;;  %v2281_v7 = vadd.f32 1e-05, %v2265_v46  ;;  %v2280_v0 = vadd.f32 1e-05, %v2264_v36  ;;  %v2293_v4 = vmul.f32 %v5812_v26, %v2269_v60  ;;  %v2307_v36 = vld [vmem:[%s8523_s8 + $0x38] sm:$0xff] }
 0x820   :  { %v2259_v3 = vpop.xlane.xlu0 %2258  ;;  %v2256_v30 = vpop.xlane.xlu1 %2255  ;;  %v2292_v20 = vmul.f32 %v5814_v62, %v2268_v58 }
 0x821   :  { %v2266_v11 = vmul.f32 0.05, %v2256_v30  ;;  %2331 = vperm.xlu0 %5767, %v2293_v4   ;;  %v2309_v32 = vmul.f32 %v2293_v4, %v6939_v61  ;;  %5819 = vrsqrt.f32 %v2280_v0  ;;  %v2267_v25 = vmul.f32 0.05, %v2259_v3 }
 0x822   :  { %2326 = vperm.xlu1 %5768, %v2292_v20   ;;  %5821 = vrsqrt.f32 %v2281_v7  ;;  %v2308_v43 = vmul.f32 %v2292_v20, %v6941_v5 }
 0x823   :  { %v2282_v48 = vadd.f32 1e-05, %v2266_v11  ;;  %v2317_v2 = vsub.f32 %v2301_v37, %v2309_v32  ;;  %v5816_v59 = vpop.eup %5815  ;;  %v2283_v13 = vadd.f32 1e-05, %v2267_v25 }
 0x824   :  { %v2295_v61 = vmul.f32 %v5816_v59, %v2271_v10  ;;  %v2316_v12 = vsub.f32 %v2300_v40, %v2308_v43 }
 0x825   :  { %5823 = vrsqrt.f32 %v2282_v48 }
 0x826   :  { %2379 = vperm.xlu1 %5768, %v2317_v2   ;;  %5825 = vrsqrt.f32 %v2283_v13  ;;  %v2311_v21 = vmul.f32 %v2295_v61, %v6947_v55  ;;  %v2304_v55 = vld [vmem:[%s8523_s8 + $0x20] sm:$0xff] }
 0x827   :  { %v5818_v41 = vpop.eup %5817 }
 0x828   :  { %v2294_v1 = vmul.f32 %v5818_v41, %v2270_v28  ;;  %v2319_v29 = vsub.f32 %v2303_v15, %v2311_v21 }
 0x82a   :  { %2341 = vperm.xlu1 %5768, %v2295_v61   ;;  %2336 = vperm.xlu0 %5767, %v2294_v1   ;;  %v2310_v45 = vmul.f32 %v2294_v1, %v6953_v63  ;;  %v2273_v63 = vld [vmem:[%s8561_s5 + $0x28] sm:$0xff]  ;;  %s5856_s5 = smov 60  }
 0x82b   :  { %v5820_v52 = vpop.eup %5819 }
 0x82c   :  { %v2318_v5 = vsub.f32 %v2302_v51, %v2310_v45  ;;  %v5822_v22 = vpop.eup %5821  ;;  %v2296_v47 = vmul.f32 %v5820_v52, %v2272_v50 }
 0x82d   :  { %v2297_v44 = vmul.f32 %v5822_v22, %v2273_v63 }
 0x82e   :  { %2374 = vperm.xlu1 %5768, %v2316_v12   ;;  %2384 = vperm.xlu0 %5767, %v2318_v5   ;;  %v2312_v24 = vmul.f32 %v2296_v47, %v6955_v19  ;;  %v2305_v19 = vld [vmem:[%s8523_s8 + $0x28] sm:$0xff] }
 0x82f   :  { %v5824_v54 = vpop.eup %5823  ;;  %v2313_v18 = vmul.f32 %v2297_v44, %v6962_v14  ;;  %v2306_v14 = vld [vmem:[%s8523_s8 + $0x30] sm:$0xff]  ;;  %s5860_s8 = smov 48  }
 0x830   :  { %v2320_v42 = vsub.f32 %v2304_v55, %v2312_v24  ;;  %v2298_v34 = vmul.f32 %v5824_v54, %v2274_v17  ;;  %v5826_v31 = vpop.eup %5825 }
 0x831   :  { %v2321_v57 = vsub.f32 %v2305_v19, %v2313_v18  ;;  %v2299_v8 = vmul.f32 %v5826_v31, %v2275_v53  ;;  %v2445_v19 = vld [vmem:[%s8524_s9 + $0x8] sm:$0xff]  ;;  %v2447_v53 = vld [vmem:[%s8524_s9 + $0x18] sm:$0xff] }
 0x832   :  { %2389 = vperm.xlu1 %5768, %v2319_v29   ;;  %2346 = vperm.xlu0 %5767, %v2296_v47   ;;  %v2314_v16 = vmul.f32 %v2298_v34, %v6964_v39  ;;  %v2444_v39 = vld [vmem:[%s8524_s9] sm:$0xff] }
 0x833   :  { %v2315_v46 = vmul.f32 %v2299_v8, %v6971_v6  ;;  %5175 = vmatprep.mubr.msk.f32.mxu1 %vm2460_vm12, %v2444_v39  ;;  %v2456_v39 = vld [vmem:[%s8524_s9 + $0x60] sm:$0xff] }
 0x834   :  { %v2322_v60 = vsub.f32 %v2306_v14, %v2314_v16  ;;  %v2450_v16 = vld [vmem:[%s8524_s9 + $0x30] sm:$0xff]  ;;  %v2451_v14 = vld [vmem:[%s8524_s9 + $0x38] sm:$0xff] }
 0x835   :  { %v2323_v58 = vsub.f32 %v2307_v36, %v2315_v46  ;;  %v2453_v46 = vld [vmem:[%s8524_s9 + $0x48] sm:$0xff]  ;;  %v2454_v36 = vld [vmem:[%s8524_s9 + $0x50] sm:$0xff] }
 0x836   :  { %2351 = vperm.xlu1 %5768, %v2297_v44   ;;  %2394 = vperm.xlu0 %5767, %v2320_v42  }
 0x83a   :  { %2399 = vperm.xlu1 %5768, %v2321_v57   ;;  %2356 = vperm.xlu0 %5767, %v2298_v34   ;;  %v2448_v57 = vld [vmem:[%s8524_s9 + $0x20] sm:$0xff] }
 0x83e   :  { %2361 = vperm.xlu1 %5768, %v2299_v8   ;;  %2404 = vperm.xlu0 %5767, %v2322_v60   ;;  %v2449_v8 = vld [vmem:[%s8524_s9 + $0x28] sm:$0xff]  ;;  %v2452_v60 = vld [vmem:[%s8524_s9 + $0x40] sm:$0xff] }
 0x842   :  { %2409 = vperm.xlu1 %5768, %v2323_v58   ;;  %v2455_v58 = vld [vmem:[%s8524_s9 + $0x58] sm:$0xff] }
 0x8a0   :  { %v2332_v62 = vpop.permute.xlu0 %2331 }
 0x8a1   :  { %v2327_v26 = vpop.permute.xlu1 %2326  ;;  %v2365_v6 = vmul.f32 %v6907_v33, %v2332_v62  ;;  %v2458_v62 = vld [vmem:[%s8524_s9 + $0x70] sm:$0xff] }
 0x8a2   :  { %v2364_v30 = vmul.f32 %v2327_v26, %v6909_v35  ;;  %v2457_v26 = vld [vmem:[%s8524_s9 + $0x68] sm:$0xff] }
 0x8a5   :  { %v2380_v7 = vpop.permute.xlu1 %2379 }
 0x8a6   :  { %v2413_v3 = vadd.f32 %v2380_v7, %v2365_v6  ;;  %v2459_v7 = vld [vmem:[%s8524_s9 + $0x78] sm:$0xff]  ;;  %v2716_v6 = vld [vmem:[%s8525_s10] sm:$0xff] }
 0x8a8   :  { %v2429_v32 = vmul.f32 0.2, %v2413_v3  ;;  %vm2421_vm13 = vcmp.gt.f32.partialorder %v2413_v3, 0.0 }
 0x8a9   :  { %v2337_v0 = vpop.permute.xlu0 %2336  ;;  %v2342_v4 = vpop.permute.xlu1 %2341 }
 0x8aa   :  { %v2366_v20 = vmul.f32 %v2337_v0, %v6917_v23  ;;  %v2367_v2 = vmul.f32 %v6915_v9, %v2342_v4  ;;  %v2437_v61 = vsel %vm2421_vm13, %v2413_v3, %v2429_v32  ;;  %v2717_v0 = vld [vmem:[%s8525_s10 + $0x8] sm:$0xff]  ;;  %v2718_v3 = vld [vmem:[%s8525_s10 + $0x10] sm:$0xff]  ;;  %vm2726_vm13 = vcmask 654336  }
 0x8ab   :  { %v5315_v4 = vpack.c.bf16 %v2717_v0, %v2716_v6 }
 0x8ad   :  { %v2385_v37 = vpop.permute.xlu0 %2384  ;;  %v2375_v11 = vpop.permute.xlu1 %2374  ;;  %5316 = vmatprep.subr.bf16.mxu0 %v5315_v4 }
 0x8ae   :  { %v2414_v25 = vadd.f32 %v2385_v37, %v2366_v20  ;;  %v2412_v48 = vadd.f32 %v2375_v11, %v2364_v30  ;;  %5318 = vmatpush3.bf16.msra.mxu0 %v5315_v4  ;;  %v2719_v30 = vld [vmem:[%s8525_s10 + $0x18] sm:$0xff]  ;;  %v2720_v20 = vld [vmem:[%s8525_s10 + $0x20] sm:$0xff]  ;;  %v2721_v11 = vld [vmem:[%s8525_s10 + $0x28] sm:$0xff] }
 0x8af   :  { %v5319_v37 = vpack.c.bf16 %v2719_v30, %v2718_v3  ;;  %v5323_v32 = vpack.c.bf16 %v2721_v11, %v2720_v20 }
 0x8b0   :  { %vm2420_vm14 = vcmp.gt.f32.partialorder %v2412_v48, 0.0  ;;  %v2428_v59 = vmul.f32 0.2, %v2412_v48  ;;  %v2430_v33 = vmul.f32 0.2, %v2414_v25  ;;  %vm2422_vm15 = vcmp.gt.f32.partialorder %v2414_v25, 0.0 }
 0x8b1   :  { %v2347_v10 = vpop.permute.xlu0 %2346  ;;  %v2390_v28 = vpop.permute.xlu1 %2389  ;;  %5320 = vmatprep.subr.bf16.mxu0 %v5319_v37 }
 0x8b2   :  { %v2415_v41 = vadd.f32 %v2390_v28, %v2367_v2  ;;  %v2436_v13 = vsel %vm2420_vm14, %v2412_v48, %v2428_v59  ;;  %v2368_v23 = vmul.f32 %v2347_v10, %v6923_v56  ;;  %v2438_v9 = vsel %vm2422_vm15, %v2414_v25, %v2430_v33  ;;  %v2722_v25 = vld [vmem:[%s8525_s10 + $0x30] sm:$0xff]  ;;  %v2723_v48 = vld [vmem:[%s8525_s10 + $0x38] sm:$0xff]  ;;  %5322 = vmatpush3.bf16.msra.mxu0 %v5319_v37  ;;  %v2724_v59 = vld [vmem:[%s8525_s10 + $0x40] sm:$0xff] }
 0x8b3   :  { %v5299_v35 = vpack.c.bf16 %v2437_v61, %v2436_v13  ;;  %5324 = vmatprep.subr.bf16.mxu0 %v5323_v32  ;;  %v5327_v2 = vpack.c.bf16 %v2723_v48, %v2722_v25  ;;  %v2725_v10 = vld [vmem:[%s8525_s10 + $0x48] sm:$0xff]  ;;  %s5855_s10 = smov 40   ;;  %vm2824_vm14 = vcmask 359424  }
 0x8b4   :  { %vm2423_vm1 = vcmp.gt.f32.partialorder %v2415_v41, 0.0  ;;  %v2431_v1 = vmul.f32 0.2, %v2415_v41  ;;  %v5331_v28 = vpack.c.bf16 %v2725_v10, %v2724_v59 }
 0x8b5   :  { %v2395_v43 = vpop.permute.xlu0 %2394  ;;  %5300 = vmatprep.subr.bf16.mxu1 %v5299_v35  ;;  %v2352_v40 = vpop.permute.xlu1 %2351 }
 0x8b6   :  { %v2416_v51 = vadd.f32 %v2395_v43, %v2368_v23  ;;  %5302 = vmatpush3.bf16.msra.mxu1 %v5299_v35  ;;  %v2439_v45 = vsel %vm2423_vm1, %v2415_v41, %v2431_v1  ;;  %v2369_v52 = vmul.f32 %v6921_v49, %v2352_v40  ;;  %5326 = vmatpush3.bf16.msra.mxu0 %v5323_v32 }
 0x8b7   :  { %v5303_v50 = vpack.c.bf16 %v2439_v45, %v2438_v9  ;;  %5328 = vmatprep.subr.bf16.mxu0 %v5327_v2 }
 0x8b8   :  { %v2432_v21 = vmul.f32 0.2, %v2416_v51  ;;  %vm2424_vm2 = vcmp.gt.f32.partialorder %v2416_v51, 0.0 }
 0x8b9   :  { %v2357_v12 = vpop.permute.xlu0 %2356  ;;  %5304 = vmatprep.subr.bf16.mxu1 %v5303_v50  ;;  %v2400_v5 = vpop.permute.xlu1 %2399 }
 0x8ba   :  { %v2417_v22 = vadd.f32 %v2400_v5, %v2369_v52  ;;  %5306 = vmatpush3.bf16.msra.mxu1 %v5303_v50  ;;  %v2370_v56 = vmul.f32 %v2357_v12, %v6931_v38  ;;  %v2440_v44 = vsel %vm2424_vm2, %v2416_v51, %v2432_v21  ;;  %5330 = vmatpush3.bf16.msra.mxu0 %v5327_v2 }
 0x8bb   :  { %5332 = vmatprep.subr.bf16.mxu0 %v5331_v28 }
 0x8bc   :  { %vm2425_vm3 = vcmp.gt.f32.partialorder %v2417_v22, 0.0  ;;  %v2433_v15 = vmul.f32 0.2, %v2417_v22 }
 0x8bd   :  { %v2405_v47 = vpop.permute.xlu0 %2404  ;;  %v2362_v63 = vpop.permute.xlu1 %2361 }
 0x8be   :  { %v2418_v29 = vadd.f32 %v2405_v47, %v2370_v56  ;;  %v2441_v24 = vsel %vm2425_vm3, %v2417_v22, %v2433_v15  ;;  %v2371_v55 = vmul.f32 %v6929_v27, %v2362_v63  ;;  %v2446_v27 = vld [vmem:[%s8524_s9 + $0x10] sm:$0xff]  ;;  %5334 = vmatpush3.bf16.msra.mxu0 %v5331_v28  ;;  %vm3144_vm3 = vcmask 392192  }
 0x8bf   :  { %v5307_v54 = vpack.c.bf16 %v2441_v24, %v2440_v44 }
 0x8c0   :  { %v2434_v17 = vmul.f32 0.2, %v2418_v29  ;;  %vm2426_vm6 = vcmp.gt.f32.partialorder %v2418_v29, 0.0 }
 0x8c1   :  { %5308 = vmatprep.subr.bf16.mxu1 %v5307_v54  ;;  %v2410_v49 = vpop.permute.xlu1 %2409 }
 0x8c2   :  { %v2419_v42 = vadd.f32 %v2410_v49, %v2371_v55  ;;  %5310 = vmatpush3.bf16.msra.mxu1 %v5307_v54  ;;  %v2442_v34 = vsel %vm2426_vm6, %v2418_v29, %v2434_v17 }
 0x8c4   :  { %vm2427_vm7 = vcmp.gt.f32.partialorder %v2419_v42, 0.0  ;;  %v2435_v18 = vmul.f32 0.2, %v2419_v42 }
 0x8c6   :  { %v2443_v38 = vsel %vm2427_vm7, %v2419_v42, %v2435_v18  ;;  %vm3495_vm7 = vcmask 785408  }
 0x8c7   :  { %v5311_v31 = vpack.c.bf16 %v2443_v38, %v2442_v34 }
 0x8c9   :  { %5312 = vmatprep.subr.bf16.mxu1 %v5311_v31 }
 0x8ca   :  { %5314 = vmatpush3.bf16.msra.mxu1 %v5311_v31 }
 0x8cd   :  { %5176 = vmatmul.mubr.msk.f32.vlgmr.msra.gmra.mrb[56].mxu1 %vm2460_vm12, %v2445_v19 }
 0x8ce   :  { %5178 = vmatprep.mubr.msk.f32.mxu1 %vm2460_vm12, %v2446_v27 }
 0x8d1   :  { %5179 = vmatmul.mubr.msk.f32.gmra.mrb[58].mxu1 %vm2460_vm12, %v2447_v53 }
 0x8d2   :  { %5181 = vmatprep.mubr.msk.f32.mxu1 %vm2460_vm12, %v2448_v57 }
 0x8d5   :  { %5182 = vmatmul.mubr.msk.f32.gmra.mrb[60].mxu1 %vm2460_vm12, %v2449_v8 }
 0x8d6   :  { %5184 = vmatprep.mubr.msk.f32.mxu1 %vm2460_vm12, %v2450_v16 }
 0x8d9   :  { %5185 = vmatmul.mubr.msk.f32.gmra.mrb[62].mxu1 %vm2460_vm12, %v2451_v14 }
 0x8da   :  { %5187 = vmatprep.mubr.msk.f32.mxu1 %vm2460_vm12, %v2452_v60 }
 0x8dd   :  { %5188 = vmatmul.mubr.msk.f32.gmra.mrb[64].mxu1 %vm2460_vm12, %v2453_v46 }
 0x8de   :  { %5190 = vmatprep.mubr.msk.f32.mxu1 %vm2460_vm12, %v2454_v36 }
 0x8e1   :  { %5191 = vmatmul.mubr.msk.f32.gmra.mrb[66].mxu1 %vm2460_vm12, %v2455_v58 }
 0x8e2   :  { %5193 = vmatprep.mubr.msk.f32.mxu1 %vm2460_vm12, %v2456_v39 }
 0x8e5   :  { %5194 = vmatmul.mubr.msk.f32.gmra.mrb[68].mxu1 %vm2460_vm12, %v2457_v26 }
 0x8e6   :  { %5196 = vmatprep.mubr.msk.f32.mxu1 %vm2460_vm12, %v2458_v62 }
 0x8e9   :  { %5197 = vmatmul.mubr.msk.f32.gmra.mrb[70].mxu1 %vm2460_vm12, %v2459_v7 }
 0x9a0   :  { %v5177_v33 = vpop.f32.mrb[56].mxu1 }
 0x9a1   :  { %v2575_v41 = vpop.f32.mrb[57].mxu1 }
 0x9a4   :  { %v5180_v13 = vpop.f32.mrb[58].mxu1 }
 0x9a5   :  { %v2585_v61 = vpop.f32.mrb[59].mxu1 }
 0x9a8   :  { %v5183_v35 = vpop.f32.mrb[60].mxu1 }
 0x9a9   :  { %2660 = vrot.lane.b32.xlu1 %v5183_v35, %s5854_s29  ;;  %v2595_v23 = vpop.f32.mrb[61].mxu1 }
 0x9aa   :  { %2658 = vrot.lane.b32.xlu0 %v2595_v23, %s5854_s29 }
 0x9ac   :  { %v5186_v1 = vpop.f32.mrb[62].mxu1 }
 0x9ad   :  { %2664 = vrot.lane.b32.xlu1 %v5186_v1, %s5854_s29  ;;  %v2605_v43 = vpop.f32.mrb[63].mxu1 }
 0x9ae   :  { %2662 = vrot.lane.b32.xlu0 %v2605_v43, %s5854_s29 }
 0x9b0   :  { %v5189_v40 = vpop.f32.mrb[64].mxu1 }
 0x9b1   :  { %2676 = vrot.lane.b32.xlu1 %v5189_v40, %s5855_s10  ;;  %v2615_v51 = vpop.f32.mrb[65].mxu1 }
 0x9b2   :  { %2674 = vrot.lane.b32.xlu0 %v2615_v51, %s5855_s10 }
 0x9b4   :  { %v5192_v9 = vpop.f32.mrb[66].mxu1 }
 0x9b5   :  { %2680 = vrot.lane.b32.xlu1 %v5192_v9, %s5855_s10  ;;  %v2625_v45 = vpop.f32.mrb[67].mxu1 }
 0x9b6   :  { %2678 = vrot.lane.b32.xlu0 %v2625_v45, %s5855_s10 }
 0x9b8   :  { %v5195_v50 = vpop.f32.mrb[68].mxu1 }
 0x9b9   :  { %2692 = vrot.lane.b32.xlu1 %v5195_v50, %s5856_s5  ;;  %v2635_v52 = vpop.f32.mrb[69].mxu1 }
 0x9ba   :  { %2690 = vrot.lane.b32.xlu0 %v2635_v52, %s5856_s5 }
 0x9bc   :  { %v5198_v12 = vpop.f32.mrb[70].mxu1 }
 0x9bd   :  { %2696 = vrot.lane.b32.xlu1 %v5198_v12, %s5856_s5  ;;  %v2645_v5 = vpop.f32.mrb[71].mxu1 }
 0x9be   :  { %2694 = vrot.lane.b32.xlu0 %v2645_v5, %s5856_s5 }
 0xa1b   :  { %v2661_v21 = vpop.permute.xlu1 %2660 }
 0xa1c   :  { %v2659_v22 = vpop.permute.xlu0 %2658  ;;  %v2703_v55 = vsel %vm141_vm0, %v5177_v33, %v2661_v21  ;;  %v2867_v21 = vld [vmem:[%s8526_s11 + $0x8] sm:$0xff] }
 0xa1d   :  { %v2702_v24 = vsel %vm141_vm0, %v2575_v41, %v2659_v22  ;;  %v2866_v22 = vld [vmem:[%s8526_s11] sm:$0xff] }
 0xa1f   :  { %v2665_v56 = vpop.permute.xlu1 %2664 }
 0xa20   :  { %v2663_v15 = vpop.permute.xlu0 %2662  ;;  %v2705_v19 = vsel %vm141_vm0, %v5180_v13, %v2665_v56 }
 0xa21   :  { %v2704_v38 = vsel %vm141_vm0, %v2585_v61, %v2663_v15 }
 0xa23   :  { %v2677_v47 = vpop.permute.xlu1 %2676 }
 0xa24   :  { %v2675_v63 = vpop.permute.xlu0 %2674  ;;  %v2708_v42 = vsel %vm2706_vm8, %v2703_v55, %v2677_v47 }
 0xa25   :  { %v2707_v49 = vsel %vm2706_vm8, %v2702_v24, %v2675_v63 }
 0xa27   :  { %v2681_v29 = vpop.permute.xlu1 %2680 }
 0xa28   :  { %v2679_v44 = vpop.permute.xlu0 %2678  ;;  %v2710_v57 = vsel %vm2706_vm8, %v2705_v19, %v2681_v29  ;;  %v2883_v29 = vld [vmem:[%s8527_s12 + $0x8] sm:$0xff] }
 0xa29   :  { %v2709_v27 = vsel %vm2706_vm8, %v2704_v38, %v2679_v44  ;;  %v2868_v44 = vld [vmem:[%s8526_s11 + $0x10] sm:$0xff] }
 0xa2b   :  { %v2693_v54 = vpop.permute.xlu1 %2692 }
 0xa2c   :  { %v2691_v17 = vpop.permute.xlu0 %2690  ;;  %v2713_v34 = vsel %vm2711_vm10, %v2708_v42, %v2693_v54  ;;  %v2869_v42 = vld [vmem:[%s8526_s11 + $0x18] sm:$0xff] }
 0xa2d   :  { %v2712_v18 = vsel %vm2711_vm10, %v2707_v49, %v2691_v17  ;;  %v2884_v17 = vld [vmem:[%s8527_s12 + $0x10] sm:$0xff] }
 0xa2e   :  { %5219 = vmatprep.mubr.msk.f32.mxu0 %vm2726_vm13, %v2712_v18 }
 0xa2f   :  { %5220 = vmatmul.mubr.msk.f32.vlgmr.msra.gmra.mrb[64].mxu0 %vm2726_vm13, %v2713_v34  ;;  %v2697_v31 = vpop.permute.xlu1 %2696 }
 0xa30   :  { %v2695_v53 = vpop.permute.xlu0 %2694  ;;  %v2715_v16 = vsel %vm2711_vm10, %v2710_v57, %v2697_v31 }
 0xa31   :  { %v2714_v8 = vsel %vm2711_vm10, %v2709_v27, %v2695_v53  ;;  %v2882_v27 = vld [vmem:[%s8527_s12] sm:$0xff] }
 0xa32   :  { %5222 = vmatprep.mubr.msk.f32.mxu0 %vm2726_vm13, %v2714_v8  ;;  %v2885_v8 = vld [vmem:[%s8527_s12 + $0x18] sm:$0xff] }
 0xa33   :  { %5223 = vmatmul.mubr.msk.f32.gmra.mrb[66].mxu0 %vm2726_vm13, %v2715_v16 }
 0xb02   :  { %v7153_v14 = vpop.f32.mrb[64].mxu0 }
 0xb03   :  { %v7155_v60 = vpop.f32.mrb[65].mxu0  ;;  %v2828_v46 = vsel %vm2824_vm14, %v7153_v14, 0.0 }
 0xb04   :  { %2829 = vadd.xlane.f32.xlu1 %v2828_v46  ;;  %v2825_v36 = vsel %vm2824_vm14, %v7155_v60, 0.0  ;;  %v2954_v46 = vld [vmem:[%s8528_s13] sm:$0xff] }
 0xb05   :  { %2826 = vadd.xlane.f32.xlu0 %v2825_v36  ;;  %5233 = vmatprep.mubr.msk.f32.mxu0 %vm2057_vm11, %v2954_v46 }
 0xb06   :  { %v7161_v58 = vpop.f32.mrb[66].mxu0 }
 0xb07   :  { %v7163_v39 = vpop.f32.mrb[67].mxu0  ;;  %v2834_v62 = vsel %vm2824_vm14, %v7161_v58, 0.0 }
 0xb08   :  { %v2831_v26 = vsel %vm2824_vm14, %v7163_v39, 0.0 }
 0xb09   :  { %2832 = vadd.xlane.f32.xlu0 %v2831_v26 }
 0xb0d   :  { %2835 = vadd.xlane.f32.xlu0 %v2834_v62 }
 0xb91   :  { %v2830_v7 = vpop.xlane.xlu1 %2829 }
 0xb92   :  { %v2839_v6 = vmul.f32 0.022727273, %v2830_v7  ;;  %v2827_v0 = vpop.xlane.xlu0 %2826 }
 0xb93   :  { %v2838_v4 = vmul.f32 0.022727273, %v2827_v0 }
 0xb94   :  { %v2843_v3 = vsub.f32 %v7153_v14, %v2839_v6 }
 0xb95   :  { %v2842_v30 = vsub.f32 %v7155_v60, %v2838_v4 }
 0xb96   :  { %v2847_v20 = vmul.f32 %v2843_v3, %v2843_v3  ;;  %v2833_v37 = vpop.xlane.xlu0 %2832 }
 0xb97   :  { %v2846_v11 = vmul.f32 %v2842_v30, %v2842_v30  ;;  %v2840_v32 = vmul.f32 0.022727273, %v2833_v37 }
 0xb98   :  { %v2853_v25 = vsel %vm2824_vm14, %v2847_v20, 0.0 }
 0xb99   :  { %v2844_v48 = vsub.f32 %v7163_v39, %v2840_v32  ;;  %2854 = vadd.xlane.f32.xlu0 %v2853_v25  ;;  %v2850_v2 = vsel %vm2824_vm14, %v2846_v11, 0.0 }
 0xb9a   :  { %2851 = vadd.xlane.f32.xlu1 %v2850_v2  ;;  %v2836_v59 = vpop.xlane.xlu0 %2835 }
 0xb9b   :  { %v2848_v10 = vmul.f32 %v2844_v48, %v2844_v48  ;;  %v2841_v28 = vmul.f32 0.022727273, %v2836_v59 }
 0xb9d   :  { %v2845_v33 = vsub.f32 %v7161_v58, %v2841_v28  ;;  %v2856_v41 = vsel %vm2824_vm14, %v2848_v10, 0.0 }
 0xb9e   :  { %2857 = vadd.xlane.f32.xlu1 %v2856_v41 }
 0xb9f   :  { %v2849_v13 = vmul.f32 %v2845_v33, %v2845_v33 }
 0xba1   :  { %v2859_v61 = vsel %vm2824_vm14, %v2849_v13, 0.0 }
 0xba2   :  { %2860 = vadd.xlane.f32.xlu0 %v2859_v61 }
 0xc26   :  { %v2855_v35 = vpop.xlane.xlu0 %2854 }
 0xc27   :  { %v2863_v23 = vmul.f32 0.022727273, %v2855_v35  ;;  %v2852_v1 = vpop.xlane.xlu1 %2851  ;;  %v2956_v35 = vld [vmem:[%s8528_s13 + $0x10] sm:$0xff] }
 0xc28   :  { %v2862_v43 = vmul.f32 0.022727273, %v2852_v1  ;;  %v2958_v1 = vld [vmem:[%s8528_s13 + $0x20] sm:$0xff] }
 0xc29   :  { %v2871_v40 = vadd.f32 1e-05, %v2863_v23  ;;  %v2957_v23 = vld [vmem:[%s8528_s13 + $0x18] sm:$0xff] }
 0xc2a   :  { %v2870_v51 = vadd.f32 1e-05, %v2862_v43  ;;  %v2959_v43 = vld [vmem:[%s8528_s13 + $0x28] sm:$0xff] }
 0xc2b   :  { %5827 = vrsqrt.f32 %v2871_v40  ;;  %v2858_v9 = vpop.xlane.xlu1 %2857  ;;  %v2960_v40 = vld [vmem:[%s8528_s13 + $0x30] sm:$0xff] }
 0xc2c   :  { %5829 = vrsqrt.f32 %v2870_v51  ;;  %v2864_v45 = vmul.f32 0.022727273, %v2858_v9  ;;  %v2961_v51 = vld [vmem:[%s8528_s13 + $0x38] sm:$0xff]  ;;  %v5857_v9 = vmov 0.0|0.0  }
 0xc2d   :  { %5343 = vmatprep.subr.bf16.mxu1 %v5857_v9 }
 0xc2e   :  { %v2872_v50 = vadd.f32 1e-05, %v2864_v45  ;;  %v3122_v45 = vld [vmem:[%s8529_s14] sm:$0xff] }
 0xc2f   :  { %v2861_v52 = vpop.xlane.xlu0 %2860 }
 0xc30   :  { %5831 = vrsqrt.f32 %v2872_v50  ;;  %v2865_v12 = vmul.f32 0.022727273, %v2861_v52  ;;  %v3123_v50 = vld [vmem:[%s8529_s14 + $0x8] sm:$0xff]  ;;  %v3124_v52 = vld [vmem:[%s8529_s14 + $0x10] sm:$0xff] }
 0xc32   :  { %v2873_v5 = vadd.f32 1e-05, %v2865_v12  ;;  %v5344_v12 = vpack.c.bf16 %v3123_v50, %v3122_v45 }
 0xc34   :  { %5833 = vrsqrt.f32 %v2873_v5  ;;  %v3125_v5 = vld [vmem:[%s8529_s14 + $0x18] sm:$0xff]  ;;  %5345 = vmatpush1.bf16.msra.mxu1 %v5344_v12 }
 0xc35   :  { %v5828_v56 = vpop.eup %5827  ;;  %5346 = vmatprep.subr.bf16.mxu1 %v5857_v9 }
 0xc36   :  { %v5830_v15 = vpop.eup %5829  ;;  %v2879_v47 = vmul.f32 %v5828_v56, %v2867_v21  ;;  %v5347_v21 = vpack.c.bf16 %v3125_v5, %v3124_v52  ;;  %v3127_v56 = vld [vmem:[%s8529_s14 + $0x28] sm:$0xff] }
 0xc37   :  { %v2878_v63 = vmul.f32 %v5830_v15, %v2866_v22  ;;  %v3126_v22 = vld [vmem:[%s8529_s14 + $0x20] sm:$0xff] }
 0xc38   :  { %2901 = vperm.xlu0 %5767, %v2879_v47   ;;  %v2887_v24 = vmul.f32 %v2879_v47, %v2839_v6  ;;  %5348 = vmatpush1.bf16.msra.mxu1 %v5347_v21  ;;  %v5350_v15 = vpack.c.bf16 %v3127_v56, %v3126_v22  ;;  %v3128_v47 = vld [vmem:[%s8529_s14 + $0x30] sm:$0xff] }
 0xc39   :  { %2896 = vperm.xlu1 %5768, %v2878_v63   ;;  %v2886_v19 = vmul.f32 %v2878_v63, %v2838_v4  ;;  %5349 = vmatprep.subr.bf16.mxu1 %v5857_v9  ;;  %v3129_v63 = vld [vmem:[%s8529_s14 + $0x38] sm:$0xff] }
 0xc3a   :  { %v5832_v54 = vpop.eup %5831  ;;  %v2891_v55 = vsub.f32 %v2883_v29, %v2887_v24  ;;  %v5353_v29 = vpack.c.bf16 %v3129_v63, %v3128_v47  ;;  %v3131_v24 = vld [vmem:[%s8529_s14 + $0x48] sm:$0xff] }
 0xc3b   :  { %v2880_v49 = vmul.f32 %v5832_v54, %v2868_v44  ;;  %v2890_v53 = vsub.f32 %v2882_v27, %v2886_v19  ;;  %v3130_v44 = vld [vmem:[%s8529_s14 + $0x40] sm:$0xff] }
 0xc3c   :  { %5351 = vmatpush1.bf16.msra.mxu1 %v5350_v15  ;;  %v5356_v54 = vpack.c.bf16 %v3131_v24, %v3130_v44  ;;  %v3138_v27 = vld [vmem:[%s8529_s14 + $0x80] sm:$0xff] }
 0xc3d   :  { %2906 = vperm.xlu0 %5767, %v2880_v49   ;;  %2925 = vperm.xlu1 %5768, %v2891_v55   ;;  %v2888_v18 = vmul.f32 %v2880_v49, %v2840_v32  ;;  %v3132_v55 = vld [vmem:[%s8529_s14 + $0x50] sm:$0xff]  ;;  %v3133_v49 = vld [vmem:[%s8529_s14 + $0x58] sm:$0xff] }
 0xc3e   :  { %v5834_v34 = vpop.eup %5833  ;;  %5352 = vmatprep.subr.bf16.mxu1 %v5857_v9 }
 0xc3f   :  { %v2892_v38 = vsub.f32 %v2884_v17, %v2888_v18  ;;  %v2881_v31 = vmul.f32 %v5834_v34, %v2869_v42  ;;  %v5359_v17 = vpack.c.bf16 %v3133_v49, %v3132_v55  ;;  %v3134_v42 = vld [vmem:[%s8529_s14 + $0x60] sm:$0xff]  ;;  %v3135_v18 = vld [vmem:[%s8529_s14 + $0x68] sm:$0xff] }
 0xc40   :  { %5354 = vmatpush1.bf16.msra.mxu1 %v5353_v29  ;;  %v5362_v34 = vpack.c.bf16 %v3135_v18, %v3134_v42 }
 0xc41   :  { %2930 = vperm.xlu0 %5767, %v2892_v38   ;;  %2911 = vperm.xlu1 %5768, %v2881_v31   ;;  %v2889_v57 = vmul.f32 %v2881_v31, %v2841_v28  ;;  %v3136_v38 = vld [vmem:[%s8529_s14 + $0x70] sm:$0xff]  ;;  %v3137_v31 = vld [vmem:[%s8529_s14 + $0x78] sm:$0xff] }
 0xc42   :  { %5355 = vmatprep.subr.bf16.mxu1 %v5857_v9  ;;  %v5365_v19 = vpack.c.bf16 %v3137_v31, %v3136_v38  ;;  %v3256_v38 = vld [vmem:[%s8531_s16 + $0x8] sm:$0xff]  ;;  %v3255_v31 = vld [vmem:[%s8531_s16] sm:$0xff]  ;;  %s5862_s16 = smov 96  }
 0xc43   :  { %v2893_v16 = vsub.f32 %v2885_v8, %v2889_v57  ;;  %v3140_v8 = vld [vmem:[%s8529_s14 + $0x90] sm:$0xff] }
 0xc44   :  { %5357 = vmatpush1.bf16.msra.mxu1 %v5356_v54  ;;  %v3247_v54 = vld [vmem:[%s8530_s15] sm:$0xff] }
 0xc45   :  { %2920 = vperm.xlu1 %5768, %v2890_v53   ;;  %5358 = vmatprep.subr.bf16.mxu1 %v5857_v9  ;;  %v3139_v53 = vld [vmem:[%s8529_s14 + $0x88] sm:$0xff] }
 0xc46   :  { %v5368_v57 = vpack.c.bf16 %v3139_v53, %v3138_v27 }
 0xc48   :  { %5360 = vmatpush1.bf16.msra.mxu1 %v5359_v17  ;;  %v3248_v17 = vld [vmem:[%s8530_s15 + $0x8] sm:$0xff] }
 0xc49   :  { %2935 = vperm.xlu1 %5768, %v2893_v16   ;;  %5361 = vmatprep.subr.bf16.mxu1 %v5857_v9  ;;  %v3141_v16 = vld [vmem:[%s8529_s14 + $0x98] sm:$0xff] }
 0xc4a   :  { %v5371_v46 = vpack.c.bf16 %v3141_v16, %v3140_v8 }
 0xc4c   :  { %5363 = vmatpush1.bf16.msra.mxu1 %v5362_v34 }
 0xc4d   :  { %5364 = vmatprep.subr.bf16.mxu1 %v5857_v9 }
 0xc50   :  { %5366 = vmatpush1.bf16.msra.mxu1 %v5365_v19 }
 0xc51   :  { %5367 = vmatprep.subr.bf16.mxu1 %v5857_v9 }
 0xc54   :  { %5369 = vmatpush1.bf16.msra.mxu1 %v5368_v57  ;;  %v3291_v57 = vld [vmem:[%s8532_s17] sm:$0xff] }
 0xc55   :  { %5370 = vmatprep.subr.bf16.mxu1 %v5857_v9 }
 0xc58   :  { %5372 = vmatpush1.bf16.msra.mxu1 %v5371_v46 }
 0xc59   :  { %5373 = vmatprep.subr.bf16.mxu1 %v5857_v9 }
 0xcb7   :  { %v2902_v36 = vpop.permute.xlu0 %2901 }
 0xcb8   :  { %v2897_v26 = vpop.permute.xlu1 %2896  ;;  %v2915_v6 = vmul.f32 %v7153_v14, %v2902_v36  ;;  %v3142_v36 = vld [vmem:[%s8529_s14 + $0xa0] sm:$0xff] }
 0xcb9   :  { %v2914_v30 = vmul.f32 %v2897_v26, %v7155_v60  ;;  %v3143_v26 = vld [vmem:[%s8529_s14 + $0xa8] sm:$0xff] }
 0xcbc   :  { %v2926_v62 = vpop.permute.xlu1 %2925  ;;  %v2907_v7 = vpop.permute.xlu0 %2906 }
 0xcbd   :  { %v2939_v4 = vadd.f32 %v2926_v62, %v2915_v6  ;;  %v2916_v20 = vmul.f32 %v2907_v7, %v7163_v39  ;;  %v5374_v62 = vpack.c.bf16 %v3143_v26, %v3142_v36 }
 0xcbf   :  { %v2947_v11 = vmul.f32 0.2, %v2939_v4  ;;  %vm2943_vm0 = vcmp.gt.f32.partialorder %v2939_v4, 0.0  ;;  %5375 = vmatpush1.bf16.msra.mxu1 %v5374_v62 }
 0xcc0   :  { %v2912_v0 = vpop.permute.xlu1 %2911  ;;  %v2931_v3 = vpop.permute.xlu0 %2930 }
 0xcc1   :  { %v2940_v32 = vadd.f32 %v2931_v3, %v2916_v20  ;;  %v2917_v48 = vmul.f32 %v7161_v58, %v2912_v0  ;;  %v2951_v33 = vsel %vm2943_vm0, %v2939_v4, %v2947_v11  ;;  %v2955_v58 = vld [vmem:[%s8528_s13 + $0x8] sm:$0xff] }
 0xcc3   :  { %v2948_v10 = vmul.f32 0.2, %v2940_v32  ;;  %vm2944_vm1 = vcmp.gt.f32.partialorder %v2940_v32, 0.0 }
 0xcc4   :  { %v2921_v37 = vpop.permute.xlu1 %2920 }
 0xcc5   :  { %v2938_v25 = vadd.f32 %v2921_v37, %v2914_v30  ;;  %v2952_v39 = vsel %vm2944_vm1, %v2940_v32, %v2948_v10 }
 0xcc7   :  { %vm2942_vm15 = vcmp.gt.f32.partialorder %v2938_v25, 0.0  ;;  %v2946_v2 = vmul.f32 0.2, %v2938_v25 }
 0xcc8   :  { %v2936_v59 = vpop.permute.xlu1 %2935 }
 0xcc9   :  { %v2941_v28 = vadd.f32 %v2936_v59, %v2917_v48  ;;  %v2950_v14 = vsel %vm2942_vm15, %v2938_v25, %v2946_v2 }
 0xcca   :  { %v5335_v41 = vpack.c.bf16 %v2951_v33, %v2950_v14 }
 0xccb   :  { %vm2945_vm2 = vcmp.gt.f32.partialorder %v2941_v28, 0.0  ;;  %v2949_v60 = vmul.f32 0.2, %v2941_v28 }
 0xccc   :  { %5336 = vmatprep.subr.bf16.mxu0 %v5335_v41 }
 0xccd   :  { %5338 = vmatpush3.bf16.msra.mxu0 %v5335_v41  ;;  %v2953_v13 = vsel %vm2945_vm2, %v2941_v28, %v2949_v60 }
 0xcce   :  { %v5339_v61 = vpack.c.bf16 %v2953_v13, %v2952_v39 }
 0xcd0   :  { %5340 = vmatprep.subr.bf16.mxu0 %v5339_v61 }
 0xcd1   :  { %5342 = vmatpush3.bf16.msra.mxu0 %v5339_v61 }
 0xcd4   :  { %5234 = vmatmul.mubr.msk.f32.vlgmr.msra.gmra.mrb[68].mxu0 %vm2057_vm11, %v2955_v58 }
 0xcd5   :  { %5236 = vmatprep.mubr.msk.f32.mxu0 %vm2057_vm11, %v2956_v35 }
 0xcd8   :  { %5237 = vmatmul.mubr.msk.f32.gmra.mrb[70].mxu0 %vm2057_vm11, %v2957_v23 }
 0xcd9   :  { %5239 = vmatprep.mubr.msk.f32.mxu0 %vm2057_vm11, %v2958_v1 }
 0xcdc   :  { %5240 = vmatmul.mubr.msk.f32.gmra.mrb[72].mxu0 %vm2057_vm11, %v2959_v43 }
 0xcdd   :  { %5242 = vmatprep.mubr.msk.f32.mxu0 %vm2057_vm11, %v2960_v40 }
 0xce0   :  { %5243 = vmatmul.mubr.msk.f32.gmra.mrb[74].mxu0 %vm2057_vm11, %v2961_v51  ;;  %vm3117_vm11 = vcmask 719872  }
 0xda7   :  { %v5235_v7 = vpop.f32.mrb[68].mxu0 }
 0xda8   :  { %v3052_v6 = vpop.f32.mrb[69].mxu0 }
 0xdab   :  { %v5238_v0 = vpop.f32.mrb[70].mxu0 }
 0xdac   :  { %v3062_v4 = vpop.f32.mrb[71].mxu0 }
 0xdad   :  { %v5769_v3 = vpack.i.bf16 %v5238_v0, %v3062_v4 }
 0xdaf   :  { %5770 = vrot.lane.b32.xlu0 %v5769_v3, %s5858_s24  ;;  %v5241_v30 = vpop.f32.mrb[72].mxu0 }
 0xdb0   :  { %v3072_v20 = vpop.f32.mrb[73].mxu0 }
 0xdb1   :  { %3101 = vrot.lane.b32.xlu1 %v3072_v20, %s5859_s1 }
 0xdb3   :  { %v5244_v37 = vpop.f32.mrb[74].mxu0 }
 0xdb4   :  { %v3082_v11 = vpop.f32.mrb[75].mxu0 }
 0xdb5   :  { %3103 = vrot.lane.b32.xlu1 %v5241_v30, %s5859_s1  ;;  %3109 = vrot.lane.b32.xlu0 %v3082_v11, %s5848_s7  ;;  %v3293_v11 = vld [vmem:[%s8532_s17 + $0x10] sm:$0xff] }
 0xdb9   :  { %3111 = vrot.lane.b32.xlu0 %v5244_v37, %s5848_s7  ;;  %v3292_v37 = vld [vmem:[%s8532_s17 + $0x8] sm:$0xff] }
 0xe21   :  { %v5771_v32 = vpop.permute.xlu0 %5770 }
 0xe22   :  { %v5772_v25 = vunpack.i.l.bf16 %v5771_v32  ;;  %v5773_v10 = vunpack.i.h.bf16 %v5771_v32  ;;  %v3294_v32 = vld [vmem:[%s8532_s17 + $0x18] sm:$0xff] }
 0xe23   :  { %v3102_v48 = vpop.permute.xlu1 %3101 }
 0xe24   :  { %v3115_v2 = vsel %vm2824_vm14, %v3052_v6, %v5772_v25  ;;  %v3116_v39 = vsel %vm2824_vm14, %v5235_v7, %v5773_v10  ;;  %v3408_v25 = vld [vmem:[%s8533_s18 + $0x8] sm:$0xff]  ;;  %v3409_v10 = vld [vmem:[%s8533_s18 + $0x10] sm:$0xff] }
 0xe25   :  { %v3118_v14 = vsel %vm3117_vm11, %v3115_v2, %v3102_v48  ;;  %v3407_v2 = vld [vmem:[%s8533_s18] sm:$0xff] }
 0xe27   :  { %v3110_v59 = vpop.permute.xlu0 %3109  ;;  %v3104_v33 = vpop.permute.xlu1 %3103 }
 0xe28   :  { %v3120_v28 = vsel %vm932_vm4, %v3102_v48, %v3110_v59  ;;  %v3119_v13 = vsel %vm3117_vm11, %v3116_v39, %v3104_v33  ;;  %v3410_v48 = vld [vmem:[%s8533_s18 + $0x18] sm:$0xff]  ;;  %v3413_v39 = vld [vmem:[%s8533_s18 + $0x30] sm:$0xff] }
 0xe29   :  { %4646 = vmatprep.mubr.msk.f32.mxu1 %vm3144_vm3, %v3120_v28  ;;  %v5380_v59 = vpack.c.bf16 %v3410_v48, %v3408_v25  ;;  %v3412_v28 = vld [vmem:[%s8533_s18 + $0x28] sm:$0xff]  ;;  %v3447_v25 = vld [vmem:[%s8533_s18 + $0x140] sm:$0xff]  ;;  %v3449_v48 = vld [vmem:[%s8533_s18 + $0x150] sm:$0xff] }
 0xe2a   :  { %3216 = vmatmul.mubr.f32.vlgmr.msra.gmra.mrb[72].mxu1 %v3118_v14  ;;  %v3414_v14 = vld [vmem:[%s8533_s18 + $0x38] sm:$0xff] }
 0xe2b   :  { %v3112_v41 = vpop.permute.xlu0 %3111  ;;  %5381 = vmatprep.subr.bf16.mxu0 %v5380_v59  ;;  %v3454_v59 = vld [vmem:[%s8533_s18 + $0x178] sm:$0xff] }
 0xe2c   :  { %v3121_v60 = vsel %vm932_vm4, %v3104_v33, %v3112_v41  ;;  %v5382_v33 = vpack.c.bf16 %v3409_v10, %v3407_v2  ;;  %v5384_v41 = vpack.c.bf16 %v3414_v14, %v3412_v28  ;;  %v3452_v2 = vld [vmem:[%s8533_s18 + $0x168] sm:$0xff]  ;;  %v5422_v10 = vpack.c.bf16 %v3449_v48, %v3447_v25  ;;  %v3451_v14 = vld [vmem:[%s8533_s18 + $0x160] sm:$0xff]  ;;  %v3485_v48 = vld [vmem:[%s8533_s18 + $0x270] sm:$0xff] }
 0xe2d   :  { %4647 = vmatprep.mubr.msk.f32.mxu1 %vm3144_vm3, %v3121_v60  ;;  %v3411_v60 = vld [vmem:[%s8533_s18 + $0x20] sm:$0xff]  ;;  %v5424_v28 = vpack.c.bf16 %v3454_v59, %v3452_v2  ;;  %v3488_v2 = vld [vmem:[%s8533_s18 + $0x288] sm:$0xff]  ;;  %v3490_v59 = vld [vmem:[%s8533_s18 + $0x298] sm:$0xff] }
 0xe2e   :  { %3221 = vmatmul.mubr.f32.gmra.mrb[74].mxu1 %v3119_v13  ;;  %v3416_v13 = vld [vmem:[%s8533_s18 + $0x48] sm:$0xff]  ;;  %5383 = vmatpush1.bf16.msra.mxu0 %v5382_v33  ;;  %v3453_v33 = vld [vmem:[%s8533_s18 + $0x170] sm:$0xff]  ;;  %v3483_v25 = vld [vmem:[%s8533_s18 + $0x260] sm:$0xff] }
 0xe2f   :  { %5249 = vmatprep.mubr.msk.f32.mxu1 %vm2035_vm9, %v3291_v57  ;;  %5385 = vmatprep.subr.bf16.mxu0 %v5384_v41  ;;  %v3437_v57 = vld [vmem:[%s8533_s18 + $0xf0] sm:$0xff]  ;;  %v3456_v41 = vld [vmem:[%s8533_s18 + $0x188] sm:$0xff] }
 0xefd   :  { %v3217_v61 = vpop.f32.mrb[72].mxu1 }
 0xefe   :  { %v3219_v58 = vpop.f32.mrb[73].mxu1  ;;  %v3226_v35 = vsel %vm3117_vm11, %v3217_v61, 0.0 }
 0xeff   :  { %3227 = vadd.xlane.f32.xlu1 %v3226_v35  ;;  %v5386_v58 = vpack.c.bf16 %v3413_v39, %v3411_v60  ;;  %v3458_v60 = vld [vmem:[%s8533_s18 + $0x198] sm:$0xff]  ;;  %v5426_v39 = vpack.c.bf16 %v3453_v33, %v3451_v14  ;;  %v3487_v14 = vld [vmem:[%s8533_s18 + $0x280] sm:$0xff]  ;;  %v3489_v33 = vld [vmem:[%s8533_s18 + $0x290] sm:$0xff] }
 0xf01   :  { %v3222_v23 = vpop.f32.mrb[74].mxu1  ;;  %5387 = vmatpush1.bf16.msra.mxu0 %v5386_v58  ;;  %v3457_v58 = vld [vmem:[%s8533_s18 + $0x190] sm:$0xff] }
 0xf02   :  { %v3224_v1 = vpop.f32.mrb[75].mxu1  ;;  %v3229_v43 = vsel %vm3117_vm11, %v3222_v23, 0.0 }
 0xf03   :  { %3230 = vadd.xlane.f32.xlu0 %v3229_v43  ;;  %v3417_v1 = vld [vmem:[%s8533_s18 + $0x50] sm:$0xff]  ;;  %v3420_v43 = vld [vmem:[%s8533_s18 + $0x68] sm:$0xff] }
 0xf8c   :  { %v3228_v40 = vpop.xlane.xlu1 %3227 }
 0xf8d   :  { %v3233_v51 = vmul.f32 0.011363637, %v3228_v40  ;;  %v3422_v40 = vld [vmem:[%s8533_s18 + $0x78] sm:$0xff] }
 0xf8f   :  { %v3235_v45 = vsub.f32 %v3217_v61, %v3233_v51 }
 0xf90   :  { %v3231_v50 = vpop.xlane.xlu0 %3230 }
 0xf91   :  { %v3237_v52 = vmul.f32 %v3235_v45, %v3235_v45  ;;  %v3234_v12 = vmul.f32 0.011363637, %v3231_v50  ;;  %v5392_v45 = vpack.c.bf16 %v3422_v40, %v3420_v43  ;;  %v3419_v50 = vld [vmem:[%s8533_s18 + $0x60] sm:$0xff] }
 0xf92   :  { %v3459_v40 = vld [vmem:[%s8533_s18 + $0x1a0] sm:$0xff] }
 0xf93   :  { %v3236_v5 = vsub.f32 %v3222_v23, %v3234_v12  ;;  %v3239_v21 = vsel %vm3117_vm11, %v3237_v52, 0.0  ;;  %v3421_v52 = vld [vmem:[%s8533_s18 + $0x70] sm:$0xff] }
 0xf94   :  { %3240 = vadd.xlane.f32.xlu0 %v3239_v21  ;;  %v5394_v21 = vpack.c.bf16 %v3421_v52, %v3419_v50  ;;  %v3466_v50 = vld [vmem:[%s8533_s18 + $0x1d8] sm:$0xff] }
 0xf95   :  { %v3238_v22 = vmul.f32 %v3236_v5, %v3236_v5  ;;  %v3426_v5 = vld [vmem:[%s8533_s18 + $0x98] sm:$0xff] }
 0xf97   :  { %v3242_v56 = vsel %vm3117_vm11, %v3238_v22, 0.0 }
 0xf98   :  { %3243 = vadd.xlane.f32.xlu1 %v3242_v56  ;;  %v3423_v56 = vld [vmem:[%s8533_s18 + $0x80] sm:$0xff] }
0x1021   :  { %v3241_v15 = vpop.xlane.xlu0 %3240 }
0x1022   :  { %v3245_v47 = vmul.f32 0.011363637, %v3241_v15  ;;  %v3425_v15 = vld [vmem:[%s8533_s18 + $0x90] sm:$0xff] }
0x1024   :  { %v3249_v63 = vadd.f32 1e-05, %v3245_v47  ;;  %v3428_v47 = vld [vmem:[%s8533_s18 + $0xa8] sm:$0xff] }
0x1025   :  { %v3244_v29 = vpop.xlane.xlu1 %3243 }
0x1026   :  { %5835 = vrsqrt.f32 %v3249_v63  ;;  %v3246_v44 = vmul.f32 0.011363637, %v3244_v29  ;;  %v3430_v63 = vld [vmem:[%s8533_s18 + $0xb8] sm:$0xff]  ;;  %v5398_v29 = vpack.c.bf16 %v3425_v15, %v3423_v56  ;;  %v3468_v56 = vld [vmem:[%s8533_s18 + $0x1e8] sm:$0xff] }
0x1027   :  { %v3470_v15 = vld [vmem:[%s8533_s18 + $0x1f8] sm:$0xff] }
0x1028   :  { %v3250_v24 = vadd.f32 1e-05, %v3246_v44  ;;  %v5400_v44 = vpack.c.bf16 %v3430_v63, %v3428_v47  ;;  %v3467_v47 = vld [vmem:[%s8533_s18 + $0x1e0] sm:$0xff]  ;;  %v5440_v63 = vpack.c.bf16 %v3470_v15, %v3468_v56 }
0x102a   :  { %5837 = vrsqrt.f32 %v3250_v24  ;;  %v3427_v24 = vld [vmem:[%s8533_s18 + $0xa0] sm:$0xff] }
0x1030   :  { %v5836_v55 = vpop.eup %5835 }
0x1031   :  { %v3253_v49 = vmul.f32 %v5836_v55, %v3247_v54  ;;  %v3429_v54 = vld [vmem:[%s8533_s18 + $0xb0] sm:$0xff]  ;;  %v3432_v55 = vld [vmem:[%s8533_s18 + $0xc8] sm:$0xff] }
0x1033   :  { %3263 = vperm.xlu0 %5767, %v3253_v49   ;;  %v3257_v34 = vmul.f32 %v3253_v49, %v3233_v51  ;;  %v3434_v49 = vld [vmem:[%s8533_s18 + $0xd8] sm:$0xff] }
0x1034   :  { %v5838_v42 = vpop.eup %5837 }
0x1035   :  { %v3254_v18 = vmul.f32 %v5838_v42, %v3248_v17  ;;  %v3259_v53 = vsub.f32 %v3255_v31, %v3257_v34  ;;  %v5402_v17 = vpack.c.bf16 %v3429_v54, %v3427_v24  ;;  %v5404_v42 = vpack.c.bf16 %v3434_v49, %v3432_v55  ;;  %v3433_v34 = vld [vmem:[%s8533_s18 + $0xd0] sm:$0xff]  ;;  %v3438_v31 = vld [vmem:[%s8533_s18 + $0xf8] sm:$0xff]  ;;  %v3472_v24 = vld [vmem:[%s8533_s18 + $0x208] sm:$0xff] }
0x1036   :  { %v3474_v54 = vld [vmem:[%s8533_s18 + $0x218] sm:$0xff] }
0x1037   :  { %3268 = vperm.xlu1 %5768, %v3254_v18   ;;  %v3258_v19 = vmul.f32 %v3254_v18, %v3234_v12  ;;  %v3424_v12 = vld [vmem:[%s8533_s18 + $0x88] sm:$0xff]  ;;  %v3431_v18 = vld [vmem:[%s8533_s18 + $0xc0] sm:$0xff]  ;;  %v5444_v55 = vpack.c.bf16 %v3474_v54, %v3472_v24 }
0x1038   :  { %v5396_v22 = vpack.c.bf16 %v3426_v5, %v3424_v12  ;;  %v3463_v5 = vld [vmem:[%s8533_s18 + $0x1c0] sm:$0xff] }
0x1039   :  { %v3260_v27 = vsub.f32 %v3256_v38, %v3258_v19  ;;  %v3436_v38 = vld [vmem:[%s8533_s18 + $0xe8] sm:$0xff]  ;;  %v5406_v19 = vpack.c.bf16 %v3433_v34, %v3431_v18  ;;  %v3471_v34 = vld [vmem:[%s8533_s18 + $0x200] sm:$0xff] }
0x103b   :  { %3280 = vperm.xlu0 %5767, %v3260_v27   ;;  %3275 = vperm.xlu1 %5768, %v3259_v53   ;;  %v5408_v27 = vpack.c.bf16 %v3438_v31, %v3436_v38  ;;  %v3435_v53 = vld [vmem:[%s8533_s18 + $0xe0] sm:$0xff]  ;;  %v3473_v38 = vld [vmem:[%s8533_s18 + $0x210] sm:$0xff]  ;;  %v3476_v31 = vld [vmem:[%s8533_s18 + $0x228] sm:$0xff] }
0x10b2   :  { %v3264_v8 = vpop.permute.xlu0 %3263 }
0x10b3   :  { %v3271_v46 = vmul.f32 %v3264_v8, %v3217_v61  ;;  %v3418_v61 = vld [vmem:[%s8533_s18 + $0x58] sm:$0xff]  ;;  %v3440_v8 = vld [vmem:[%s8533_s18 + $0x108] sm:$0xff] }
0x10b4   :  { %v5388_v35 = vpack.c.bf16 %v3418_v61, %v3416_v13  ;;  %v5428_v13 = vpack.c.bf16 %v3458_v60, %v3456_v41  ;;  %v3455_v61 = vld [vmem:[%s8533_s18 + $0x180] sm:$0xff]  ;;  %v3492_v41 = vld [vmem:[%s8533_s18 + $0x2a8] sm:$0xff]  ;;  %v3494_v60 = vld [vmem:[%s8533_s18 + $0x2b8] sm:$0xff] }
0x10b6   :  { %v3269_v16 = vpop.permute.xlu1 %3268  ;;  %5389 = vmatprep.subr.bf16.mxu0 %v5388_v35  ;;  %v3460_v35 = vld [vmem:[%s8533_s18 + $0x1a8] sm:$0xff] }
0x10b7   :  { %v3272_v36 = vmul.f32 %v3269_v16, %v3222_v23  ;;  %v3415_v23 = vld [vmem:[%s8533_s18 + $0x40] sm:$0xff]  ;;  %v3442_v16 = vld [vmem:[%s8533_s18 + $0x118] sm:$0xff] }
0x10b8   :  { %v5390_v51 = vpack.c.bf16 %v3417_v1, %v3415_v23  ;;  %v3462_v23 = vld [vmem:[%s8533_s18 + $0x1b8] sm:$0xff]  ;;  %v5430_v1 = vpack.c.bf16 %v3457_v58, %v3455_v61  ;;  %v3491_v61 = vld [vmem:[%s8533_s18 + $0x2a0] sm:$0xff]  ;;  %v3493_v58 = vld [vmem:[%s8533_s18 + $0x2b0] sm:$0xff] }
0x10b9   :  { %v5432_v43 = vpack.c.bf16 %v3462_v23, %v3460_v35  ;;  %v5466_v35 = vpack.c.bf16 %v3493_v58, %v3491_v61  ;;  %v3843_v61 = vld [vmem:[%s8537_s22 + $0xc8] sm:$0xff]  ;;  %v3846_v58 = vld [vmem:[%s8537_s22 + $0xe0] sm:$0xff] }
0x10ba   :  { %v3281_v26 = vpop.permute.xlu0 %3280  ;;  %v3276_v62 = vpop.permute.xlu1 %3275  ;;  %5391 = vmatpush1.bf16.msra.mxu0 %v5390_v51  ;;  %v3461_v51 = vld [vmem:[%s8533_s18 + $0x1b0] sm:$0xff] }
0x10bb   :  { %v3284_v7 = vadd.f32 %v3281_v26, %v3272_v36  ;;  %v3283_v6 = vadd.f32 %v3276_v62, %v3271_v46  ;;  %5393 = vmatprep.subr.bf16.mxu0 %v5392_v45  ;;  %v5410_v46 = vpack.c.bf16 %v3437_v57, %v3435_v53  ;;  %v5412_v36 = vpack.c.bf16 %v3442_v16, %v3440_v8  ;;  %v3439_v26 = vld [vmem:[%s8533_s18 + $0x100] sm:$0xff]  ;;  %v3441_v62 = vld [vmem:[%s8533_s18 + $0x110] sm:$0xff]  ;;  %v3464_v45 = vld [vmem:[%s8533_s18 + $0x1c8] sm:$0xff] }
0x10bc   :  { %v5434_v52 = vpack.c.bf16 %v3461_v51, %v3459_v40  ;;  %v5436_v12 = vpack.c.bf16 %v3466_v50, %v3464_v45  ;;  %v5446_v57 = vpack.c.bf16 %v3473_v38, %v3471_v34 }
0x10bd   :  { %vm3286_vm4 = vcmp.gt.f32.partialorder %v3284_v7, 0.0  ;;  %v3288_v0 = vmul.f32 0.2, %v3284_v7  ;;  %vm3285_vm6 = vcmp.gt.f32.partialorder %v3283_v6, 0.0  ;;  %v3287_v4 = vmul.f32 0.2, %v3283_v6 }
0x10be   :  { %5395 = vmatpush1.bf16.msra.mxu0 %v5394_v21  ;;  %v3465_v21 = vld [vmem:[%s8533_s18 + $0x1d0] sm:$0xff] }
0x10bf   :  { %v3289_v3 = vsel %vm3285_vm6, %v3283_v6, %v3287_v4  ;;  %v3290_v30 = vsel %vm3286_vm4, %v3284_v7, %v3288_v0  ;;  %5397 = vmatprep.subr.bf16.mxu0 %v5396_v22  ;;  %v3444_v7 = vld [vmem:[%s8533_s18 + $0x128] sm:$0xff]  ;;  %v3446_v6 = vld [vmem:[%s8533_s18 + $0x138] sm:$0xff]  ;;  %v5414_v0 = vpack.c.bf16 %v3441_v62, %v3439_v26  ;;  %v5438_v22 = vpack.c.bf16 %v3465_v21, %v3463_v5 }
0x10c0   :  { %v5376_v20 = vpack.c.bf16 %v3290_v30, %v3289_v3  ;;  %v5416_v4 = vpack.c.bf16 %v3446_v6, %v3444_v7  ;;  %v3443_v3 = vld [vmem:[%s8533_s18 + $0x120] sm:$0xff]  ;;  %v3445_v30 = vld [vmem:[%s8533_s18 + $0x130] sm:$0xff]  ;;  %v3480_v62 = vld [vmem:[%s8533_s18 + $0x248] sm:$0xff] }
0x10c1   :  { %v3482_v7 = vld [vmem:[%s8533_s18 + $0x258] sm:$0xff] }
0x10c2   :  { %5377 = vmatprep.subr.bf16.mxu1 %v5376_v20  ;;  %5399 = vmatpush1.bf16.msra.mxu0 %v5398_v29  ;;  %v3469_v29 = vld [vmem:[%s8533_s18 + $0x1f0] sm:$0xff] }
0x10c3   :  { %5379 = vmatpush3.bf16.msra.mxu1 %v5376_v20  ;;  %5401 = vmatprep.subr.bf16.mxu0 %v5400_v44  ;;  %v3448_v20 = vld [vmem:[%s8533_s18 + $0x148] sm:$0xff]  ;;  %v5442_v44 = vpack.c.bf16 %v3469_v29, %v3467_v47 }
0x10c6   :  { %5250 = vmatmul.mubr.msk.f32.vlgmr.msra.gmra.mrb[76].mxu1 %vm2035_vm9, %v3292_v37  ;;  %5403 = vmatpush1.bf16.msra.mxu0 %v5402_v17  ;;  %v3450_v37 = vld [vmem:[%s8533_s18 + $0x158] sm:$0xff] }
0x10c7   :  { %5252 = vmatprep.mubr.msk.f32.mxu1 %vm2035_vm9, %v3293_v11  ;;  %5405 = vmatprep.subr.bf16.mxu0 %v5404_v42  ;;  %v5418_v11 = vpack.c.bf16 %v3445_v30, %v3443_v3  ;;  %v3479_v3 = vld [vmem:[%s8533_s18 + $0x240] sm:$0xff]  ;;  %v3481_v30 = vld [vmem:[%s8533_s18 + $0x250] sm:$0xff] }
0x10ca   :  { %5253 = vmatmul.mubr.msk.f32.gmra.mrb[78].mxu1 %vm2035_vm9, %v3294_v32  ;;  %5407 = vmatpush1.bf16.msra.mxu0 %v5406_v19  ;;  %v5420_v32 = vpack.c.bf16 %v3450_v37, %v3448_v20  ;;  %v3478_v19 = vld [vmem:[%s8533_s18 + $0x238] sm:$0xff]  ;;  %v3484_v20 = vld [vmem:[%s8533_s18 + $0x268] sm:$0xff] }
0x10cb   :  { %5409 = vmatprep.subr.bf16.mxu0 %v5408_v27  ;;  %v5448_v16 = vpack.c.bf16 %v3478_v19, %v3476_v31  ;;  %v3486_v37 = vld [vmem:[%s8533_s18 + $0x278] sm:$0xff] }
0x10ce   :  { %5411 = vmatpush1.bf16.msra.mxu0 %v5410_v46  ;;  %v3475_v46 = vld [vmem:[%s8533_s18 + $0x220] sm:$0xff] }
0x10cf   :  { %5413 = vmatprep.subr.bf16.mxu0 %v5412_v36  ;;  %v3477_v36 = vld [vmem:[%s8533_s18 + $0x230] sm:$0xff] }
0x10d0   :  { %v5450_v6 = vpack.c.bf16 %v3477_v36, %v3475_v46  ;;  %v3684_v46 = vld [vmem:[%s8536_s21 + $0x8] sm:$0xff]  ;;  %v3685_v36 = vld [vmem:[%s8536_s21 + $0x10] sm:$0xff] }
0x10d2   :  { %5415 = vmatpush1.bf16.msra.mxu0 %v5414_v0  ;;  %v5861_v0 = vmov 0.0  }
0x10d3   :  { %5417 = vmatprep.subr.bf16.mxu0 %v5416_v4  ;;  %v5452_v4 = vpack.c.bf16 %v3482_v7, %v3480_v62  ;;  %v3819_v62 = vld [vmem:[%s8537_s22 + $0x8] sm:$0xff]  ;;  %v3822_v7 = vld [vmem:[%s8537_s22 + $0x20] sm:$0xff] }
0x10d6   :  { %5419 = vmatpush1.bf16.msra.mxu0 %v5418_v11  ;;  %v5454_v11 = vpack.c.bf16 %v3481_v30, %v3479_v3  ;;  %v3825_v3 = vld [vmem:[%s8537_s22 + $0x38] sm:$0xff]  ;;  %v3828_v30 = vld [vmem:[%s8537_s22 + $0x50] sm:$0xff] }
0x10d7   :  { %5421 = vmatprep.subr.bf16.mxu0 %v5420_v32  ;;  %v5456_v32 = vpack.c.bf16 %v3486_v37, %v3484_v20  ;;  %v5472_v37 = vpack.c.bf16 %v3828_v30, %v3825_v3  ;;  %v3860_v30 = vld [vmem:[%s8537_s22 + $0x150] sm:$0xff] }
0x10da   :  { %5423 = vmatpush1.bf16.msra.mxu0 %v5422_v10  ;;  %v5458_v10 = vpack.c.bf16 %v3485_v48, %v3483_v25  ;;  %v3831_v25 = vld [vmem:[%s8537_s22 + $0x68] sm:$0xff]  ;;  %v3834_v48 = vld [vmem:[%s8537_s22 + $0x80] sm:$0xff] }
0x10db   :  { %5425 = vmatprep.subr.bf16.mxu0 %v5424_v28  ;;  %v5460_v28 = vpack.c.bf16 %v3490_v59, %v3488_v2  ;;  %v5476_v59 = vpack.c.bf16 %v3834_v48, %v3831_v25  ;;  %v3844_v48 = vld [vmem:[%s8537_s22 + $0xd0] sm:$0xff] }
0x10de   :  { %5427 = vmatpush1.bf16.msra.mxu0 %v5426_v39  ;;  %v5462_v39 = vpack.c.bf16 %v3489_v33, %v3487_v14  ;;  %v3837_v14 = vld [vmem:[%s8537_s22 + $0x98] sm:$0xff]  ;;  %v3840_v33 = vld [vmem:[%s8537_s22 + $0xb0] sm:$0xff] }
0x10df   :  { %5429 = vmatprep.subr.bf16.mxu0 %v5428_v13  ;;  %v5464_v13 = vpack.c.bf16 %v3494_v60, %v3492_v41  ;;  %v5480_v60 = vpack.c.bf16 %v3840_v33, %v3837_v14  ;;  %v3866_v33 = vld [vmem:[%s8537_s22 + $0x180] sm:$0xff] }
0x10e2   :  { %5431 = vmatpush1.bf16.msra.mxu0 %v5430_v1 }
0x10e3   :  { %5433 = vmatprep.subr.bf16.mxu0 %v5432_v43 }
0x10e6   :  { %5435 = vmatpush1.bf16.msra.mxu0 %v5434_v52 }
0x10e7   :  { %5437 = vmatprep.subr.bf16.mxu0 %v5436_v12 }
0x10ea   :  { %5439 = vmatpush1.bf16.msra.mxu0 %v5438_v22 }
0x10eb   :  { %5441 = vmatprep.subr.bf16.mxu0 %v5440_v63 }
0x10ee   :  { %5443 = vmatpush1.bf16.msra.mxu0 %v5442_v44  ;;  %v3656_v44 = vld [vmem:[%s8534_s19] sm:$0xff] }
0x10ef   :  { %5445 = vmatprep.subr.bf16.mxu0 %v5444_v55  ;;  %v3660_v55 = vld [vmem:[%s8535_s20] sm:$0xff] }
0x1199   :  { %v5251_v49 = vpop.f32.mrb[76].mxu1 }
0x119a   :  { %3393 = vrot.lane.b32.xlu1 %v5251_v49, %s5859_s1  ;;  %v3373_v17 = vpop.f32.mrb[77].mxu1 }
0x119d   :  { %v5254_v42 = vpop.f32.mrb[78].mxu1 }
0x119e   :  { %v3383_v18 = vpop.f32.mrb[79].mxu1  ;;  %3401 = vrot.lane.b32.xlu1 %v5254_v42, %s5851_s3 }
0x119f   :  { %3397 = vrot.lane.b32.xlu0 %v3383_v18, %s5860_s8 }
0x120c   :  { %v3394_v27 = vpop.permute.xlu1 %3393 }
0x120d   :  { %v3404_v26 = vsel %vm3117_vm11, %v3373_v17, %v3394_v27 }
0x1210   :  { %v3402_v23 = vpop.permute.xlu1 %3401 }
0x1211   :  { %v3398_v53 = vpop.permute.xlu0 %3397 }
0x1212   :  { %v3405_v8 = vsel %vm3144_vm3, %v3394_v27, %v3398_v53  ;;  %v3406_v1 = vsel %vm967_vm5, %v3398_v53, %v3402_v23  ;;  %v3871_v23 = vld [vmem:[%s8537_s22 + $0x1a8] sm:$0xff] }
0x1213   :  { %3563 = vmatprep.mubr.f32.mxu0 %v3405_v8 }
0x1214   :  { %3564 = vmatmul.mubr.f32.vlgmr.msra.gmra.mrb[76].mxu0 %v3404_v26  ;;  %v3686_v26 = vld [vmem:[%s8536_s21 + $0x18] sm:$0xff] }
0x1215   :  { %5447 = vmatpush1.bf16.msra.mxu0 %v5446_v57  ;;  %3634 = vmatprep.mubr.f32.mxu0 %v5861_v0 }
0x1216   :  { %5449 = vmatprep.subr.bf16.mxu0 %v5448_v16  ;;  %v3683_v16 = vld [vmem:[%s8536_s21] sm:$0xff] }
0x1219   :  { %5451 = vmatpush1.bf16.msra.mxu0 %v5450_v6  ;;  %v3818_v6 = vld [vmem:[%s8537_s22] sm:$0xff] }
0x121a   :  { %5453 = vmatprep.subr.bf16.mxu0 %v5452_v4  ;;  %v5468_v4 = vpack.c.bf16 %v3822_v7, %v3819_v62  ;;  %v3838_v62 = vld [vmem:[%s8537_s22 + $0xa0] sm:$0xff]  ;;  %v3841_v7 = vld [vmem:[%s8537_s22 + $0xb8] sm:$0xff] }
0x121c   :  { %5469 = vmatprep.subr.bf16.mxu1 %v5468_v4  ;;  %v3892_v4 = vld [vmem:[%s8537_s22 + $0x250] sm:$0xff] }
0x121d   :  { %5455 = vmatpush1.bf16.msra.mxu0 %v5454_v11  ;;  %v3824_v11 = vld [vmem:[%s8537_s22 + $0x30] sm:$0xff] }
0x121e   :  { %5457 = vmatprep.subr.bf16.mxu0 %v5456_v32  ;;  %v3827_v32 = vld [vmem:[%s8537_s22 + $0x48] sm:$0xff] }
0x121f   :  { %v5474_v2 = vpack.c.bf16 %v3827_v32, %v3824_v11  ;;  %v3867_v32 = vld [vmem:[%s8537_s22 + $0x188] sm:$0xff] }
0x1221   :  { %5459 = vmatpush1.bf16.msra.mxu0 %v5458_v10  ;;  %v3830_v10 = vld [vmem:[%s8537_s22 + $0x60] sm:$0xff] }
0x1222   :  { %5461 = vmatprep.subr.bf16.mxu0 %v5460_v28  ;;  %v3833_v28 = vld [vmem:[%s8537_s22 + $0x78] sm:$0xff] }
0x1223   :  { %v5478_v41 = vpack.c.bf16 %v3833_v28, %v3830_v10  ;;  %v3898_v10 = vld [vmem:[%s8537_s22 + $0x280] sm:$0xff]  ;;  %v3901_v28 = vld [vmem:[%s8537_s22 + $0x298] sm:$0xff] }
0x1225   :  { %5463 = vmatpush1.bf16.msra.mxu0 %v5462_v39  ;;  %v3836_v39 = vld [vmem:[%s8537_s22 + $0x90] sm:$0xff] }
0x1226   :  { %5465 = vmatprep.subr.bf16.mxu0 %v5464_v13  ;;  %v3839_v13 = vld [vmem:[%s8537_s22 + $0xa8] sm:$0xff] }
0x1229   :  { %5467 = vmatpush1.bf16.msra.mxu0 %v5466_v35  ;;  %v3868_v35 = vld [vmem:[%s8537_s22 + $0x190] sm:$0xff] }
0x122c   :  { %4652 = vmatmul.mubr.msk.f32.vlgmr.msra.gmra.mrb[76].mxu0 %vm3495_vm7, %v3406_v1  ;;  %v5482_v1 = vpack.c.bf16 %v3839_v13, %v3836_v39  ;;  %v3873_v13 = vld [vmem:[%s8537_s22 + $0x1b8] sm:$0xff] }
0x122d   :  { %3763 = vmatprep.mubr.f32.mxu0 %v5861_v0 }
0x12ff   :  { %v3636_v43 = vpop.f32.mrb[76].mxu0 }
0x1300   :  { %v3638_v40 = vpop.f32.mrb[77].mxu0 }
0x1301   :  { %v3641_v51 = vsel %vm3144_vm3, %v3638_v40, 0.0 }
0x1302   :  { %v3642_v45 = vadd.f32 %v3641_v51, %v3636_v43  ;;  %v3820_v51 = vld [vmem:[%s8537_s22 + $0x10] sm:$0xff] }
0x1304   :  { %3643 = vadd.xlane.f32.xlu0 %v3642_v45  ;;  %v5484_v45 = vpack.c.bf16 %v3846_v58, %v3843_v61  ;;  %v5664_v61 = vpack.c.bf16 %v3901_v28, %v3898_v10  ;;  %v3850_v58 = vld [vmem:[%s8537_s22 + $0x100] sm:$0xff]  ;;  %v3908_v10 = vld [vmem:[%s8537_s22 + $0x2d0] sm:$0xff]  ;;  %v3911_v28 = vld [vmem:[%s8537_s22 + $0x2e8] sm:$0xff] }
0x1391   :  { %v3644_v50 = vpop.xlane.xlu0 %3643 }
0x1392   :  { %v3646_v52 = vmul.f32 0.0056818184, %v3644_v50  ;;  %v3845_v50 = vld [vmem:[%s8537_s22 + $0xd8] sm:$0xff] }
0x1394   :  { %v3647_v12 = vsub.f32 %v3636_v43, %v3646_v52  ;;  %v3648_v5 = vsub.f32 %v3638_v40, %v3646_v52 }
0x1396   :  { %v3649_v21 = vmul.f32 %v3647_v12, %v3647_v12  ;;  %v3650_v22 = vmul.f32 %v3648_v5, %v3648_v5  ;;  %v3823_v12 = vld [vmem:[%s8537_s22 + $0x28] sm:$0xff]  ;;  %v3852_v5 = vld [vmem:[%s8537_s22 + $0x110] sm:$0xff] }
0x1398   :  { %v3651_v56 = vsel %vm3144_vm3, %v3650_v22, 0.0  ;;  %v3874_v22 = vld [vmem:[%s8537_s22 + $0x1c0] sm:$0xff] }
0x1399   :  { %v3652_v15 = vadd.f32 %v3651_v56, %v3649_v21  ;;  %v5646_v21 = vpack.c.bf16 %v3823_v12, %v3820_v51  ;;  %v3877_v56 = vld [vmem:[%s8537_s22 + $0x1d8] sm:$0xff]  ;;  %v3872_v51 = vld [vmem:[%s8537_s22 + $0x1b0] sm:$0xff]  ;;  %v3879_v12 = vld [vmem:[%s8537_s22 + $0x1e8] sm:$0xff] }
0x139b   :  { %3653 = vadd.xlane.f32.xlu1 %v3652_v15  ;;  %v5648_v15 = vpack.c.bf16 %v3877_v56, %v3874_v22  ;;  %v3859_v22 = vld [vmem:[%s8537_s22 + $0x148] sm:$0xff]  ;;  %v3882_v56 = vld [vmem:[%s8537_s22 + $0x200] sm:$0xff] }
0x1428   :  { %v3654_v47 = vpop.xlane.xlu1 %3653 }
0x1429   :  { %v3655_v63 = vmul.f32 0.0056818184, %v3654_v47  ;;  %v3826_v47 = vld [vmem:[%s8537_s22 + $0x40] sm:$0xff] }
0x142b   :  { %v3657_v29 = vadd.f32 1e-05, %v3655_v63  ;;  %v3829_v63 = vld [vmem:[%s8537_s22 + $0x58] sm:$0xff] }
0x142d   :  { %5839 = vrsqrt.f32 %v3657_v29 }
0x1437   :  { %v5840_v24 = vpop.eup %5839 }
0x1438   :  { %v3659_v54 = vmul.f32 %v5840_v24, %v3656_v44  ;;  %v3848_v44 = vld [vmem:[%s8537_s22 + $0xf0] sm:$0xff]  ;;  %v5650_v24 = vpack.c.bf16 %v3829_v63, %v3826_v47  ;;  %v3913_v47 = vld [vmem:[%s8537_s22 + $0x2f8] sm:$0xff] }
0x143a   :  { %3665 = vperm.xlu0 %5767, %v3659_v54   ;;  %v3661_v49 = vmul.f32 %v3659_v54, %v3646_v52  ;;  %v3849_v52 = vld [vmem:[%s8537_s22 + $0xf8] sm:$0xff]  ;;  %v3880_v54 = vld [vmem:[%s8537_s22 + $0x1f0] sm:$0xff] }
0x143c   :  { %v3662_v17 = vsub.f32 %v3660_v55, %v3661_v49  ;;  %v5488_v55 = vpack.c.bf16 %v3852_v5, %v3849_v52  ;;  %v3851_v49 = vld [vmem:[%s8537_s22 + $0x108] sm:$0xff] }
0x143e   :  { %3672 = vperm.xlu1 %5768, %v3662_v17   ;;  %v3855_v17 = vld [vmem:[%s8537_s22 + $0x128] sm:$0xff] }
0x14b9   :  { %v3666_v42 = vpop.permute.xlu0 %3665 }
0x14ba   :  { %v3668_v18 = vmul.f32 %v3666_v42, %v3636_v43  ;;  %v3669_v34 = vmul.f32 %v3666_v42, %v3638_v40  ;;  %v3842_v43 = vld [vmem:[%s8537_s22 + $0xc0] sm:$0xff]  ;;  %v5644_v40 = vpack.c.bf16 %v3871_v23, %v3868_v35  ;;  %v3883_v42 = vld [vmem:[%s8537_s22 + $0x208] sm:$0xff]  ;;  %v3853_v35 = vld [vmem:[%s8537_s22 + $0x118] sm:$0xff] }
0x14bb   :  { %v5486_v29 = vpack.c.bf16 %v3845_v50, %v3842_v43  ;;  %v3876_v23 = vld [vmem:[%s8537_s22 + $0x1d0] sm:$0xff]  ;;  %v3907_v43 = vld [vmem:[%s8537_s22 + $0x2c8] sm:$0xff]  ;;  %v5666_v50 = vpack.c.bf16 %v3853_v35, %v3850_v58 }
0x14bc   :  { %v5504_v52 = vpack.c.bf16 %v3876_v23, %v3873_v13  ;;  %v3967_v13 = vld [vmem:[%s8537_s22 + $0x4a8] sm:$0xff] }
0x14bd   :  { %v3673_v38 = vpop.permute.xlu1 %3672 }
0x14be   :  { %v3675_v31 = vadd.f32 %v3673_v38, %v3668_v18  ;;  %v3676_v19 = vadd.f32 %v3673_v38, %v3669_v34  ;;  %v3858_v18 = vld [vmem:[%s8537_s22 + $0x140] sm:$0xff]  ;;  %v5652_v34 = vpack.c.bf16 %v3883_v42, %v3880_v54  ;;  %v3832_v38 = vld [vmem:[%s8537_s22 + $0x70] sm:$0xff]  ;;  %v3881_v54 = vld [vmem:[%s8537_s22 + $0x1f8] sm:$0xff] }
0x14bf   :  { %v3885_v42 = vld [vmem:[%s8537_s22 + $0x218] sm:$0xff] }
0x14c0   :  { %v3679_v27 = vmul.f32 0.2, %v3675_v31  ;;  %vm3678_vm8 = vcmp.gt.f32.partialorder %v3676_v19, 0.0  ;;  %v3680_v53 = vmul.f32 0.2, %v3676_v19  ;;  %vm3677_vm10 = vcmp.gt.f32.partialorder %v3675_v31, 0.0 }
0x14c2   :  { %v3682_v57 = vsel %vm3678_vm8, %v3676_v19, %v3680_v53  ;;  %v3681_v8 = vsel %vm3677_vm10, %v3675_v31, %v3679_v27  ;;  %v3835_v31 = vld [vmem:[%s8537_s22 + $0x88] sm:$0xff]  ;;  %v3886_v19 = vld [vmem:[%s8537_s22 + $0x220] sm:$0xff]  ;;  %v3889_v27 = vld [vmem:[%s8537_s22 + $0x238] sm:$0xff]  ;;  %v5490_v53 = vpack.c.bf16 %v3851_v49, %v3848_v44 }
0x14c3   :  { %3699 = vmatprep.subr.mxu0 %v3682_v57  ;;  %v3854_v57 = vld [vmem:[%s8537_s22 + $0x120] sm:$0xff] }
0x14c4   :  { %3700 = vmatpush1.msra.mxu0 %v3681_v8  ;;  %v3857_v8 = vld [vmem:[%s8537_s22 + $0x138] sm:$0xff]  ;;  %v3862_v49 = vld [vmem:[%s8537_s22 + $0x160] sm:$0xff] }
0x14c5   :  { %4653 = vmatmul.mubr.msk.f32.vlgmr.msra.gmra.mrb[78].mxu0 %vm967_vm5, %v3683_v16  ;;  %5645 = vmatprep.subr.bf16.mxu0 %v5644_v40  ;;  %v5654_v16 = vpack.c.bf16 %v3835_v31, %v3832_v38  ;;  %v5494_v3 = vpack.c.bf16 %v3857_v8, %v3854_v57  ;;  %v3894_v57 = vld [vmem:[%s8537_s22 + $0x260] sm:$0xff] }
0x14c6   :  { %3769 = vmatprep.mubr.f32.mxu0 %v5861_v0  ;;  %5647 = vmatpush3.bf16.msra.mxu0 %v5646_v21  ;;  %v3856_v21 = vld [vmem:[%s8537_s22 + $0x130] sm:$0xff] }
0x14c7   :  { %5649 = vmatprep.subr.bf16.mxu0 %v5648_v15  ;;  %v3910_v15 = vld [vmem:[%s8537_s22 + $0x2e0] sm:$0xff]  ;;  %v5670_v44 = vpack.c.bf16 %v3859_v22, %v3856_v21  ;;  %v3919_v21 = vld [vmem:[%s8537_s22 + $0x328] sm:$0xff]  ;;  %v3921_v22 = vld [vmem:[%s8537_s22 + $0x338] sm:$0xff] }
0x14c9   :  { %4654 = vmatmul.mubr.msk.f32.gmra.mrb[80].mxu0 %vm967_vm5, %v3684_v46  ;;  %v5492_v46 = vpack.c.bf16 %v3858_v18, %v3855_v17  ;;  %v3865_v17 = vld [vmem:[%s8537_s22 + $0x178] sm:$0xff]  ;;  %v3888_v18 = vld [vmem:[%s8537_s22 + $0x230] sm:$0xff] }
0x14ca   :  { %3775 = vmatprep.mubr.f32.mxu0 %v5861_v0  ;;  %5651 = vmatpush3.bf16.msra.mxu0 %v5650_v24  ;;  %v5508_v24 = vpack.c.bf16 %v3882_v56, %v3879_v12  ;;  %v5674_v38 = vpack.c.bf16 %v3865_v17, %v3862_v49  ;;  %v5512_v31 = vpack.c.bf16 %v3888_v18, %v3885_v42  ;;  %v3917_v12 = vld [vmem:[%s8537_s22 + $0x318] sm:$0xff]  ;;  %v3924_v56 = vld [vmem:[%s8537_s22 + $0x350] sm:$0xff]  ;;  %v3922_v42 = vld [vmem:[%s8537_s22 + $0x340] sm:$0xff] }
0x14cb   :  { %5653 = vmatprep.subr.bf16.mxu0 %v5652_v34  ;;  %v5536_v49 = vpack.c.bf16 %v3924_v56, %v3921_v22  ;;  %v3925_v18 = vld [vmem:[%s8537_s22 + $0x358] sm:$0xff]  ;;  %v3946_v56 = vld [vmem:[%s8537_s22 + $0x400] sm:$0xff] }
0x14cd   :  { %4655 = vmatmul.mubr.msk.f32.gmra.mrb[82].mxu0 %vm967_vm5, %v3685_v36  ;;  %v3861_v36 = vld [vmem:[%s8537_s22 + $0x158] sm:$0xff] }
0x14ce   :  { %3781 = vmatprep.mubr.f32.mxu0 %v5861_v0  ;;  %v3821_v0 = vld [vmem:[%s8537_s22 + $0x18] sm:$0xff]  ;;  %5655 = vmatpush3.bf16.msra.mxu0 %v5654_v16 }
0x14cf   :  { %v5470_v20 = vpack.c.bf16 %v3821_v0, %v3818_v6  ;;  %v3864_v6 = vld [vmem:[%s8537_s22 + $0x170] sm:$0xff]  ;;  %v3895_v0 = vld [vmem:[%s8537_s22 + $0x268] sm:$0xff] }
0x14d0   :  { %v5496_v11 = vpack.c.bf16 %v3864_v6, %v3861_v36  ;;  %v5660_v25 = vpack.c.bf16 %v3895_v0, %v3892_v4  ;;  %v3893_v36 = vld [vmem:[%s8537_s22 + $0x258] sm:$0xff]  ;;  %v3896_v4 = vld [vmem:[%s8537_s22 + $0x270] sm:$0xff]  ;;  %v3899_v0 = vld [vmem:[%s8537_s22 + $0x288] sm:$0xff] }
0x14d1   :  { %4656 = vmatmul.mubr.msk.f32.gmra.mrb[84].mxu0 %vm967_vm5, %v3686_v26  ;;  %5471 = vmatpush1.bf16.msra.mxu1 %v5470_v20  ;;  %v5656_v26 = vpack.c.bf16 %v3889_v27, %v3886_v19  ;;  %v3863_v20 = vld [vmem:[%s8537_s22 + $0x168] sm:$0xff]  ;;  %v3884_v19 = vld [vmem:[%s8537_s22 + $0x210] sm:$0xff]  ;;  %vm4511_vm5 = vcmask 390144  }
0x14d2   :  { %5473 = vmatprep.subr.bf16.mxu1 %v5472_v37  ;;  %v5658_v37 = vpack.c.bf16 %v3841_v7, %v3838_v62  ;;  %v5498_v14 = vpack.c.bf16 %v3863_v20, %v3860_v30  ;;  %v3887_v27 = vld [vmem:[%s8537_s22 + $0x228] sm:$0xff]  ;;  %v3900_v62 = vld [vmem:[%s8537_s22 + $0x290] sm:$0xff]  ;;  %v3906_v30 = vld [vmem:[%s8537_s22 + $0x2c0] sm:$0xff]  ;;  %v5522_v20 = vpack.c.bf16 %v3899_v0, %v3896_v4 }
0x14d3   :  { %5657 = vmatprep.subr.bf16.mxu0 %v5656_v26  ;;  %v5514_v8 = vpack.c.bf16 %v3887_v27, %v3884_v19  ;;  %v3897_v26 = vld [vmem:[%s8537_s22 + $0x278] sm:$0xff]  ;;  %v3979_v19 = vld [vmem:[%s8537_s22 + $0x508] sm:$0xff] }
0x14d4   :  { %5659 = vmatpush3.bf16.msra.mxu0 %v5658_v37  ;;  %v5520_v6 = vpack.c.bf16 %v3900_v62, %v3897_v26  ;;  %v3931_v26 = vld [vmem:[%s8537_s22 + $0x388] sm:$0xff]  ;;  %v3933_v62 = vld [vmem:[%s8537_s22 + $0x398] sm:$0xff] }
0x14d5   :  { %5475 = vmatpush1.bf16.msra.mxu1 %v5474_v2  ;;  %v3847_v2 = vld [vmem:[%s8537_s22 + $0xe8] sm:$0xff]  ;;  %5661 = vmatprep.subr.bf16.mxu0 %v5660_v25  ;;  %v3909_v25 = vld [vmem:[%s8537_s22 + $0x2d8] sm:$0xff] }
0x14d6   :  { %5477 = vmatprep.subr.bf16.mxu1 %v5476_v59  ;;  %v3870_v59 = vld [vmem:[%s8537_s22 + $0x1a0] sm:$0xff]  ;;  %v3985_v4 = vld [vmem:[%s8537_s22 + $0x538] sm:$0xff] }
0x14d7   :  { %v5500_v39 = vpack.c.bf16 %v3870_v59, %v3867_v32  ;;  %v3905_v32 = vld [vmem:[%s8537_s22 + $0x2b8] sm:$0xff] }
0x14d9   :  { %5479 = vmatpush1.bf16.msra.mxu1 %v5478_v41  ;;  %v3869_v41 = vld [vmem:[%s8537_s22 + $0x198] sm:$0xff] }
0x14da   :  { %5481 = vmatprep.subr.bf16.mxu1 %v5480_v60  ;;  %v5662_v60 = vpack.c.bf16 %v3847_v2, %v3844_v48  ;;  %v5502_v40 = vpack.c.bf16 %v3869_v41, %v3866_v33  ;;  %v3912_v48 = vld [vmem:[%s8537_s22 + $0x2f0] sm:$0xff]  ;;  %v3915_v33 = vld [vmem:[%s8537_s22 + $0x308] sm:$0xff]  ;;  %v3918_v41 = vld [vmem:[%s8537_s22 + $0x320] sm:$0xff] }
0x14db   :  { %v5528_v59 = vpack.c.bf16 %v3912_v48, %v3909_v25 }
0x14dc   :  { %5663 = vmatpush3.bf16.msra.mxu0 %v5662_v60  ;;  %v3964_v60 = vld [vmem:[%s8537_s22 + $0x490] sm:$0xff] }
0x14dd   :  { %5483 = vmatpush1.bf16.msra.mxu1 %v5482_v1  ;;  %v3904_v1 = vld [vmem:[%s8537_s22 + $0x2b0] sm:$0xff]  ;;  %5665 = vmatprep.subr.bf16.mxu0 %v5664_v61  ;;  %v5676_v61 = vpack.c.bf16 %v3967_v13, %v3964_v60  ;;  %v3938_v13 = vld [vmem:[%s8537_s22 + $0x3c0] sm:$0xff] }
0x14de   :  { %5485 = vmatprep.subr.bf16.mxu1 %v5484_v45  ;;  %v3875_v45 = vld [vmem:[%s8537_s22 + $0x1c8] sm:$0xff]  ;;  %v5668_v5 = vpack.c.bf16 %v3907_v43, %v3904_v1 }
0x14df   :  { %v5506_v63 = vpack.c.bf16 %v3875_v45, %v3872_v51 }
0x14e0   :  { %5667 = vmatpush3.bf16.msra.mxu0 %v5666_v50 }
0x14e1   :  { %5487 = vmatpush1.bf16.msra.mxu1 %v5486_v29  ;;  %v3878_v29 = vld [vmem:[%s8537_s22 + $0x1e0] sm:$0xff]  ;;  %5669 = vmatprep.subr.bf16.mxu0 %v5668_v5  ;;  %v3916_v5 = vld [vmem:[%s8537_s22 + $0x310] sm:$0xff] }
0x14e2   :  { %5489 = vmatprep.subr.bf16.mxu1 %v5488_v55  ;;  %v5672_v55 = vpack.c.bf16 %v3913_v47, %v3910_v15  ;;  %v5510_v34 = vpack.c.bf16 %v3881_v54, %v3878_v29  ;;  %v3970_v15 = vld [vmem:[%s8537_s22 + $0x4c0] sm:$0xff]  ;;  %v3973_v47 = vld [vmem:[%s8537_s22 + $0x4d8] sm:$0xff]  ;;  %v3923_v54 = vld [vmem:[%s8537_s22 + $0x348] sm:$0xff] }
0x14e3   :  { %v5680_v17 = vpack.c.bf16 %v3973_v47, %v3970_v15  ;;  %v3949_v15 = vld [vmem:[%s8537_s22 + $0x418] sm:$0xff]  ;;  %v3951_v47 = vld [vmem:[%s8537_s22 + $0x428] sm:$0xff] }
0x14e4   :  { %5671 = vmatpush3.bf16.msra.mxu0 %v5670_v44  ;;  %v5678_v44 = vpack.c.bf16 %v3919_v21, %v3916_v5  ;;  %v3947_v5 = vld [vmem:[%s8537_s22 + $0x408] sm:$0xff] }
0x14e5   :  { %5491 = vmatpush1.bf16.msra.mxu1 %v5490_v53  ;;  %5673 = vmatprep.subr.bf16.mxu0 %v5672_v55  ;;  %v3891_v53 = vld [vmem:[%s8537_s22 + $0x248] sm:$0xff] }
0x14e6   :  { %5493 = vmatprep.subr.bf16.mxu1 %v5492_v46  ;;  %v5516_v16 = vpack.c.bf16 %v3894_v57, %v3891_v53  ;;  %v3890_v46 = vld [vmem:[%s8537_s22 + $0x240] sm:$0xff]  ;;  %v5682_v53 = vpack.c.bf16 %v3925_v18, %v3922_v42 }
0x14e7   :  { %v5518_v7 = vpack.c.bf16 %v3893_v36, %v3890_v46  ;;  %v3926_v57 = vld [vmem:[%s8537_s22 + $0x360] sm:$0xff]  ;;  %v3928_v36 = vld [vmem:[%s8537_s22 + $0x370] sm:$0xff] }
0x14e8   :  { %5675 = vmatpush3.bf16.msra.mxu0 %v5674_v38  ;;  %v3930_v38 = vld [vmem:[%s8537_s22 + $0x380] sm:$0xff] }
0x14e9   :  { %5495 = vmatpush1.bf16.msra.mxu1 %v5494_v3  ;;  %v3903_v3 = vld [vmem:[%s8537_s22 + $0x2a8] sm:$0xff]  ;;  %5677 = vmatprep.subr.bf16.mxu0 %v5676_v61  ;;  %v3941_v61 = vld [vmem:[%s8537_s22 + $0x3d8] sm:$0xff] }
0x14ea   :  { %5497 = vmatprep.subr.bf16.mxu1 %v5496_v11  ;;  %v5524_v37 = vpack.c.bf16 %v3906_v30, %v3903_v3  ;;  %v3902_v11 = vld [vmem:[%s8537_s22 + $0x2a0] sm:$0xff] }
0x14eb   :  { %v5526_v2 = vpack.c.bf16 %v3905_v32, %v3902_v11  ;;  %v3932_v11 = vld [vmem:[%s8537_s22 + $0x390] sm:$0xff]  ;;  %v3935_v32 = vld [vmem:[%s8537_s22 + $0x3a8] sm:$0xff] }
0x14ec   :  { %v5546_v60 = vpack.c.bf16 %v3935_v32, %v3932_v11  ;;  %v3962_v11 = vld [vmem:[%s8537_s22 + $0x480] sm:$0xff] }
0x14ed   :  { %5499 = vmatpush1.bf16.msra.mxu1 %v5498_v14  ;;  %v5530_v14 = vpack.c.bf16 %v3911_v28, %v3908_v10  ;;  %v3939_v10 = vld [vmem:[%s8537_s22 + $0x3c8] sm:$0xff]  ;;  %v3942_v28 = vld [vmem:[%s8537_s22 + $0x3e0] sm:$0xff] }
0x14ee   :  { %5501 = vmatprep.subr.bf16.mxu1 %v5500_v39  ;;  %v5532_v39 = vpack.c.bf16 %v3918_v41, %v3915_v33  ;;  %v3991_v33 = vld [vmem:[%s8537_s22 + $0x568] sm:$0xff] }
0x14f1   :  { %5503 = vmatpush1.bf16.msra.mxu1 %v5502_v40 }
0x14f2   :  { %5505 = vmatprep.subr.bf16.mxu1 %v5504_v52  ;;  %v3914_v52 = vld [vmem:[%s8537_s22 + $0x300] sm:$0xff] }
0x14f3   :  { %v5534_v29 = vpack.c.bf16 %v3917_v12, %v3914_v52  ;;  %v3944_v12 = vld [vmem:[%s8537_s22 + $0x3f0] sm:$0xff] }
0x14f5   :  { %5507 = vmatpush1.bf16.msra.mxu1 %v5506_v63 }
0x14f6   :  { %5509 = vmatprep.subr.bf16.mxu1 %v5508_v24  ;;  %v3920_v24 = vld [vmem:[%s8537_s22 + $0x330] sm:$0xff] }
0x14f7   :  { %v5538_v27 = vpack.c.bf16 %v3923_v54, %v3920_v24  ;;  %v4003_v24 = vld [vmem:[%s8537_s22 + $0x5c8] sm:$0xff]  ;;  %v5554_v54 = vpack.c.bf16 %v3947_v5, %v3944_v12  ;;  %v4024_v12 = vld [vmem:[%s8537_s22 + $0x670] sm:$0xff] }
0x14f8   :  { %v4027_v5 = vld [vmem:[%s8537_s22 + $0x688] sm:$0xff] }
0x14f9   :  { %5511 = vmatpush1.bf16.msra.mxu1 %v5510_v34  ;;  %v3927_v34 = vld [vmem:[%s8537_s22 + $0x368] sm:$0xff] }
0x14fa   :  { %5513 = vmatprep.subr.bf16.mxu1 %v5512_v31  ;;  %v3976_v31 = vld [vmem:[%s8537_s22 + $0x4f0] sm:$0xff] }
0x14fb   :  { %v5684_v46 = vpack.c.bf16 %v3979_v19, %v3976_v31  ;;  %v3957_v31 = vld [vmem:[%s8537_s22 + $0x458] sm:$0xff]  ;;  %v3960_v19 = vld [vmem:[%s8537_s22 + $0x470] sm:$0xff] }
0x14fd   :  { %5515 = vmatpush1.bf16.msra.mxu1 %v5514_v8  ;;  %v3929_v8 = vld [vmem:[%s8537_s22 + $0x378] sm:$0xff] }
0x14fe   :  { %5517 = vmatprep.subr.bf16.mxu1 %v5516_v16  ;;  %v5540_v16 = vpack.c.bf16 %v3930_v38, %v3927_v34  ;;  %v3952_v34 = vld [vmem:[%s8537_s22 + $0x430] sm:$0xff]  ;;  %v3955_v38 = vld [vmem:[%s8537_s22 + $0x448] sm:$0xff] }
0x1501   :  { %5519 = vmatpush1.bf16.msra.mxu1 %v5518_v7  ;;  %v3936_v7 = vld [vmem:[%s8537_s22 + $0x3b0] sm:$0xff] }
0x1502   :  { %5521 = vmatprep.subr.bf16.mxu1 %v5520_v6  ;;  %v3982_v6 = vld [vmem:[%s8537_s22 + $0x520] sm:$0xff]  ;;  %v5544_v25 = vpack.c.bf16 %v3936_v7, %v3933_v62  ;;  %v3961_v7 = vld [vmem:[%s8537_s22 + $0x478] sm:$0xff] }
0x1503   :  { %v5688_v48 = vpack.c.bf16 %v3985_v4, %v3982_v6  ;;  %v3958_v62 = vld [vmem:[%s8537_s22 + $0x460] sm:$0xff]  ;;  %v3963_v6 = vld [vmem:[%s8537_s22 + $0x488] sm:$0xff] }
0x1504   :  { %v3966_v4 = vld [vmem:[%s8537_s22 + $0x4a0] sm:$0xff] }
0x1505   :  { %5523 = vmatpush1.bf16.msra.mxu1 %v5522_v20  ;;  %v5542_v20 = vpack.c.bf16 %v3929_v8, %v3926_v57  ;;  %v5702_v8 = vpack.c.bf16 %v3955_v38, %v3952_v34  ;;  %v5564_v32 = vpack.c.bf16 %v3966_v4, %v3963_v6  ;;  %v3989_v38 = vld [vmem:[%s8537_s22 + $0x558] sm:$0xff]  ;;  %v4002_v6 = vld [vmem:[%s8537_s22 + $0x5c0] sm:$0xff] }
0x1506   :  { %5525 = vmatprep.subr.bf16.mxu1 %v5524_v37  ;;  %v5686_v37 = vpack.c.bf16 %v3931_v26, %v3928_v36  ;;  %v3959_v26 = vld [vmem:[%s8537_s22 + $0x468] sm:$0xff] }
0x1509   :  { %5527 = vmatpush1.bf16.msra.mxu1 %v5526_v2  ;;  %v3934_v2 = vld [vmem:[%s8537_s22 + $0x3a0] sm:$0xff] }
0x150a   :  { %5529 = vmatprep.subr.bf16.mxu1 %v5528_v59  ;;  %v3937_v59 = vld [vmem:[%s8537_s22 + $0x3b8] sm:$0xff] }
0x150d   :  { %5531 = vmatpush1.bf16.msra.mxu1 %v5530_v14  ;;  %v3988_v14 = vld [vmem:[%s8537_s22 + $0x550] sm:$0xff] }
0x150e   :  { %5533 = vmatprep.subr.bf16.mxu1 %v5532_v39  ;;  %v5690_v39 = vpack.c.bf16 %v3937_v59, %v3934_v2  ;;  %v4015_v2 = vld [vmem:[%s8537_s22 + $0x628] sm:$0xff] }
0x1598   :  { %v3765_v58 = vpop.f32.mrb[78].mxu0 }
0x1599   :  { %v3767_v35 = vpop.f32.mrb[79].mxu0 }
0x159c   :  { %v3771_v23 = vpop.f32.mrb[80].mxu0 }
0x159d   :  { %3790 = vrot.lane.b32.xlu0 %v3771_v23, %s5860_s8  ;;  %v3773_v1 = vpop.f32.mrb[81].mxu0  ;;  %v3940_v23 = vld [vmem:[%s8537_s22 + $0x3d0] sm:$0xff] }
0x159e   :  { %3792 = vrot.lane.b32.xlu1 %v3773_v1, %s5860_s8  ;;  %v3943_v1 = vld [vmem:[%s8537_s22 + $0x3e8] sm:$0xff] }
0x159f   :  { %v5694_v52 = vpack.c.bf16 %v3943_v1, %v3940_v23  ;;  %v3975_v23 = vld [vmem:[%s8537_s22 + $0x4e8] sm:$0xff]  ;;  %v3978_v1 = vld [vmem:[%s8537_s22 + $0x500] sm:$0xff] }
0x15a0   :  { %v3777_v43 = vpop.f32.mrb[82].mxu0 }
0x15a1   :  { %v3779_v40 = vpop.f32.mrb[83].mxu0 }
0x15a2   :  { %v5774_v51 = vpack.i.bf16 %v3779_v40, %v3777_v43  ;;  %v3945_v43 = vld [vmem:[%s8537_s22 + $0x3f8] sm:$0xff]  ;;  %v3948_v40 = vld [vmem:[%s8537_s22 + $0x410] sm:$0xff] }
0x15a3   :  { %v5552_v21 = vpack.c.bf16 %v3948_v40, %v3945_v43 }
0x15a4   :  { %5775 = vrot.lane.b32.xlu0 %v5774_v51, %s5862_s16  ;;  %v3783_v45 = vpop.f32.mrb[84].mxu0  ;;  %v3994_v51 = vld [vmem:[%s8537_s22 + $0x580] sm:$0xff] }
0x15a5   :  { %3809 = vrot.lane.b32.xlu1 %v3783_v45, %s5852_s0  ;;  %v3785_v50 = vpop.f32.mrb[85].mxu0  ;;  %v3997_v45 = vld [vmem:[%s8537_s22 + $0x598] sm:$0xff] }
0x15a6   :  { %v5696_v22 = vpack.c.bf16 %v3997_v45, %v3994_v51  ;;  %v3974_v45 = vld [vmem:[%s8537_s22 + $0x4e0] sm:$0xff] }
0x15a8   :  { %3811 = vrot.lane.b32.xlu0 %v3785_v50, %s5852_s0  ;;  %v5550_v50 = vpack.c.bf16 %v3941_v61, %v3938_v13  ;;  %v3971_v61 = vld [vmem:[%s8537_s22 + $0x4c8] sm:$0xff] }
0x160f   :  { %v7986_v63 = vpop.permute.xlu0 %3790 }
0x1610   :  { %v3815_v55 = vsel %vm3144_vm3, %v3767_v35, %v7986_v63  ;;  %v5692_v35 = vpack.c.bf16 %v3991_v33, %v3988_v14  ;;  %v3793_v59 = vpop.permute.xlu1 %3792 }
0x1611   :  { %4148 = vmatprep.mubr.f32.mxu1 %v3815_v55  ;;  %4361 = vmatprep.mubr.f32.mxu0 %v3815_v55  ;;  %v5698_v55 = vpack.c.bf16 %v3949_v15, %v3946_v56  ;;  %v5715_v15 = vpack.c.bf16 %v4027_v5, %v4024_v12 }
0x1612   :  { %4149 = vmatmul.mubr.f32.vlgmr.msra.gmra.mrb[80].mxu1 %v3765_v58  ;;  %4362 = vmatmul.mubr.f32.vlgmr.msra.gmra.mrb[86].mxu0 %v3765_v58  ;;  %v5548_v58 = vpack.c.bf16 %v3942_v28, %v3939_v10  ;;  %v3969_v10 = vld [vmem:[%s8537_s22 + $0x4b8] sm:$0xff]  ;;  %v3972_v28 = vld [vmem:[%s8537_s22 + $0x4d0] sm:$0xff] }
0x1613   :  { %5535 = vmatpush1.bf16.msra.mxu1 %v5534_v29  ;;  %5679 = vmatpush3.bf16.msra.mxu0 %v5678_v44  ;;  %v3954_v29 = vld [vmem:[%s8537_s22 + $0x440] sm:$0xff]  ;;  %v4000_v44 = vld [vmem:[%s8537_s22 + $0x5b0] sm:$0xff]  ;;  %v5568_v13 = vpack.c.bf16 %v3972_v28, %v3969_v10 }
0x1614   :  { %5537 = vmatprep.subr.bf16.mxu1 %v5536_v49  ;;  %5681 = vmatprep.subr.bf16.mxu0 %v5680_v17  ;;  %v3950_v49 = vld [vmem:[%s8537_s22 + $0x420] sm:$0xff]  ;;  %v3953_v17 = vld [vmem:[%s8537_s22 + $0x438] sm:$0xff]  ;;  %v5556_v42 = vpack.c.bf16 %v3954_v29, %v3951_v47  ;;  %v5700_v18 = vpack.c.bf16 %v4003_v24, %v4000_v44  ;;  %v3980_v47 = vld [vmem:[%s8537_s22 + $0x510] sm:$0xff] }
0x1615   :  { %v5558_v57 = vpack.c.bf16 %v3953_v17, %v3950_v49  ;;  %v3983_v44 = vld [vmem:[%s8537_s22 + $0x528] sm:$0xff]  ;;  %v4030_v24 = vld [vmem:[%s8537_s22 + $0x6a0] sm:$0xff] }
0x1616   :  { %v8038_v0 = vpop.permute.xlu0 %5775  ;;  %v3990_v49 = vld [vmem:[%s8537_s22 + $0x560] sm:$0xff]  ;;  %v5578_v17 = vpack.c.bf16 %v3983_v44, %v3980_v47  ;;  %v4069_v47 = vld [vmem:[%s8537_s22 + $0x7d8] sm:$0xff] }
0x1617   :  { %5539 = vmatpush1.bf16.msra.mxu1 %v5538_v27  ;;  %5683 = vmatpush3.bf16.msra.mxu0 %v5682_v53  ;;  %v5778_v3 = vunpack.i.h.bf16 %v8038_v0  ;;  %v5777_v30 = vunpack.i.l.bf16 %v8038_v0  ;;  %v4006_v27 = vld [vmem:[%s8537_s22 + $0x5e0] sm:$0xff]  ;;  %v4009_v53 = vld [vmem:[%s8537_s22 + $0x5f8] sm:$0xff]  ;;  %v8205_v43 = vpop.permute.xlu1 %3809 }
0x1618   :  { %5541 = vmatprep.subr.bf16.mxu1 %v5540_v16  ;;  %5685 = vmatprep.subr.bf16.mxu0 %v5684_v46  ;;  %v3956_v16 = vld [vmem:[%s8537_s22 + $0x450] sm:$0xff]  ;;  %v5560_v46 = vpack.c.bf16 %v3960_v19, %v3957_v31  ;;  %v5704_v36 = vpack.c.bf16 %v4009_v53, %v4006_v27  ;;  %v4039_v19 = vld [vmem:[%s8537_s22 + $0x6e8] sm:$0xff]  ;;  %v3993_v27 = vld [vmem:[%s8537_s22 + $0x578] sm:$0xff] }
0x1619   :  { %v3803_v41 = vsel %vm3495_vm7, %v5777_v30, %v5778_v3  ;;  %v4036_v31 = vld [vmem:[%s8537_s22 + $0x6d0] sm:$0xff]  ;;  %v4026_v44 = vld [vmem:[%s8537_s22 + $0x680] sm:$0xff]  ;;  %v4049_v0 = vld [vmem:[%s8537_s22 + $0x738] sm:$0xff] }
0x161a   :  { %4431 = vmatprep.mubr.f32.mxu0 %v3803_v41  ;;  %4219 = vmatprep.mubr.f32.mxu1 %v3803_v41  ;;  %v3968_v41 = vld [vmem:[%s8537_s22 + $0x4b0] sm:$0xff] }
0x161b   :  { %5543 = vmatpush1.bf16.msra.mxu1 %v5542_v20  ;;  %5687 = vmatpush3.bf16.msra.mxu0 %v5686_v37  ;;  %v5562_v20 = vpack.c.bf16 %v3959_v26, %v3956_v16  ;;  %v5706_v37 = vpack.c.bf16 %v3961_v7, %v3958_v62  ;;  %v3996_v53 = vld [vmem:[%s8537_s22 + $0x590] sm:$0xff]  ;;  %v4042_v26 = vld [vmem:[%s8537_s22 + $0x700] sm:$0xff]  ;;  %v4045_v62 = vld [vmem:[%s8537_s22 + $0x718] sm:$0xff] }
0x161c   :  { %5545 = vmatprep.subr.bf16.mxu1 %v5544_v25  ;;  %5689 = vmatprep.subr.bf16.mxu0 %v5688_v48  ;;  %v3965_v25 = vld [vmem:[%s8537_s22 + $0x498] sm:$0xff]  ;;  %v4012_v48 = vld [vmem:[%s8537_s22 + $0x610] sm:$0xff]  ;;  %v3999_v7 = vld [vmem:[%s8537_s22 + $0x5a8] sm:$0xff] }
0x161d   :  { %v5566_v14 = vpack.c.bf16 %v3965_v25, %v3962_v11  ;;  %v5709_v33 = vpack.c.bf16 %v4015_v2, %v4012_v48  ;;  %v3992_v16 = vld [vmem:[%s8537_s22 + $0x570] sm:$0xff]  ;;  %v5588_v11 = vpack.c.bf16 %v4002_v6, %v3999_v7  ;;  %v4051_v48 = vld [vmem:[%s8537_s22 + $0x748] sm:$0xff]  ;;  %v4005_v2 = vld [vmem:[%s8537_s22 + $0x5d8] sm:$0xff] }
0x161e   :  { %v4048_v25 = vld [vmem:[%s8537_s22 + $0x730] sm:$0xff]  ;;  %v4037_v7 = vld [vmem:[%s8537_s22 + $0x6d8] sm:$0xff] }
0x161f   :  { %5547 = vmatpush1.bf16.msra.mxu1 %v5546_v60  ;;  %5691 = vmatpush3.bf16.msra.mxu0 %v5690_v39  ;;  %v3812_v60 = vpop.permute.xlu0 %3811  ;;  %v3794_v39 = vsel %vm3144_vm3, %v7986_v63, %v3793_v59  ;;  %v4008_v59 = vld [vmem:[%s8537_s22 + $0x5f0] sm:$0xff]  ;;  %v5727_v28 = vpack.c.bf16 %v4051_v48, %v4048_v25  ;;  %v4041_v6 = vld [vmem:[%s8537_s22 + $0x6f8] sm:$0xff]  ;;  %v4047_v25 = vld [vmem:[%s8537_s22 + $0x728] sm:$0xff] }
0x1620   :  { %5549 = vmatprep.subr.bf16.mxu1 %v5548_v58  ;;  %5693 = vmatprep.subr.bf16.mxu0 %v5692_v35  ;;  %v4018_v58 = vld [vmem:[%s8537_s22 + $0x640] sm:$0xff]  ;;  %v4021_v35 = vld [vmem:[%s8537_s22 + $0x658] sm:$0xff]  ;;  %v8197_v63 = vsel %vm3495_vm7, %v3794_v39, %v5777_v30  ;;  %v8210_v40 = vsel %vm2035_vm9, %v8205_v43, %v3812_v60  ;;  %v5570_v30 = vpack.c.bf16 %v3971_v61, %v3968_v41  ;;  %v4007_v41 = vld [vmem:[%s8537_s22 + $0x5e8] sm:$0xff] }
0x1621   :  { %v5712_v51 = vpack.c.bf16 %v4021_v35, %v4018_v58  ;;  %v4054_v60 = vld [vmem:[%s8537_s22 + $0x760] sm:$0xff]  ;;  %v4057_v39 = vld [vmem:[%s8537_s22 + $0x778] sm:$0xff] }
0x1622   :  { %v4014_v61 = vld [vmem:[%s8537_s22 + $0x620] sm:$0xff]  ;;  %v5730_v35 = vpack.c.bf16 %v4057_v39, %v4054_v60  ;;  %v4059_v60 = vld [vmem:[%s8537_s22 + $0x788] sm:$0xff] }
0x1623   :  { %5551 = vmatpush1.bf16.msra.mxu1 %v5550_v50  ;;  %5695 = vmatpush3.bf16.msra.mxu0 %v5694_v52  ;;  %v5572_v50 = vpack.c.bf16 %v3978_v1, %v3975_v23  ;;  %v3977_v52 = vld [vmem:[%s8537_s22 + $0x4f8] sm:$0xff]  ;;  %v4010_v23 = vld [vmem:[%s8537_s22 + $0x600] sm:$0xff] }
0x1624   :  { %5553 = vmatprep.subr.bf16.mxu1 %v5552_v21  ;;  %5697 = vmatprep.subr.bf16.mxu0 %v5696_v22  ;;  %v3981_v21 = vld [vmem:[%s8537_s22 + $0x518] sm:$0xff]  ;;  %v3984_v22 = vld [vmem:[%s8537_s22 + $0x530] sm:$0xff]  ;;  %v5574_v56 = vpack.c.bf16 %v3977_v52, %v3974_v45  ;;  %v4063_v45 = vld [vmem:[%s8537_s22 + $0x7a8] sm:$0xff] }
0x1625   :  { %v5576_v29 = vpack.c.bf16 %v3984_v22, %v3981_v21  ;;  %v4020_v52 = vld [vmem:[%s8537_s22 + $0x650] sm:$0xff]  ;;  %v4050_v48 = vld [vmem:[%s8537_s22 + $0x740] sm:$0xff] }
0x1626   :  { %v4016_v21 = vld [vmem:[%s8537_s22 + $0x630] sm:$0xff]  ;;  %v4062_v39 = vld [vmem:[%s8537_s22 + $0x7a0] sm:$0xff] }
0x1627   :  { %5555 = vmatpush1.bf16.msra.mxu1 %v5554_v54  ;;  %5699 = vmatpush3.bf16.msra.mxu0 %v5698_v55  ;;  %v4033_v54 = vld [vmem:[%s8537_s22 + $0x6b8] sm:$0xff]  ;;  %v3987_v55 = vld [vmem:[%s8537_s22 + $0x548] sm:$0xff] }
0x1628   :  { %5557 = vmatprep.subr.bf16.mxu1 %v5556_v42  ;;  %5701 = vmatprep.subr.bf16.mxu0 %v5700_v18  ;;  %v5718_v42 = vpack.c.bf16 %v4033_v54, %v4030_v24  ;;  %v3986_v18 = vld [vmem:[%s8537_s22 + $0x540] sm:$0xff]  ;;  %v5580_v34 = vpack.c.bf16 %v3990_v49, %v3987_v55 }
0x1629   :  { %v4022_v55 = vld [vmem:[%s8537_s22 + $0x660] sm:$0xff] }
0x162b   :  { %5559 = vmatpush1.bf16.msra.mxu1 %v5558_v57  ;;  %5703 = vmatpush3.bf16.msra.mxu0 %v5702_v8  ;;  %v5582_v57 = vpack.c.bf16 %v3989_v38, %v3986_v18  ;;  %v5721_v8 = vpack.c.bf16 %v4039_v19, %v4036_v31  ;;  %v4029_v18 = vld [vmem:[%s8537_s22 + $0x698] sm:$0xff]  ;;  %v4028_v19 = vld [vmem:[%s8537_s22 + $0x690] sm:$0xff] }
0x162c   :  { %5561 = vmatprep.subr.bf16.mxu1 %v5560_v46  ;;  %5705 = vmatprep.subr.bf16.mxu0 %v5704_v36  ;;  %v5584_v46 = vpack.c.bf16 %v3996_v53, %v3993_v27  ;;  %v3995_v36 = vld [vmem:[%s8537_s22 + $0x588] sm:$0xff] }
0x162d   :  { %v5586_v4 = vpack.c.bf16 %v3995_v36, %v3992_v16  ;;  %v4031_v53 = vld [vmem:[%s8537_s22 + $0x6a8] sm:$0xff]  ;;  %v4038_v16 = vld [vmem:[%s8537_s22 + $0x6e0] sm:$0xff] }
0x162f   :  { %5563 = vmatpush1.bf16.msra.mxu1 %v5562_v20  ;;  %5707 = vmatpush3.bf16.msra.mxu0 %v5706_v37  ;;  %v5724_v20 = vpack.c.bf16 %v4045_v62, %v4042_v26  ;;  %v3998_v37 = vld [vmem:[%s8537_s22 + $0x5a0] sm:$0xff] }
0x1630   :  { %5565 = vmatprep.subr.bf16.mxu1 %v5564_v32  ;;  %5708 = vmatprep.subr.bf16.mxu0 %v5857_v9  ;;  %v4001_v32 = vld [vmem:[%s8537_s22 + $0x5b8] sm:$0xff]  ;;  %v4034_v62 = vld [vmem:[%s8537_s22 + $0x6c0] sm:$0xff] }
0x1631   :  { %v5590_v10 = vpack.c.bf16 %v4001_v32, %v3998_v37  ;;  %v4040_v37 = vld [vmem:[%s8537_s22 + $0x6f0] sm:$0xff]  ;;  %v3817_v32 = vsel %vm2035_vm9, %v5778_v3, %v8205_v43  ;;  %v4053_v3 = vld [vmem:[%s8537_s22 + $0x758] sm:$0xff] }
0x1632   :  { %4432 = vmatmul.mubr.f32.vlgmr.msra.gmra.mrb[88].mxu0 %v8197_v63  ;;  %v4056_v43 = vld [vmem:[%s8537_s22 + $0x770] sm:$0xff] }
0x1633   :  { %5567 = vmatpush1.bf16.msra.mxu1 %v5566_v14  ;;  %5710 = vmatpush1.bf16.msra.mxu0 %v5709_v33  ;;  %v4004_v14 = vld [vmem:[%s8537_s22 + $0x5d0] sm:$0xff]  ;;  %v5592_v33 = vpack.c.bf16 %v4008_v59, %v4005_v2  ;;  %v5620_v59 = vpack.c.bf16 %v4050_v48, %v4047_v25 }
0x1634   :  { %5569 = vmatprep.subr.bf16.mxu1 %v5568_v13  ;;  %5711 = vmatprep.subr.bf16.mxu0 %v5857_v9  ;;  %v4011_v13 = vld [vmem:[%s8537_s22 + $0x608] sm:$0xff]  ;;  %v5594_v58 = vpack.c.bf16 %v4007_v41, %v4004_v14  ;;  %v5624_v14 = vpack.c.bf16 %v4056_v43, %v4053_v3 }
0x1635   :  { %4658 = vmatprep.mubr.msk.f32.mxu0 %vm2460_vm12, %v8210_v40  ;;  %v5596_v1 = vpack.c.bf16 %v4014_v61, %v4011_v13  ;;  %v4055_v41 = vld [vmem:[%s8537_s22 + $0x768] sm:$0xff]  ;;  %v5628_v61 = vpack.c.bf16 %v4062_v39, %v4059_v60 }
0x1637   :  { %5571 = vmatpush1.bf16.msra.mxu1 %v5570_v30  ;;  %5713 = vmatpush1.bf16.msra.mxu0 %v5712_v51  ;;  %v4013_v30 = vld [vmem:[%s8537_s22 + $0x618] sm:$0xff]  ;;  %v4060_v51 = vld [vmem:[%s8537_s22 + $0x790] sm:$0xff] }
0x1638   :  { %5573 = vmatprep.subr.bf16.mxu1 %v5572_v50  ;;  %5714 = vmatprep.subr.bf16.mxu0 %v5857_v9  ;;  %v4017_v50 = vld [vmem:[%s8537_s22 + $0x638] sm:$0xff]  ;;  %v5598_v12 = vpack.c.bf16 %v4013_v30, %v4010_v23  ;;  %v5733_v5 = vpack.c.bf16 %v4063_v45, %v4060_v51  ;;  %v4064_v45 = vld [vmem:[%s8537_s22 + $0x7b0] sm:$0xff] }
0x1639   :  { %v5600_v22 = vpack.c.bf16 %v4020_v52, %v4017_v50  ;;  %v4065_v23 = vld [vmem:[%s8537_s22 + $0x7b8] sm:$0xff]  ;;  %v4067_v50 = vld [vmem:[%s8537_s22 + $0x7c8] sm:$0xff] }
0x163a   :  { %v4071_v52 = vld [vmem:[%s8537_s22 + $0x7e8] sm:$0xff] }
0x163b   :  { %5575 = vmatpush1.bf16.msra.mxu1 %v5574_v56  ;;  %5716 = vmatpush1.bf16.msra.mxu0 %v5715_v15  ;;  %v4019_v56 = vld [vmem:[%s8537_s22 + $0x648] sm:$0xff]  ;;  %v4066_v15 = vld [vmem:[%s8537_s22 + $0x7c0] sm:$0xff] }
0x163c   :  { %5577 = vmatprep.subr.bf16.mxu1 %v5576_v29  ;;  %5717 = vmatprep.subr.bf16.mxu0 %v5857_v9  ;;  %v4023_v29 = vld [vmem:[%s8537_s22 + $0x668] sm:$0xff]  ;;  %v5602_v24 = vpack.c.bf16 %v4019_v56, %v4016_v21  ;;  %v5736_v54 = vpack.c.bf16 %v4069_v47, %v4066_v15  ;;  %v4073_v56 = vld [vmem:[%s8537_s22 + $0x7f8] sm:$0xff]  ;;  %v4080_v47 = vld [vmem:[%s8537_s22 + $0x830] sm:$0xff] }
0x163d   :  { %v5604_v49 = vpack.c.bf16 %v4026_v44, %v4023_v29  ;;  %v4077_v15 = vld [vmem:[%s8537_s22 + $0x818] sm:$0xff] }
0x163e   :  { %v5640_v44 = vpack.c.bf16 %v4080_v47, %v4077_v15 }
0x163f   :  { %5579 = vmatpush1.bf16.msra.mxu1 %v5578_v17  ;;  %5719 = vmatpush1.bf16.msra.mxu0 %v5718_v42  ;;  %v4025_v17 = vld [vmem:[%s8537_s22 + $0x678] sm:$0xff]  ;;  %v4075_v42 = vld [vmem:[%s8537_s22 + $0x808] sm:$0xff] }
0x1640   :  { %5581 = vmatprep.subr.bf16.mxu1 %v5580_v34  ;;  %5720 = vmatprep.subr.bf16.mxu0 %v5857_v9  ;;  %v4032_v34 = vld [vmem:[%s8537_s22 + $0x6b0] sm:$0xff]  ;;  %v5606_v38 = vpack.c.bf16 %v4025_v17, %v4022_v55 }
0x1641   :  { %v5608_v27 = vpack.c.bf16 %v4032_v34, %v4029_v18 }
0x1643   :  { %5583 = vmatpush1.bf16.msra.mxu1 %v5582_v57  ;;  %5722 = vmatpush1.bf16.msra.mxu0 %v5721_v8  ;;  %v4081_v57 = vld [vmem:[%s8537_s22 + $0x838] sm:$0xff]  ;;  %v4035_v8 = vld [vmem:[%s8537_s22 + $0x6c8] sm:$0xff] }
0x1644   :  { %5585 = vmatprep.subr.bf16.mxu1 %v5584_v46  ;;  %5723 = vmatprep.subr.bf16.mxu0 %v5857_v9  ;;  %v5610_v46 = vpack.c.bf16 %v4031_v53, %v4028_v19  ;;  %v5612_v26 = vpack.c.bf16 %v4038_v16, %v4035_v8 }
0x1647   :  { %5587 = vmatpush1.bf16.msra.mxu1 %v5586_v4  ;;  %5725 = vmatpush1.bf16.msra.mxu0 %v5724_v20  ;;  %v4044_v4 = vld [vmem:[%s8537_s22 + $0x710] sm:$0xff] }
0x1648   :  { %5589 = vmatprep.subr.bf16.mxu1 %v5588_v11  ;;  %5726 = vmatprep.subr.bf16.mxu0 %v5857_v9  ;;  %v5616_v20 = vpack.c.bf16 %v4044_v4, %v4041_v6  ;;  %v4043_v11 = vld [vmem:[%s8537_s22 + $0x708] sm:$0xff] }
0x1649   :  { %v5618_v2 = vpack.c.bf16 %v4043_v11, %v4040_v37 }
0x164b   :  { %5591 = vmatpush1.bf16.msra.mxu1 %v5590_v10  ;;  %5728 = vmatpush1.bf16.msra.mxu0 %v5727_v28  ;;  %v4046_v10 = vld [vmem:[%s8537_s22 + $0x720] sm:$0xff] }
0x164c   :  { %5593 = vmatprep.subr.bf16.mxu1 %v5592_v33  ;;  %5729 = vmatprep.subr.bf16.mxu0 %v5857_v9  ;;  %v5622_v28 = vpack.c.bf16 %v4049_v0, %v4046_v10  ;;  %v4052_v33 = vld [vmem:[%s8537_s22 + $0x750] sm:$0xff] }
0x164d   :  { %v5626_v13 = vpack.c.bf16 %v4055_v41, %v4052_v33 }
0x164f   :  { %5595 = vmatpush1.bf16.msra.mxu1 %v5594_v58  ;;  %5731 = vmatpush1.bf16.msra.mxu0 %v5730_v35  ;;  %v4058_v58 = vld [vmem:[%s8537_s22 + $0x780] sm:$0xff]  ;;  %v4061_v35 = vld [vmem:[%s8537_s22 + $0x798] sm:$0xff] }
0x1650   :  { %5597 = vmatprep.subr.bf16.mxu1 %v5596_v1  ;;  %5732 = vmatprep.subr.bf16.mxu0 %v5857_v9  ;;  %v4068_v1 = vld [vmem:[%s8537_s22 + $0x7d0] sm:$0xff]  ;;  %v5630_v30 = vpack.c.bf16 %v4061_v35, %v4058_v58 }
0x1651   :  { %v5632_v51 = vpack.c.bf16 %v4068_v1, %v4065_v23 }
0x1652   :  { %4220 = vmatmul.mubr.f32.vlgmr.msra.gmra.mrb[80].mxu1 %v8197_v63  ;;  %v4072_v63 = vld [vmem:[%s8537_s22 + $0x7f0] sm:$0xff] }
0x1653   :  { %5599 = vmatpush1.bf16.msra.mxu1 %v5598_v12  ;;  %5734 = vmatpush1.bf16.msra.mxu0 %v5733_v5  ;;  %v5739_v31 = vpack.c.bf16 %v4075_v42, %v4072_v63  ;;  %v4074_v12 = vld [vmem:[%s8537_s22 + $0x800] sm:$0xff]  ;;  %v5634_v5 = vpack.c.bf16 %v4067_v50, %v4064_v45 }
0x1654   :  { %5601 = vmatprep.subr.bf16.mxu1 %v5600_v22  ;;  %5735 = vmatprep.subr.bf16.mxu0 %v5857_v9  ;;  %v5636_v21 = vpack.c.bf16 %v4074_v12, %v4071_v52  ;;  %v4070_v22 = vld [vmem:[%s8537_s22 + $0x7e0] sm:$0xff] }
0x1655   :  { %4657 = vmatprep.mubr.msk.f32.mxu1 %vm2460_vm12, %v8210_v40  ;;  %v4078_v40 = vld [vmem:[%s8537_s22 + $0x820] sm:$0xff]  ;;  %v5638_v29 = vpack.c.bf16 %v4073_v56, %v4070_v22 }
0x1656   :  { %v5742_v36 = vpack.c.bf16 %v4081_v57, %v4078_v40 }
0x1657   :  { %5603 = vmatpush1.bf16.msra.mxu1 %v5602_v24  ;;  %5737 = vmatpush1.bf16.msra.mxu0 %v5736_v54  ;;  %v4076_v24 = vld [vmem:[%s8537_s22 + $0x810] sm:$0xff]  ;;  %v4079_v54 = vld [vmem:[%s8537_s22 + $0x828] sm:$0xff] }
0x1658   :  { %5605 = vmatprep.subr.bf16.mxu1 %v5604_v49  ;;  %5738 = vmatprep.subr.bf16.mxu0 %v5857_v9  ;;  %v5642_v55 = vpack.c.bf16 %v4079_v54, %v4076_v24 }
0x165b   :  { %5607 = vmatpush1.bf16.msra.mxu1 %v5606_v38  ;;  %5740 = vmatpush1.bf16.msra.mxu0 %v5739_v31 }
0x165c   :  { %5609 = vmatprep.subr.bf16.mxu1 %v5608_v27  ;;  %5741 = vmatprep.subr.bf16.mxu0 %v5857_v9  ;;  %v5614_v9 = vpack.c.bf16 %v4037_v7, %v4034_v62 }
0x165f   :  { %5611 = vmatpush1.bf16.msra.mxu1 %v5610_v46  ;;  %5743 = vmatpush1.bf16.msra.mxu0 %v5742_v36 }
0x1660   :  { %5613 = vmatprep.subr.bf16.mxu1 %v5612_v26 }
0x1662   :  { %4502 = vmatmul.mubr.f32.vlgmr.msra.gmra.mrb[90].mxu0 %v3817_v32 }
0x1663   :  { %5615 = vmatpush1.bf16.msra.mxu1 %v5614_v9 }
0x1664   :  { %5617 = vmatprep.subr.bf16.mxu1 %v5616_v20 }
0x1667   :  { %5619 = vmatpush1.bf16.msra.mxu1 %v5618_v2 }
0x1668   :  { %5621 = vmatprep.subr.bf16.mxu1 %v5620_v59 }
0x166b   :  { %5623 = vmatpush1.bf16.msra.mxu1 %v5622_v28 }
0x166c   :  { %5625 = vmatprep.subr.bf16.mxu1 %v5624_v14 }
0x166f   :  { %5627 = vmatpush1.bf16.msra.mxu1 %v5626_v13 }
0x1670   :  { %5629 = vmatprep.subr.bf16.mxu1 %v5628_v61 }
0x1673   :  { %5631 = vmatpush1.bf16.msra.mxu1 %v5630_v30 }
0x1674   :  { %5633 = vmatprep.subr.bf16.mxu1 %v5632_v51 }
0x1677   :  { %5635 = vmatpush1.bf16.msra.mxu1 %v5634_v5 }
0x1678   :  { %5637 = vmatprep.subr.bf16.mxu1 %v5636_v21 }
0x167b   :  { %5639 = vmatpush1.bf16.msra.mxu1 %v5638_v29 }
0x167c   :  { %5641 = vmatprep.subr.bf16.mxu1 %v5640_v44 }
0x167f   :  { %5643 = vmatpush1.bf16.msra.mxu1 %v5642_v55 }
0x1682   :  { %4291 = vmatmul.mubr.f32.vlgmr.msra.gmra.mrb[80].mxu1 %v3817_v32 }
0x16e5   :  { %v4893_v49 = vpop.f32.mrb[86].mxu0 }
0x16e6   :  { %v4894_v17 = vpop.f32.mrb[87].mxu0 }
0x16e7   :  { %v4895_v63 = vadd.f32 %v4894_v17, %v4893_v49 }
0x1705   :  { %v4928_v42 = vpop.f32.mrb[88].mxu0 }
0x1706   :  { %v4929_v18 = vpop.f32.mrb[89].mxu0 }
0x1707   :  { %v4930_v34 = vadd.f32 %v4929_v18, %v4928_v42 }
0x1709   :  { %v4434_v38 = vadd.f32 %v4930_v34, %v4895_v63 }
0x1735   :  { %v4503_v31 = vpop.f32.mrb[90].mxu0 }
0x1736   :  { %v4504_v19 = vadd.f32 %v4503_v31, %v4434_v38  ;;  %v4505_v27 = vpop.f32.mrb[91].mxu0 }
0x1738   :  { %5841 = vtanh.f32 %v4504_v19 }
0x1742   :  { %v5842_v53 = vpop.eup %5841 }
0x1743   :  { %4517 = vrot.lane.b32.xlu0 %v5842_v53, %s5863_s25 }
0x1755   :  { %v4292_v40 = vpop.f32.mrb[80].mxu1 }
0x1756   :  { %5843 = vtanh.f32 %v4292_v40  ;;  %v4294_v57 = vpop.f32.mrb[81].mxu1 }
0x1757   :  { %5845 = vtanh.f32 %v4294_v57 }
0x1760   :  { %v5844_v8 = vpop.eup %5843 }
0x1761   :  { %v5846_v16 = vpop.eup %5845  ;;  %4510 = vst [vmem:[%s8538_s23] sm:$0x3f] %v5844_v8 }
0x1762   :  { %4515 = vrot.lane.b32.xlu1 %v5846_v16, %s5863_s25  ;;  %4512 = vst.msk [vmem:[%s8538_s23 + $0x8] sm:$0x3f] %vm4511_vm5, %v5846_v16 }
0x17b5   :  { %v4518_v46 = vpop.permute.xlu0 %4517 }
0x17b6   :  { %4660 = vst.msk [vmem:[%s8538_s23 + $0x18] sm:$0x3f] %vm4511_vm5, %v4518_v46 }
0x17d4   :  { %v4516_v36 = vpop.permute.xlu1 %4515 }
0x17d5   :  { %v4519_v26 = vsel %vm2726_vm13, %v4516_v36, %v4518_v46 }
0x17d6   :  { %4659 = vst [vmem:[%s8538_s23 + $0x10] sm:$0x3f] %v4519_v26 }

</bundles_post_ra>
